<compile_context>
chip_gen: v5e
topology: v5e:2x2
jax: 0.10.0
libtpu: 0.0.40
codegen_flags: <defaults>
</compile_context>

<pallas_src>
import functools

import jax
import jax.numpy as jnp
from jax.experimental import pallas as pl
from jax.experimental.pallas import tpu as pltpu

D_IN, D_HID, D_OUT = 768, 768, 512   # fixed by nn.Linear(768,768) / nn.Linear(768,512)


def _round_up(n, m):
    return ((n + m - 1) // m) * m


def _mlp_head_kernel(x_ref, w1_ref, b1_ref, w2_ref, b2_ref, o_ref):
    """One batch tile: ReLU(x @ W1 + b1) @ W2 + b2, bf16 MXU, f32 accumulate."""
    x = x_ref[...].astype(jnp.bfloat16)                                # [TB, 768]
    h = jnp.dot(x, w1_ref[...], preferred_element_type=jnp.float32)    # MXU, f32 acc
    h = jnp.maximum(h + b1_ref[...], 0.0)                              # bias + ReLU (VPU)
    o = jnp.dot(h.astype(jnp.bfloat16), w2_ref[...],
                preferred_element_type=jnp.float32)                    # MXU, f32 acc
    o_ref[...] = (o + b2_ref[...]).astype(o_ref.dtype)                 # fused epilogue


@functools.partial(jax.jit, static_argnames=("tile_b",))
def mlp_head(feats, w1_bf16, b1, w2_bf16, b2, *, tile_b=256):
    """feats: [B, 768] f32 -> [B, 512] f32.

    Weights (w1_bf16: [768,768] bf16, w2_bf16: [768,512] bf16) are fetched once
    and stay VMEM-resident; activation tiles of TILE_B rows are pipelined.
    """
    B = feats.shape[0]
    tb = min(tile_b, _round_up(B, 8))          # tile >= 8 sublanes, <= 256 rows
    Bp = _round_up(B, tb)                      # pad batch to a tile multiple
    if Bp != B:
        feats = jnp.pad(feats, ((0, Bp - B), (0, 0)))
    grid = (Bp // tb,)

    flops = 2 * Bp * (D_IN * D_HID + D_HID * D_OUT)
    bytes_accessed = (
        w1_bf16.size * 2 + w2_bf16.size * 2            # bf16 weights
        + (b1.size + b2.size) * 4                      # f32 biases
        + Bp * D_IN * 4 + Bp * D_OUT * 4               # f32 activations in/out
    )

    out = pl.pallas_call(
        _mlp_head_kernel,
        out_shape=jax.ShapeDtypeStruct((Bp, D_OUT), feats.dtype),
        grid=grid,
        in_specs=[
            pl.BlockSpec((tb, D_IN), lambda i: (i, 0)),       # activations (tiled)
            pl.BlockSpec((D_IN, D_HID), lambda i: (0, 0)),    # W1 bf16 (~1.1 MiB, resident)
            pl.BlockSpec((1, D_HID), lambda i: (0, 0)),       # b1 f32
            pl.BlockSpec((D_HID, D_OUT), lambda i: (0, 0)),   # W2 bf16 (~0.75 MiB, resident)
            pl.BlockSpec((1, D_OUT), lambda i: (0, 0)),       # b2 f32
        ],
        out_specs=pl.BlockSpec((tb, D_OUT), lambda i: (i, 0)),
        compiler_params=pltpu.CompilerParams(
            dimension_semantics=("parallel",)),               # 2 TCs on v7x
        cost_estimate=pl.CostEstimate(
            flops=flops, transcendentals=0, bytes_accessed=bytes_accessed),
    )(feats, w1_bf16, b1, w2_bf16, b2)

    return out[:B] if Bp != B else out


def init_mlp_params(key):
    """Deterministic stand-in for the .pth MLP weights (PyTorch Linear init).

    Weights are stored [in_features, out_features] (kernel computes x @ W + b,
    equivalent to PyTorch's x @ W_t.T + b) and cast to bf16 for the kernel.
    """
    k1, k2, k3, k4 = jax.random.split(key, 4)
    lim1 = 1.0 / jnp.sqrt(jnp.float32(D_IN))
    lim2 = 1.0 / jnp.sqrt(jnp.float32(D_HID))
    w1 = jax.random.uniform(k1, (D_IN, D_HID), jnp.float32, -lim1, lim1)
    b1 = jax.random.uniform(k2, (1, D_HID), jnp.float32, -lim1, lim1)
    w2 = jax.random.uniform(k3, (D_HID, D_OUT), jnp.float32, -lim2, lim2)
    b2 = jax.random.uniform(k4, (1, D_OUT), jnp.float32, -lim2, lim2)
    # TODO(synk): on v7x-only serving, quantize W1/W2 to fp8 with per-column
    # scales for another 2x on weight-DMA bytes.
    return w1.astype(jnp.bfloat16), b1, w2.astype(jnp.bfloat16), b2


def image_encoder_forward(x_image, clip_features, mlp_params):
    # TODO(synk): pretrained CLIP ViT-L/14 backbone (get_image_features) has no
    # self-contained Pallas equivalent (external checkpoint); we consume
    # stand-in [B, 768] features that mirror its output contract.
    del x_image  # shape/layout documented only; backbone not reimplemented
    w1, b1, w2, b2 = mlp_params
    return mlp_head(clip_features, w1, b1, w2, b2)


if __name__ == "__main__":
    key = jax.random.PRNGKey(0)
    k_img, k_feat, k_mlp = jax.random.split(key, 3)

    B = 2
    # Nominal module input: a batch of images, NCHW (what CLIP's processor
    # would produce: [B, 3, 224, 224] float32).
    x_image = jax.random.normal(k_img, (B, 3, 224, 224), jnp.float32)
    # Stand-in CLIP image features ([B, 768] f32), deterministic.
    clip_features = jax.random.normal(k_feat, (B, D_IN), jnp.float32)

    mlp_params = init_mlp_params(k_mlp)

    out = image_encoder_forward(x_image, clip_features, mlp_params)
    out = jax.block_until_ready(out)
    assert out.shape == (B, D_OUT) and out.dtype == jnp.float32

    # Pure-JAX reference for the MLP head using the same bf16-rounded weights
    # (f32 math), then a looser sanity check against full-f32 weights.
    w1_bf, b1, w2_bf, b2 = mlp_params
    x_bf = clip_features.astype(jnp.bfloat16).astype(jnp.float32)
    w1f, w2f = w1_bf.astype(jnp.float32), w2_bf.astype(jnp.float32)
    h_ref = jnp.maximum(x_bf @ w1f + b1, 0.0)
    ref = h_ref.astype(jnp.bfloat16).astype(jnp.float32) @ w2f + b2
    assert jnp.allclose(out, ref, atol=1e-2, rtol=1e-2), "mismatch vs bf16 reference"

    ref_f32 = jnp.maximum(clip_features @ w1f + b1, 0.0) @ w2f + b2
    assert jnp.allclose(out, ref_f32, atol=5e-2, rtol=5e-2), "mismatch vs f32 reference"

    print("KERNEL_OK")
</pallas_src>

<mosaic_0001>
module attributes {stable_mosaic.version = 11 : i64} {
  func.func @_mlp_head_kernel(%arg0: i32, %arg1: memref<8x768xf32, #tpu.memory_space<vmem>>, %arg2: memref<768x768xbf16, #tpu.memory_space<vmem>>, %arg3: memref<1x768xf32, #tpu.memory_space<vmem>>, %arg4: memref<768x512xbf16, #tpu.memory_space<vmem>>, %arg5: memref<1x512xf32, #tpu.memory_space<vmem>>, %arg6: memref<8x512xf32, #tpu.memory_space<vmem>>) attributes {dimension_semantics = [#tpu.dimension_semantics<parallel>], iteration_bounds = array<i64: 1>, scalar_prefetch = 0 : i64, scratch_operands = 0 : i64, tpu.core_type = #tpu.core_type<tc>, window_params = [{transform_indices = @transform_0, window_bounds = array<i64: 8, 768>}, {pipeline_mode = #tpu.pipeline_mode<synchronous>, transform_indices = @transform_1, window_bounds = array<i64: 768, 768>}, {pipeline_mode = #tpu.pipeline_mode<synchronous>, transform_indices = @transform_2, window_bounds = array<i64: 1, 768>}, {pipeline_mode = #tpu.pipeline_mode<synchronous>, transform_indices = @transform_3, window_bounds = array<i64: 768, 512>}, {pipeline_mode = #tpu.pipeline_mode<synchronous>, transform_indices = @transform_4, window_bounds = array<i64: 1, 512>}, {transform_indices = @transform_5, window_bounds = array<i64: 8, 512>}]} {
    %c0 = arith.constant 0 : index
    %c0_0 = arith.constant 0 : index
    %0 = vector.load %arg1[%c0, %c0_0] : memref<8x768xf32, #tpu.memory_space<vmem>>, vector<8x768xf32>
    %1 = arith.truncf %0 : vector<8x768xf32> to vector<8x768xbf16>
    %c0_1 = arith.constant 0 : index
    %c0_2 = arith.constant 0 : index
    %2 = vector.load %arg2[%c0_1, %c0_2] : memref<768x768xbf16, #tpu.memory_space<vmem>>, vector<768x768xbf16>
    %cst = arith.constant dense<0.000000e+00> : vector<8x768xf32>
    %3 = tpu.matmul %1, %2, %cst {dimension_numbers = #tpu.dot_dimension_numbers<[1], [0], [0], [1], [0, 0, 1, 1], [], []>} : vector<8x768xbf16>, vector<768x768xbf16>, vector<8x768xf32> -> vector<8x768xf32>
    %c0_3 = arith.constant 0 : index
    %c0_4 = arith.constant 0 : index
    %4 = vector.load %arg3[%c0_3, %c0_4] : memref<1x768xf32, #tpu.memory_space<vmem>>, vector<1x768xf32>
    %5 = vector.broadcast %4 : vector<1x768xf32> to vector<8x768xf32>
    %6 = arith.addf %3, %5 : vector<8x768xf32>
    %cst_5 = arith.constant 0.000000e+00 : f32
    %7 = vector.broadcast %cst_5 : f32 to vector<8x768xf32>
    %8 = arith.maximumf %6, %7 : vector<8x768xf32>
    %9 = arith.truncf %8 : vector<8x768xf32> to vector<8x768xbf16>
    %c0_6 = arith.constant 0 : index
    %c0_7 = arith.constant 0 : index
    %10 = vector.load %arg4[%c0_6, %c0_7] : memref<768x512xbf16, #tpu.memory_space<vmem>>, vector<768x512xbf16>
    %cst_8 = arith.constant dense<0.000000e+00> : vector<8x512xf32>
    %11 = tpu.matmul %9, %10, %cst_8 {dimension_numbers = #tpu.dot_dimension_numbers<[1], [0], [0], [1], [0, 0, 1, 1], [], []>} : vector<8x768xbf16>, vector<768x512xbf16>, vector<8x512xf32> -> vector<8x512xf32>
    %c0_9 = arith.constant 0 : index
    %c0_10 = arith.constant 0 : index
    %12 = vector.load %arg5[%c0_9, %c0_10] : memref<1x512xf32, #tpu.memory_space<vmem>>, vector<1x512xf32>
    %13 = vector.broadcast %12 : vector<1x512xf32> to vector<8x512xf32>
    %14 = arith.addf %11, %13 : vector<8x512xf32>
    %c0_11 = arith.constant 0 : index
    %c0_12 = arith.constant 0 : index
    %15 = vector.load %arg6[%c0_11, %c0_12] : memref<8x512xf32, #tpu.memory_space<vmem>>, vector<8x512xf32>
    tpu.vector_store %arg6[%c0_11, %c0_12], %14 {strides = array<i32>} : memref<8x512xf32, #tpu.memory_space<vmem>>, vector<8x512xf32>,
    return
  }
  func.func @transform_0(%arg0: i32) -> (i32, i32) {
    %c0_i32 = arith.constant 0 : i32
    %c0_i32_0 = arith.constant 0 : i32
    return %arg0, %c0_i32 : i32, i32
  }
  func.func @transform_1(%arg0: i32) -> (i32, i32) {
    %c0_i32 = arith.constant 0 : i32
    %c0_i32_0 = arith.constant 0 : i32
    %c0_i32_1 = arith.constant 0 : i32
    return %c0_i32, %c0_i32_0 : i32, i32
  }
  func.func @transform_2(%arg0: i32) -> (i32, i32) {
    %c0_i32 = arith.constant 0 : i32
    %c0_i32_0 = arith.constant 0 : i32
    %c0_i32_1 = arith.constant 0 : i32
    return %c0_i32, %c0_i32_0 : i32, i32
  }
  func.func @transform_3(%arg0: i32) -> (i32, i32) {
    %c0_i32 = arith.constant 0 : i32
    %c0_i32_0 = arith.constant 0 : i32
    %c0_i32_1 = arith.constant 0 : i32
    return %c0_i32, %c0_i32_0 : i32, i32
  }
  func.func @transform_4(%arg0: i32) -> (i32, i32) {
    %c0_i32 = arith.constant 0 : i32
    %c0_i32_0 = arith.constant 0 : i32
    %c0_i32_1 = arith.constant 0 : i32
    return %c0_i32, %c0_i32_0 : i32, i32
  }
  func.func @transform_5(%arg0: i32) -> (i32, i32) {
    %c0_i32 = arith.constant 0 : i32
    %c0_i32_0 = arith.constant 0 : i32
    return %arg0, %c0_i32 : i32, i32
  }
}

</mosaic_0001>

<bundles_post_ra>
// kernel: mlp_head.1
= control target key start
LH: loop header
LB: loop body
LE: loop exit
PB: predicated region body
PF: predicated region fallthrough
CT: control target
= control target key end

     0   :  { %10 = vsyncpa [#allocation3], 0  ;;  %s6546_s0 = inlined_call_operand.vmem [shape: f32[8,768], index: 0, kind: input, shape index: {}]   ;;  %s6547_s1 = inlined_call_operand.hbm [shape: bf16[768,768], index: 1, kind: input, shape index: {}]   ;;  %s6548_s2 = inlined_call_operand.hbm [shape: f32[1,768], index: 2, kind: input, shape index: {}]   ;;  %s6549_s3 = inlined_call_operand.hbm [shape: bf16[768,512], index: 3, kind: input, shape index: {}]   ;;  %s6550_s4 = inlined_call_operand.hbm [shape: f32[1,512], index: 4, kind: input, shape index: {}]   ;;  %s6551_s5 = inlined_call_operand.vmem [shape: f32[8,512], index: 5, kind: output, shape index: {}]  }
   0x1   :  { %11 = vsyncpa [#allocation5], 0  ;;  %s33_s20 = sshll.u32 %s6548_s2, 4  ;;  %s34_s20 = int_to_ptr.hbm [resolvable:$true] %s33_s20 }
   0x2   :  { %12 = vsyncpa [#allocation8], 0  ;;  %s6310_s21 = smov [#allocation4]   ;;  %s19_s25 = sshll.u32 %s6547_s1, 4  ;;  %s20_s25 = int_to_ptr.hbm [resolvable:$true] %s19_s25 }
   0x3   :  { %s35_s22 = sshll.u32 %s6310_s21, 4  ;;  %s6311_s26 = smov [#allocation2]   ;;  %s36_s22 = int_to_ptr.vmem [resolvable:$true] %s35_s22 }
   0x4   :  { %38 = dma.hbm_to_vmem [thread:$0]  %s34_s20, 96, %s36_s22, [#allocation5]  }
   0x5   :  { %s21_s27 = sshll.u32 %s6311_s26, 4  ;;  %s6312_s28 = smov 384   ;;  %s22_s27 = int_to_ptr.vmem [resolvable:$true] %s21_s27 }
   0x6   :  { %s6313_s29 = smov 24   ;;  %s43_s2 = sshll.u32 %s6549_s3, 4  ;;  %s44_s2 = int_to_ptr.hbm [resolvable:$true] %s43_s2 }
   0x7   :  { %27 = dma.hbm_to_vmem [thread:$0]  %s20_s25, 36864, %s22_s27, [#allocation3], %s6312_s28, %s6312_s28, %s6313_s29  }
   0x8   :  { %s6314_s7 = smov [#allocation6]   ;;  %s57_s1 = sshll.u32 %s6550_s4, 4  ;;  %s58_s1 = int_to_ptr.hbm [resolvable:$true] %s57_s1 }
   0x9   :  { %s45_s8 = sshll.u32 %s6314_s7, 4  ;;  %s6315_s11 = smov 256   ;;  %s46_s8 = int_to_ptr.vmem [resolvable:$true] %s45_s8 }
   0xa   :  { %s6316_s12 = smov 16   ;;  %s6317_s13 = smov [#allocation7]  }
   0xb   :  { %51 = dma.hbm_to_vmem [thread:$0]  %s44_s2, 24576, %s46_s8, [#allocation5], %s6315_s11, %s6315_s11, %s6316_s12  }
   0xc   :  { %s59_s14 = sshll.u32 %s6317_s13, 4  ;;  %s60_s14 = int_to_ptr.vmem [resolvable:$true] %s59_s14 }
   0xd   :  { %62 = dma.hbm_to_vmem [thread:$0]  %s58_s1, 64, %s60_s14, [#allocation8]  }
   0xe   :  { %6304 = dma.done.wait [#allocation3], 36864  }
   0xf   :  { %6305 = vsyncadd [#allocation3], 4294930432 }
  0x10   :  { %6306 = dma.done.wait [#allocation5], 24672  }
  0x11   :  { %6307 = vsyncadd [#allocation5], 4294942624 }
  0x12   :  { %6308 = dma.done.wait [#allocation8], 64  }
  0x13   :  { %6309 = vsyncadd [#allocation8], 4294967232  ;;  %v3968_v0 = vld [vmem:[#allocation2 + $0x150] sm:$0xf]  ;;  %v5763_v1 = vld [vmem:[#allocation2 + $0x164] sm:$0xf0] }
  0x14   :  { %v4160_v2 = vld [vmem:[#allocation2 + $0x2d0] sm:$0xf]  ;;  %v3969_v3 = vor.u32 %v5763_v1, %v3968_v0  ;;  %v5811_v4 = vld [vmem:[#allocation2 + $0x2e4] sm:$0xf0]  ;;  %v3944_v11 = vld [vmem:[#allocation2 + $0x120] sm:$0xf] }
  0x15   :  { %v4352_v5 = vld [vmem:[#allocation2 + $0x450] sm:$0xf]  ;;  %v5859_v6 = vld [vmem:[#allocation2 + $0x464] sm:$0xf0]  ;;  %v4161_v7 = vor.u32 %v5811_v4, %v4160_v2  ;;  %v5757_v13 = vld [vmem:[#allocation2 + $0x134] sm:$0xf0] }
  0x16   :  { %v4353_v8 = vor.u32 %v5859_v6, %v4352_v5  ;;  %v4544_v9 = vld [vmem:[#allocation2 + $0x5d0] sm:$0xf]  ;;  %v5907_v10 = vld [vmem:[#allocation2 + $0x5e4] sm:$0xf0]  ;;  %1833 = vmatpush.bf16.msra.mxu0 %v3969_v3  ;;  %v4136_v14 = vld [vmem:[#allocation2 + $0x2a0] sm:$0xf]  ;;  %v3945_v16 = vor.u32 %v5757_v13, %v3944_v11 }
  0x17   :  { %v4545_v12 = vor.u32 %v5907_v10, %v4544_v9  ;;  %v5805_v15 = vld [vmem:[#allocation2 + $0x2b4] sm:$0xf0]  ;;  %1846 = vmatpush.bf16.msra.mxu1 %v4161_v7  ;;  %v4328_v18 = vld [vmem:[#allocation2 + $0x420] sm:$0xf]  ;;  %v3920_v23 = vld [vmem:[#allocation2 + $0xf0] sm:$0xf] }
  0x18   :  { %1859 = vmatpush.bf16.msra.mxu2 %v4353_v8  ;;  %v4137_v17 = vor.u32 %v5805_v15, %v4136_v14  ;;  %v5853_v19 = vld [vmem:[#allocation2 + $0x434] sm:$0xf0]  ;;  %v4520_v20 = vld [vmem:[#allocation2 + $0x5a0] sm:$0xf]  ;;  %v5751_v24 = vld [vmem:[#allocation2 + $0x104] sm:$0xf0] }
  0x19   :  { %1872 = vmatpush.bf16.msra.mxu3 %v4545_v12  ;;  %v4329_v21 = vor.u32 %v5853_v19, %v4328_v18  ;;  %v5901_v22 = vld [vmem:[#allocation2 + $0x5b4] sm:$0xf0]  ;;  %v4112_v26 = vld [vmem:[#allocation2 + $0x270] sm:$0xf]  ;;  %v5799_v27 = vld [vmem:[#allocation2 + $0x284] sm:$0xf0]  ;;  %v3921_v29 = vor.u32 %v5751_v24, %v3920_v23 }
  0x1a   :  { %v4521_v25 = vor.u32 %v5901_v22, %v4520_v20  ;;  %v4304_v28 = vld [vmem:[#allocation2 + $0x3f0] sm:$0xf]  ;;  %1834 = vmatpush.bf16.msra.mxu0 %v3945_v16  ;;  %v5847_v30 = vld [vmem:[#allocation2 + $0x404] sm:$0xf0]  ;;  %v4113_v33 = vor.u32 %v5799_v27, %v4112_v26  ;;  %v3896_v35 = vld [vmem:[#allocation2 + $0xc0] sm:$0xf] }
  0x1b   :  { %v4496_v31 = vld [vmem:[#allocation2 + $0x570] sm:$0xf]  ;;  %v5895_v32 = vld [vmem:[#allocation2 + $0x584] sm:$0xf0]  ;;  %1847 = vmatpush.bf16.msra.mxu1 %v4137_v17  ;;  %v4305_v34 = vor.u32 %v5847_v30, %v4304_v28  ;;  %v5745_v36 = vld [vmem:[#allocation2 + $0xd4] sm:$0xf0] }
  0x1c   :  { %1860 = vmatpush.bf16.msra.mxu2 %v4329_v21  ;;  %v4088_v37 = vld [vmem:[#allocation2 + $0x240] sm:$0xf]  ;;  %v4497_v38 = vor.u32 %v5895_v32, %v4496_v31  ;;  %v5793_v39 = vld [vmem:[#allocation2 + $0x254] sm:$0xf0]  ;;  %v3897_v44 = vor.u32 %v5745_v36, %v3896_v35  ;;  %v3872_v47 = vld [vmem:[#allocation2 + $0x90] sm:$0xf] }
  0x1d   :  { %1873 = vmatpush.bf16.msra.mxu3 %v4521_v25  ;;  %v4280_v40 = vld [vmem:[#allocation2 + $0x3c0] sm:$0xf]  ;;  %v5841_v41 = vld [vmem:[#allocation2 + $0x3d4] sm:$0xf0]  ;;  %v4089_v45 = vor.u32 %v5793_v39, %v4088_v37  ;;  %v5739_v48 = vld [vmem:[#allocation2 + $0xa4] sm:$0xf0] }
  0x1e   :  { %v4472_v42 = vld [vmem:[#allocation2 + $0x540] sm:$0xf]  ;;  %v5889_v43 = vld [vmem:[#allocation2 + $0x554] sm:$0xf0]  ;;  %1835 = vmatpush.bf16.msra.mxu0 %v3921_v29  ;;  %v4281_v46 = vor.u32 %v5841_v41, %v4280_v40  ;;  %v4064_v49 = vld [vmem:[#allocation2 + $0x210] sm:$0xf]  ;;  %v3873_v56 = vor.u32 %v5739_v48, %v3872_v47 }
  0x1f   :  { %1848 = vmatpush.bf16.msra.mxu1 %v4113_v33  ;;  %v4473_v50 = vor.u32 %v5889_v43, %v4472_v42  ;;  %v5787_v51 = vld [vmem:[#allocation2 + $0x224] sm:$0xf0]  ;;  %v4256_v52 = vld [vmem:[#allocation2 + $0x390] sm:$0xf]  ;;  %v3848_v59 = vld [vmem:[#allocation2 + $0x60] sm:$0xf] }
  0x20   :  { %1861 = vmatpush.bf16.msra.mxu2 %v4305_v34  ;;  %v5835_v53 = vld [vmem:[#allocation2 + $0x3a4] sm:$0xf0]  ;;  %v4448_v54 = vld [vmem:[#allocation2 + $0x510] sm:$0xf]  ;;  %v4065_v57 = vor.u32 %v5787_v51, %v4064_v49  ;;  %v5733_v60 = vld [vmem:[#allocation2 + $0x74] sm:$0xf0] }
  0x21   :  { %1874 = vmatpush.bf16.msra.mxu3 %v4497_v38  ;;  %v5883_v55 = vld [vmem:[#allocation2 + $0x524] sm:$0xf0]  ;;  %v4257_v58 = vor.u32 %v5835_v53, %v4256_v52  ;;  %v4040_v61 = vld [vmem:[#allocation2 + $0x1e0] sm:$0xf]  ;;  %v5781_v63 = vld [vmem:[#allocation2 + $0x1f4] sm:$0xf0]  ;;  %v3849_v4 = vor.u32 %v5733_v60, %v3848_v59 }
  0x22   :  { %1836 = vmatpush.bf16.msra.mxu0 %v3897_v44  ;;  %v4449_v62 = vor.u32 %v5883_v55, %v4448_v54  ;;  %v4232_v0 = vld [vmem:[#allocation2 + $0x360] sm:$0xf]  ;;  %v5829_v1 = vld [vmem:[#allocation2 + $0x374] sm:$0xf0]  ;;  %v4041_v5 = vor.u32 %v5781_v63, %v4040_v61  ;;  %v3824_v7 = vld [vmem:[#allocation2 + $0x30] sm:$0xf] }
  0x23   :  { %1849 = vmatpush.bf16.msra.mxu1 %v4089_v45  ;;  %v4424_v2 = vld [vmem:[#allocation2 + $0x4e0] sm:$0xf]  ;;  %v5877_v3 = vld [vmem:[#allocation2 + $0x4f4] sm:$0xf0]  ;;  %v4233_v6 = vor.u32 %v5829_v1, %v4232_v0  ;;  %v5727_v8 = vld [vmem:[#allocation2 + $0x44] sm:$0xf0] }
  0x24   :  { %1862 = vmatpush.bf16.msra.mxu2 %v4281_v46  ;;  %v4016_v9 = vld [vmem:[#allocation2 + $0x1b0] sm:$0xf]  ;;  %v4425_v10 = vor.u32 %v5877_v3, %v4424_v2  ;;  %v5775_v11 = vld [vmem:[#allocation2 + $0x1c4] sm:$0xf0]  ;;  %v3825_v16 = vor.u32 %v5727_v8, %v3824_v7  ;;  %v3800_v17 = vld [vmem:[#allocation2] sm:$0xf] }
  0x25   :  { %1875 = vmatpush.bf16.msra.mxu3 %v4473_v50  ;;  %v4208_v12 = vld [vmem:[#allocation2 + $0x330] sm:$0xf]  ;;  %v5823_v13 = vld [vmem:[#allocation2 + $0x344] sm:$0xf0]  ;;  %v5721_v18 = vld [vmem:[#allocation2 + $0x14] sm:$0xf0]  ;;  %v4017_v19 = vor.u32 %v5775_v11, %v4016_v9 }
  0x26   :  { %1837 = vmatpush.bf16.msra.mxu0 %v3873_v56  ;;  %v4400_v14 = vld [vmem:[#allocation2 + $0x4b0] sm:$0xf]  ;;  %v5871_v15 = vld [vmem:[#allocation2 + $0x4c4] sm:$0xf0]  ;;  %v4209_v20 = vor.u32 %v5823_v13, %v4208_v12  ;;  %v3992_v21 = vld [vmem:[#allocation2 + $0x180] sm:$0xf]  ;;  %v3801_v31 = vor.u32 %v5721_v18, %v3800_v17 }
  0x27   :  { %1850 = vmatpush.bf16.msra.mxu1 %v4065_v57  ;;  %v5769_v22 = vld [vmem:[#allocation2 + $0x194] sm:$0xf0]  ;;  %v4184_v23 = vld [vmem:[#allocation2 + $0x300] sm:$0xf]  ;;  %v4401_v24 = vor.u32 %v5871_v15, %v4400_v14  ;;  %v4736_v28 = vld [vmem:[#allocation2 + $0x750] sm:$0xf] }
  0x28   :  { %1863 = vmatpush.bf16.msra.mxu2 %v4257_v58  ;;  %v5817_v25 = vld [vmem:[#allocation2 + $0x314] sm:$0xf0]  ;;  %v4376_v26 = vld [vmem:[#allocation2 + $0x480] sm:$0xf]  ;;  %v5955_v29 = vld [vmem:[#allocation2 + $0x764] sm:$0xf0]  ;;  %v3993_v35 = vor.u32 %v5769_v22, %v3992_v21 }
  0x29   :  { %1876 = vmatpush.bf16.msra.mxu3 %v4449_v62  ;;  %v5865_v27 = vld [vmem:[#allocation2 + $0x494] sm:$0xf0]  ;;  %v4928_v30 = vld [vmem:[#allocation2 + $0x8d0] sm:$0xf]  ;;  %v6003_v32 = vld [vmem:[#allocation2 + $0x8e4] sm:$0xf0]  ;;  %v4185_v36 = vor.u32 %v5817_v25, %v4184_v23  ;;  %v4737_v40 = vor.u32 %v5955_v29, %v4736_v28 }
  0x2a   :  { %1838 = vmatpush.bf16.msra.mxu0 %v3849_v4  ;;  %v5760_v33 = vld [vmem:[#allocation2 + $0x154] sm:$0xf]  ;;  %v3970_v34 = vld [vmem:[#allocation2 + $0x168] sm:$0xf0]  ;;  %v4377_v39 = vor.u32 %v5865_v27, %v4376_v26  ;;  %v4929_v41 = vor.u32 %v6003_v32, %v4928_v30  ;;  %v4712_v43 = vld [vmem:[#allocation2 + $0x720] sm:$0xf] }
  0x2b   :  { %1851 = vmatpush.bf16.msra.mxu1 %v4041_v5  ;;  %v5808_v37 = vld [vmem:[#allocation2 + $0x2d4] sm:$0xf]  ;;  %v4162_v38 = vld [vmem:[#allocation2 + $0x2e8] sm:$0xf0]  ;;  %v3973_v42 = vor.u32 %v5760_v33, %v3970_v34  ;;  %v5949_v44 = vld [vmem:[#allocation2 + $0x734] sm:$0xf0] }
  0x2c   :  { %1864 = vmatpush.bf16.msra.mxu2 %v4233_v6  ;;  %v4904_v45 = vld [vmem:[#allocation2 + $0x8a0] sm:$0xf]  ;;  %v4165_v46 = vor.u32 %v5808_v37, %v4162_v38  ;;  %v5997_v47 = vld [vmem:[#allocation2 + $0x8b4] sm:$0xf0]  ;;  %v5754_v48 = vld [vmem:[#allocation2 + $0x124] sm:$0xf]  ;;  %v4713_v52 = vor.u32 %v5949_v44, %v4712_v43 }
  0x2d   :  { %1877 = vmatpush.bf16.msra.mxu3 %v4425_v10  ;;  %v3946_v49 = vld [vmem:[#allocation2 + $0x138] sm:$0xf0]  ;;  %v5802_v50 = vld [vmem:[#allocation2 + $0x2a4] sm:$0xf]  ;;  %v4688_v53 = vld [vmem:[#allocation2 + $0x6f0] sm:$0xf]  ;;  %v4905_v54 = vor.u32 %v5997_v47, %v4904_v45 }
  0x2e   :  { %1839 = vmatpush.bf16.msra.mxu0 %v3825_v16  ;;  %v4138_v51 = vld [vmem:[#allocation2 + $0x2b8] sm:$0xf0]  ;;  %v3949_v55 = vor.u32 %v5754_v48, %v3946_v49  ;;  %v5943_v56 = vld [vmem:[#allocation2 + $0x704] sm:$0xf0]  ;;  %v4880_v57 = vld [vmem:[#allocation2 + $0x870] sm:$0xf] }
  0x2f   :  { %1852 = vmatpush.bf16.msra.mxu1 %v4017_v19  ;;  %v5991_v58 = vld [vmem:[#allocation2 + $0x884] sm:$0xf0]  ;;  %v4141_v59 = vor.u32 %v5802_v50, %v4138_v51  ;;  %v5748_v60 = vld [vmem:[#allocation2 + $0xf4] sm:$0xf]  ;;  %v3922_v61 = vld [vmem:[#allocation2 + $0x108] sm:$0xf0]  ;;  %v4689_v0 = vor.u32 %v5943_v56, %v4688_v53 }
  0x30   :  { %1865 = vmatpush.bf16.msra.mxu2 %v4209_v20  ;;  %v5796_v62 = vld [vmem:[#allocation2 + $0x274] sm:$0xf]  ;;  %v4114_v63 = vld [vmem:[#allocation2 + $0x288] sm:$0xf0]  ;;  %v4881_v1 = vor.u32 %v5991_v58, %v4880_v57  ;;  %v4664_v2 = vld [vmem:[#allocation2 + $0x6c0] sm:$0xf]  ;;  %v3925_v5 = vor.u32 %v5748_v60, %v3922_v61 }
  0x31   :  { %1878 = vmatpush.bf16.msra.mxu3 %v4401_v24  ;;  %v81_v3 = vld [vmem:[%s6546_s0 + $0x10] sm:$0xff]  ;;  %v79_v4 = vld [vmem:[%s6546_s0] sm:$0xff]  ;;  %v5937_v6 = vld [vmem:[#allocation2 + $0x6d4] sm:$0xf0]  ;;  %v4117_v11 = vor.u32 %v5796_v62, %v4114_v63 }
  0x32   :  { %1840 = vmatpush.bf16.msra.mxu0 %v3801_v31  ;;  %v4856_v7 = vld [vmem:[#allocation2 + $0x840] sm:$0xf]  ;;  %v6366_v8 = vpack.c.bf16 %v81_v3, %v81_v3  ;;  %v6368_v9 = vpack.c.bf16 %v79_v4, %v79_v4  ;;  %v82_v10 = vld [vmem:[%s6546_s0 + $0x18] sm:$0xff]  ;;  %v5742_v13 = vld [vmem:[#allocation2 + $0xc4] sm:$0xf]  ;;  %v4665_v18 = vor.u32 %v5937_v6, %v4664_v2 }
  0x33   :  { %1853 = vmatpush.bf16.msra.mxu1 %v3993_v35  ;;  %v5985_v12 = vld [vmem:[#allocation2 + $0x854] sm:$0xf0]  ;;  %v3898_v14 = vld [vmem:[#allocation2 + $0xd8] sm:$0xf0]  ;;  %v6373_v15 = vpack.c.bf16 %v82_v10, %v82_v10  ;;  %v5790_v16 = vld [vmem:[#allocation2 + $0x244] sm:$0xf] }
  0x34   :  { %1866 = vmatpush.bf16.msra.mxu2 %v4185_v36  ;;  %v4090_v17 = vld [vmem:[#allocation2 + $0x258] sm:$0xf0]  ;;  %v80_v19 = vld [vmem:[%s6546_s0 + $0x8] sm:$0xff]  ;;  %v4857_v20 = vor.u32 %v5985_v12, %v4856_v7  ;;  %v3901_v21 = vor.u32 %v5742_v13, %v3898_v14  ;;  %v4640_v22 = vld [vmem:[#allocation2 + $0x690] sm:$0xf] }
  0x35   :  { %1879 = vmatpush.bf16.msra.mxu3 %v4377_v39  ;;  %1841 = vmatmul.bf16.vlgmr.msra.gmra.mxu0 %v6368_v9  ;;  %v5931_v23 = vld [vmem:[#allocation2 + $0x6a4] sm:$0xf0]  ;;  %v4832_v24 = vld [vmem:[#allocation2 + $0x810] sm:$0xf]  ;;  %v6381_v25 = vpack.c.bf16 %v80_v19, %v80_v19  ;;  %v4093_v26 = vor.u32 %v5790_v16, %v4090_v17  ;;  %v5736_v28 = vld [vmem:[#allocation2 + $0x94] sm:$0xf] }
  0x36   :  { %1885 = vmatpush.bf16.msrb.mxu0 %v4737_v40  ;;  %v5979_v27 = vld [vmem:[#allocation2 + $0x824] sm:$0xf0]  ;;  %v3874_v29 = vld [vmem:[#allocation2 + $0xa8] sm:$0xf0]  ;;  %v5784_v30 = vld [vmem:[#allocation2 + $0x214] sm:$0xf]  ;;  %v4641_v32 = vor.u32 %v5931_v23, %v4640_v22 }
  0x37   :  { %1898 = vmatpush.bf16.msrb.mxu1 %v4929_v41  ;;  %1867 = vmatmul.bf16.vlgmr.msra.gmra.mxu2 %v6366_v8  ;;  %v4066_v31 = vld [vmem:[#allocation2 + $0x228] sm:$0xf0]  ;;  %v4833_v33 = vor.u32 %v5979_v27, %v4832_v24  ;;  %v3877_v34 = vor.u32 %v5736_v28, %v3874_v29  ;;  %v4616_v35 = vld [vmem:[#allocation2 + $0x660] sm:$0xf]  ;;  %v5925_v36 = vld [vmem:[#allocation2 + $0x674] sm:$0xf0] }
  0x38   :  { %1911 = vmatpush.bf16.msrb.mxu2 %v3973_v42  ;;  %1880 = vmatmul.bf16.vlgmr.msra.gmra.mxu3 %v6373_v15  ;;  %v4808_v37 = vld [vmem:[#allocation2 + $0x7e0] sm:$0xf]  ;;  %v4069_v38 = vor.u32 %v5784_v30, %v4066_v31  ;;  %v5973_v39 = vld [vmem:[#allocation2 + $0x7f4] sm:$0xf0]  ;;  %v5730_v40 = vld [vmem:[#allocation2 + $0x64] sm:$0xf]  ;;  %v4617_v44 = vor.u32 %v5925_v36, %v4616_v35 }
  0x39   :  { %1924 = vmatpush.bf16.msrb.mxu3 %v4165_v46  ;;  %1854 = vmatmul.bf16.vlgmr.msra.gmra.mxu1 %v6381_v25  ;;  %v3850_v41 = vld [vmem:[#allocation2 + $0x78] sm:$0xf0]  ;;  %v5778_v42 = vld [vmem:[#allocation2 + $0x1e4] sm:$0xf]  ;;  %v4809_v45 = vor.u32 %v5973_v39, %v4808_v37  ;;  %v4592_v47 = vld [vmem:[#allocation2 + $0x630] sm:$0xf] }
  0x3a   :  { %1886 = vmatpush.bf16.msrb.mxu0 %v4713_v52  ;;  %v4042_v43 = vld [vmem:[#allocation2 + $0x1f8] sm:$0xf0]  ;;  %v3853_v46 = vor.u32 %v5730_v40, %v3850_v41  ;;  %v5919_v48 = vld [vmem:[#allocation2 + $0x644] sm:$0xf0]  ;;  %v4784_v49 = vld [vmem:[#allocation2 + $0x7b0] sm:$0xf] }
  0x3b   :  { %1899 = vmatpush.bf16.msrb.mxu1 %v4905_v54  ;;  %v4045_v50 = vor.u32 %v5778_v42, %v4042_v43  ;;  %v5967_v51 = vld [vmem:[#allocation2 + $0x7c4] sm:$0xf0]  ;;  %v5724_v52 = vld [vmem:[#allocation2 + $0x34] sm:$0xf]  ;;  %v3826_v53 = vld [vmem:[#allocation2 + $0x48] sm:$0xf0]  ;;  %v4593_v56 = vor.u32 %v5919_v48, %v4592_v47 }
  0x3c   :  { %1912 = vmatpush.bf16.msrb.mxu2 %v3949_v55  ;;  %v5772_v54 = vld [vmem:[#allocation2 + $0x1b4] sm:$0xf]  ;;  %v4018_v55 = vld [vmem:[#allocation2 + $0x1c8] sm:$0xf0]  ;;  %v4568_v57 = vld [vmem:[#allocation2 + $0x600] sm:$0xf]  ;;  %v3829_v60 = vor.u32 %v5724_v52, %v3826_v53 }
  0x3d   :  { %1925 = vmatpush.bf16.msrb.mxu3 %v4141_v59  ;;  %v5913_v58 = vld [vmem:[#allocation2 + $0x614] sm:$0xf0]  ;;  %v4785_v59 = vor.u32 %v5967_v51, %v4784_v49  ;;  %v4760_v61 = vld [vmem:[#allocation2 + $0x780] sm:$0xf]  ;;  %v5718_v63 = vld [vmem:[#allocation2 + $0x4] sm:$0xf] }
  0x3e   :  { %1887 = vmatpush.bf16.msrb.mxu0 %v4689_v0  ;;  %v5961_v62 = vld [vmem:[#allocation2 + $0x794] sm:$0xf0]  ;;  %v4021_v0 = vor.u32 %v5772_v54, %v4018_v55  ;;  %v5766_v2 = vld [vmem:[#allocation2 + $0x184] sm:$0xf]  ;;  %v3994_v3 = vld [vmem:[#allocation2 + $0x198] sm:$0xf0]  ;;  %v4569_v7 = vor.u32 %v5913_v58, %v4568_v57 }
  0x3f   :  { %1900 = vmatpush.bf16.msrb.mxu1 %v4881_v1  ;;  %v3802_v1 = vld [vmem:[#allocation2 + $0x18] sm:$0xf0]  ;;  %v5856_v4 = vld [vmem:[#allocation2 + $0x454] sm:$0xf]  ;;  %v4546_v10 = vld [vmem:[#allocation2 + $0x5e8] sm:$0xf0]  ;;  %v4761_v13 = vor.u32 %v5961_v62, %v4760_v61  ;;  %v3997_v19 = vor.u32 %v5766_v2, %v3994_v3 }
  0x40   :  { %1913 = vmatpush.bf16.msrb.mxu2 %v3925_v5  ;;  %v4354_v5 = vld [vmem:[#allocation2 + $0x468] sm:$0xf0]  ;;  %v5904_v6 = vld [vmem:[#allocation2 + $0x5d4] sm:$0xf]  ;;  %v3805_v14 = vor.u32 %v5718_v63, %v3802_v1  ;;  %v5850_v24 = vld [vmem:[#allocation2 + $0x424] sm:$0xf] }
  0x41   :  { %1926 = vmatpush.bf16.msrb.mxu3 %v4117_v11  ;;  %v5952_v11 = vld [vmem:[#allocation2 + $0x754] sm:$0xf]  ;;  %v4738_v12 = vld [vmem:[#allocation2 + $0x768] sm:$0xf0]  ;;  %v4549_v22 = vor.u32 %v5904_v6, %v4546_v10  ;;  %v5898_v27 = vld [vmem:[#allocation2 + $0x5a4] sm:$0xf] }
  0x42   :  { %1888 = vmatpush.bf16.msrb.mxu0 %v4665_v18  ;;  %v6000_v16 = vld [vmem:[#allocation2 + $0x8d4] sm:$0xf]  ;;  %v4930_v17 = vld [vmem:[#allocation2 + $0x8e8] sm:$0xf0]  ;;  %v83_v18 = vld [vmem:[%s6546_s0 + $0x20] sm:$0xff]  ;;  %v4741_v23 = vor.u32 %v5952_v11, %v4738_v12 }
  0x43   :  { %1901 = vmatpush.bf16.msrb.mxu1 %v4857_v20  ;;  %v4357_v20 = vor.u32 %v5856_v4, %v4354_v5  ;;  %v4933_v28 = vor.u32 %v6000_v16, %v4930_v17  ;;  %v4522_v29 = vld [vmem:[#allocation2 + $0x5b8] sm:$0xf0]  ;;  %v5946_v30 = vld [vmem:[#allocation2 + $0x724] sm:$0xf]  ;;  %v5844_v39 = vld [vmem:[#allocation2 + $0x3f4] sm:$0xf] }
  0x44   :  { %1914 = vmatpush.bf16.msrb.mxu2 %v3901_v21  ;;  %v84_v21 = vld [vmem:[%s6546_s0 + $0x28] sm:$0xff]  ;;  %v4714_v31 = vld [vmem:[#allocation2 + $0x738] sm:$0xf0]  ;;  %v4525_v37 = vor.u32 %v5898_v27, %v4522_v29  ;;  %v5892_v41 = vld [vmem:[#allocation2 + $0x574] sm:$0xf] }
  0x45   :  { %1927 = vmatpush.bf16.msrb.mxu3 %v4093_v26  ;;  %v4330_v26 = vld [vmem:[#allocation2 + $0x438] sm:$0xf0]  ;;  %v6392_v35 = vpack.c.bf16 %v84_v21, %v84_v21  ;;  %v4306_v40 = vld [vmem:[#allocation2 + $0x408] sm:$0xf0]  ;;  %v5838_v51 = vld [vmem:[#allocation2 + $0x3c4] sm:$0xf] }
  0x46   :  { %1889 = vmatpush.bf16.msrb.mxu0 %v4641_v32  ;;  %v6390_v32 = vpack.c.bf16 %v83_v18, %v83_v18  ;;  %v4333_v36 = vor.u32 %v5850_v24, %v4330_v26  ;;  %v4498_v43 = vld [vmem:[#allocation2 + $0x588] sm:$0xf0]  ;;  %v4309_v48 = vor.u32 %v5844_v39, %v4306_v40  ;;  %v4282_v52 = vld [vmem:[#allocation2 + $0x3d8] sm:$0xf0]  ;;  %v5886_v53 = vld [vmem:[#allocation2 + $0x544] sm:$0xf] }
  0x47   :  { %1902 = vmatpush.bf16.msrb.mxu1 %v4833_v33  ;;  %v5994_v33 = vld [vmem:[#allocation2 + $0x8a4] sm:$0xf]  ;;  %v4882_v47 = vld [vmem:[#allocation2 + $0x888] sm:$0xf0]  ;;  %v4501_v49 = vor.u32 %v5892_v41, %v4498_v43  ;;  %v4474_v55 = vld [vmem:[#allocation2 + $0x558] sm:$0xf0] }
  0x48   :  { %1915 = vmatpush.bf16.msrb.mxu2 %v3877_v34  ;;  %v4906_v34 = vld [vmem:[#allocation2 + $0x8b8] sm:$0xf0]  ;;  %v5982_v58 = vld [vmem:[#allocation2 + $0x844] sm:$0xf]  ;;  %v4477_v61 = vor.u32 %v5886_v53, %v4474_v55  ;;  %v5832_v63 = vld [vmem:[#allocation2 + $0x394] sm:$0xf] }
  0x49   :  { %1928 = vmatpush.bf16.msrb.mxu3 %v4069_v38  ;;  %v4717_v38 = vor.u32 %v5946_v30, %v4714_v31  ;;  %v4909_v42 = vor.u32 %v5994_v33, %v4906_v34  ;;  %v4666_v57 = vld [vmem:[#allocation2 + $0x6d8] sm:$0xf0]  ;;  %v5880_v1 = vld [vmem:[#allocation2 + $0x514] sm:$0xf]  ;;  %v4450_v3 = vld [vmem:[#allocation2 + $0x528] sm:$0xf0] }
  0x4a   :  { %1890 = vmatpush.bf16.msrb.mxu0 %v4617_v44  ;;  %v5940_v44 = vld [vmem:[#allocation2 + $0x6f4] sm:$0xf]  ;;  %v4642_v5 = vld [vmem:[#allocation2 + $0x6a8] sm:$0xf0]  ;;  %v4453_v11 = vor.u32 %v5880_v1, %v4450_v3  ;;  %v5874_v16 = vld [vmem:[#allocation2 + $0x4e4] sm:$0xf] }
  0x4b   :  { %1903 = vmatpush.bf16.msrb.mxu1 %v4809_v45  ;;  %v4690_v45 = vld [vmem:[#allocation2 + $0x708] sm:$0xf0]  ;;  %v5928_v4 = vld [vmem:[#allocation2 + $0x694] sm:$0xf]  ;;  %v4426_v18 = vld [vmem:[#allocation2 + $0x4f8] sm:$0xf0] }
  0x4c   :  { %1916 = vmatpush.bf16.msrb.mxu2 %v3853_v46  ;;  %v5988_v46 = vld [vmem:[#allocation2 + $0x874] sm:$0xf]  ;;  %v4645_v12 = vor.u32 %v5928_v4, %v4642_v5  ;;  %v5970_v21 = vld [vmem:[#allocation2 + $0x7e4] sm:$0xf]  ;;  %v4429_v24 = vor.u32 %v5874_v16, %v4426_v18  ;;  %v4402_v31 = vld [vmem:[#allocation2 + $0x4c8] sm:$0xf0] }
  0x4d   :  { %1929 = vmatpush.bf16.msrb.mxu3 %v4045_v50  ;;  %v4693_v50 = vor.u32 %v5940_v44, %v4690_v45  ;;  %v4885_v54 = vor.u32 %v5988_v46, %v4882_v47  ;;  %v5976_v6 = vld [vmem:[#allocation2 + $0x814] sm:$0xf]  ;;  %v4594_v34 = vld [vmem:[#allocation2 + $0x648] sm:$0xf0]  ;;  %v5814_v39 = vld [vmem:[#allocation2 + $0x304] sm:$0xf] }
  0x4e   :  { %1891 = vmatpush.bf16.msrb.mxu0 %v4593_v56  ;;  %v5934_v56 = vld [vmem:[#allocation2 + $0x6c4] sm:$0xf]  ;;  %v5820_v27 = vld [vmem:[#allocation2 + $0x334] sm:$0xf]  ;;  %v4186_v40 = vld [vmem:[#allocation2 + $0x318] sm:$0xf0] }
  0x4f   :  { %1904 = vmatpush.bf16.msrb.mxu1 %v4785_v59  ;;  %v4858_v59 = vld [vmem:[#allocation2 + $0x858] sm:$0xf0]  ;;  %v4669_v62 = vor.u32 %v5934_v56, %v4666_v57  ;;  %v5868_v29 = vld [vmem:[#allocation2 + $0x4b4] sm:$0xf]  ;;  %v5862_v43 = vld [vmem:[#allocation2 + $0x484] sm:$0xf]  ;;  %v4189_v53 = vor.u32 %v5814_v39, %v4186_v40 }
  0x50   :  { %1917 = vmatpush.bf16.msrb.mxu2 %v3829_v60  ;;  %v4285_v60 = vor.u32 %v5838_v51, %v4282_v52  ;;  %v4861_v2 = vor.u32 %v5982_v58, %v4858_v59  ;;  %v5916_v33 = vld [vmem:[#allocation2 + $0x634] sm:$0xf]  ;;  %v4405_v41 = vor.u32 %v5868_v29, %v4402_v31  ;;  %v4378_v44 = vld [vmem:[#allocation2 + $0x498] sm:$0xf0]  ;;  %v5910_v45 = vld [vmem:[#allocation2 + $0x604] sm:$0xf] }
  0x51   :  { %1930 = vmatpush.bf16.msrb.mxu3 %v4021_v0  ;;  %v4258_v0 = vld [vmem:[#allocation2 + $0x3a8] sm:$0xf0]  ;;  %v4570_v47 = vld [vmem:[#allocation2 + $0x618] sm:$0xf0]  ;;  %v5764_v51 = vld [vmem:[#allocation2 + $0x16c] sm:$0xf0]  ;;  %v4381_v57 = vor.u32 %v5862_v43, %v4378_v44 }
  0x52   :  { %1892 = vmatpush.bf16.msrb.mxu0 %v4569_v7  ;;  %v4834_v7 = vld [vmem:[#allocation2 + $0x828] sm:$0xf0]  ;;  %v4261_v10 = vor.u32 %v5832_v63, %v4258_v0  ;;  %v4168_v52 = vld [vmem:[#allocation2 + $0x2d8] sm:$0xf]  ;;  %v5860_v56 = vld [vmem:[#allocation2 + $0x46c] sm:$0xf0]  ;;  %v4573_v58 = vor.u32 %v5910_v45, %v4570_v47 }
  0x53   :  { %1905 = vmatpush.bf16.msrb.mxu1 %v4761_v13  ;;  %v5826_v13 = vld [vmem:[#allocation2 + $0x364] sm:$0xf]  ;;  %v4837_v17 = vor.u32 %v5976_v6, %v4834_v7  ;;  %v4360_v55 = vld [vmem:[#allocation2 + $0x458] sm:$0xf]  ;;  %v3952_v1 = vld [vmem:[#allocation2 + $0x128] sm:$0xf] }
  0x54   :  { %1918 = vmatpush.bf16.msrb.mxu2 %v3805_v14  ;;  %v4234_v14 = vld [vmem:[#allocation2 + $0x378] sm:$0xf0]  ;;  %v4552_v59 = vld [vmem:[#allocation2 + $0x5d8] sm:$0xf]  ;;  %v4361_v0 = vor.u32 %v5860_v56, %v4360_v55  ;;  %v4144_v3 = vld [vmem:[#allocation2 + $0x2a8] sm:$0xf] }
  0x55   :  { %1931 = vmatpush.bf16.msrb.mxu3 %v3997_v19  ;;  %1893 = vmatmul.bf16.vlgmr.msrb.gmra.mxu0 %v6390_v32  ;;  %v5922_v19 = vld [vmem:[#allocation2 + $0x664] sm:$0xf]  ;;  %v5806_v5 = vld [vmem:[#allocation2 + $0x2bc] sm:$0xf0]  ;;  %v4336_v6 = vld [vmem:[#allocation2 + $0x428] sm:$0xf] }
  0x56   :  { %1937 = vmatpush.bf16.msra.mxu0 %v4357_v20  ;;  %1906 = vmatmul.bf16.vlgmr.msrb.gmra.mxu1 %v6392_v35  ;;  %v4618_v20 = vld [vmem:[#allocation2 + $0x678] sm:$0xf0]  ;;  %v5854_v7 = vld [vmem:[#allocation2 + $0x43c] sm:$0xf0]  ;;  %v3928_v16 = vld [vmem:[#allocation2 + $0xf8] sm:$0xf] }
  0x57   :  { %1950 = vmatpush.bf16.msra.mxu1 %v4549_v22  ;;  %1919 = vmatmul.bf16.vlgmr.msrb.gmra.mxu2 %v6368_v9  ;;  %v4810_v22 = vld [vmem:[#allocation2 + $0x7f8] sm:$0xf0]  ;;  %v4621_v26 = vor.u32 %v5922_v19, %v4618_v20  ;;  %v4120_v18 = vld [vmem:[#allocation2 + $0x278] sm:$0xf]  ;;  %v5800_v20 = vld [vmem:[#allocation2 + $0x28c] sm:$0xf0] }
  0x58   :  { %1963 = vmatpush.bf16.msra.mxu2 %v4741_v23  ;;  %1932 = vmatmul.bf16.vlgmr.msrb.gmra.mxu3 %v6381_v25  ;;  %v4237_v23 = vor.u32 %v5826_v13, %v4234_v14  ;;  %v4813_v30 = vor.u32 %v5970_v21, %v4810_v22  ;;  %v4145_v13 = vor.u32 %v5806_v5, %v4144_v3  ;;  %v4312_v21 = vld [vmem:[#allocation2 + $0x3f8] sm:$0xf]  ;;  %v5848_v22 = vld [vmem:[#allocation2 + $0x40c] sm:$0xf0]  ;;  %v3904_v29 = vld [vmem:[#allocation2 + $0xc8] sm:$0xf] }
  0x59   :  { %1976 = vmatpush.bf16.msra.mxu3 %v4933_v28  ;;  %v4210_v28 = vld [vmem:[#allocation2 + $0x348] sm:$0xf0]  ;;  %v4337_v14 = vor.u32 %v5854_v7, %v4336_v6  ;;  %v4096_v31 = vld [vmem:[#allocation2 + $0x248] sm:$0xf]  ;;  %v5890_v39 = vld [vmem:[#allocation2 + $0x55c] sm:$0xf0] }
  0x5a   :  { %1938 = vmatpush.bf16.msra.mxu0 %v4333_v36  ;;  %v5964_v36 = vld [vmem:[#allocation2 + $0x7b4] sm:$0xf]  ;;  %v3880_v43 = vld [vmem:[#allocation2 + $0x98] sm:$0xf]  ;;  %v5740_v44 = vld [vmem:[#allocation2 + $0xac] sm:$0xf0] }
  0x5b   :  { %1951 = vmatpush.bf16.msra.mxu1 %v4525_v37  ;;  %v4786_v37 = vld [vmem:[#allocation2 + $0x7c8] sm:$0xf0]  ;;  %v4072_v45 = vld [vmem:[#allocation2 + $0x218] sm:$0xf]  ;;  %v5788_v47 = vld [vmem:[#allocation2 + $0x22c] sm:$0xf0] }
  0x5c   :  { %1964 = vmatpush.bf16.msra.mxu2 %v4717_v38  ;;  %v4213_v38 = vor.u32 %v5820_v27, %v4210_v28  ;;  %v4789_v46 = vor.u32 %v5964_v36, %v4786_v37  ;;  %v4121_v27 = vor.u32 %v5800_v20, %v4120_v18  ;;  %v4313_v28 = vor.u32 %v5848_v22, %v4312_v21  ;;  %v4288_v36 = vld [vmem:[#allocation2 + $0x3c8] sm:$0xf]  ;;  %v5842_v37 = vld [vmem:[#allocation2 + $0x3dc] sm:$0xf0]  ;;  %v3832_v3 = vld [vmem:[#allocation2 + $0x38] sm:$0xf] }
  0x5d   :  { %1977 = vmatpush.bf16.msra.mxu3 %v4909_v42  ;;  %v4597_v42 = vor.u32 %v5916_v33, %v4594_v34  ;;  %v5794_v34 = vld [vmem:[#allocation2 + $0x25c] sm:$0xf0]  ;;  %v3856_v55 = vld [vmem:[#allocation2 + $0x68] sm:$0xf]  ;;  %v4024_v5 = vld [vmem:[#allocation2 + $0x1b8] sm:$0xf] }
  0x5e   :  { %1939 = vmatpush.bf16.msra.mxu0 %v4309_v48  ;;  %v5958_v48 = vld [vmem:[#allocation2 + $0x784] sm:$0xf]  ;;  %v5734_v56 = vld [vmem:[#allocation2 + $0x7c] sm:$0xf0]  ;;  %v5776_v7 = vld [vmem:[#allocation2 + $0x1cc] sm:$0xf0] }
  0x5f   :  { %1952 = vmatpush.bf16.msra.mxu1 %v4501_v49  ;;  %v4762_v49 = vld [vmem:[#allocation2 + $0x798] sm:$0xf0]  ;;  %v4025_v18 = vor.u32 %v5776_v7, %v4024_v5  ;;  %v4000_v20 = vld [vmem:[#allocation2 + $0x188] sm:$0xf]  ;;  %v5770_v21 = vld [vmem:[#allocation2 + $0x19c] sm:$0xf0] }
  0x60   :  { %1965 = vmatpush.bf16.msra.mxu2 %v4693_v50  ;;  %v3976_v50 = vld [vmem:[#allocation2 + $0x158] sm:$0xf]  ;;  %v4192_v22 = vld [vmem:[#allocation2 + $0x308] sm:$0xf] }
  0x61   :  { %1978 = vmatpush.bf16.msra.mxu3 %v4885_v54  ;;  %v5812_v54 = vld [vmem:[#allocation2 + $0x2ec] sm:$0xf0]  ;;  %v4672_v5 = vld [vmem:[#allocation2 + $0x6c8] sm:$0xf] }
  0x62   :  { %1940 = vmatpush.bf16.msra.mxu0 %v4285_v60  ;;  %v5908_v60 = vld [vmem:[#allocation2 + $0x5ec] sm:$0xf0]  ;;  %v4169_v63 = vor.u32 %v5812_v54, %v4168_v52  ;;  %v3881_v52 = vor.u32 %v5740_v44, %v3880_v43  ;;  %v4864_v7 = vld [vmem:[#allocation2 + $0x848] sm:$0xf] }
  0x63   :  { %1953 = vmatpush.bf16.msra.mxu1 %v4477_v61  ;;  %v4765_v61 = vor.u32 %v5958_v48, %v4762_v49  ;;  %v4553_v4 = vor.u32 %v5908_v60, %v4552_v59  ;;  %v4264_v48 = vld [vmem:[#allocation2 + $0x398] sm:$0xf]  ;;  %v5836_v49 = vld [vmem:[#allocation2 + $0x3ac] sm:$0xf0]  ;;  %v5782_v59 = vld [vmem:[#allocation2 + $0x1fc] sm:$0xf0] }
  0x64   :  { %1966 = vmatpush.bf16.msra.mxu2 %v4669_v62  ;;  %v3977_v62 = vor.u32 %v5764_v51, %v3976_v50  ;;  %v4456_v50 = vld [vmem:[#allocation2 + $0x518] sm:$0xf]  ;;  %v5884_v51 = vld [vmem:[#allocation2 + $0x52c] sm:$0xf0]  ;;  %v4265_v54 = vor.u32 %v5836_v49, %v4264_v48  ;;  %v4240_v60 = vld [vmem:[#allocation2 + $0x368] sm:$0xf] }
  0x65   :  { %1979 = vmatpush.bf16.msra.mxu3 %v4861_v2  ;;  %v5758_v2 = vld [vmem:[#allocation2 + $0x13c] sm:$0xf0] }
  0x66   :  { %1941 = vmatpush.bf16.msra.mxu0 %v4261_v10  ;;  %v4528_v10 = vld [vmem:[#allocation2 + $0x5a8] sm:$0xf]  ;;  %v5998_v49 = vld [vmem:[#allocation2 + $0x8bc] sm:$0xf0] }
  0x67   :  { %1954 = vmatpush.bf16.msra.mxu1 %v4453_v11  ;;  %v5902_v11 = vld [vmem:[#allocation2 + $0x5bc] sm:$0xf0] }
  0x68   :  { %1967 = vmatpush.bf16.msra.mxu2 %v4645_v12  ;;  %v3953_v12 = vor.u32 %v5758_v2, %v3952_v1  ;;  %v4529_v19 = vor.u32 %v5902_v11, %v4528_v10  ;;  %v4216_v10 = vld [vmem:[#allocation2 + $0x338] sm:$0xf]  ;;  %v5824_v11 = vld [vmem:[#allocation2 + $0x34c] sm:$0xf0] }
  0x69   :  { %1980 = vmatpush.bf16.msra.mxu3 %v4837_v17  ;;  %v5752_v17 = vld [vmem:[#allocation2 + $0x10c] sm:$0xf0] }
  0x6a   :  { %1942 = vmatpush.bf16.msra.mxu0 %v4237_v23  ;;  %v4504_v23 = vld [vmem:[#allocation2 + $0x578] sm:$0xf] }
  0x6b   :  { %1955 = vmatpush.bf16.msra.mxu1 %v4429_v24  ;;  %v5896_v24 = vld [vmem:[#allocation2 + $0x58c] sm:$0xf0] }
  0x6c   :  { %1968 = vmatpush.bf16.msra.mxu2 %v4621_v26  ;;  %v3929_v26 = vor.u32 %v5752_v17, %v3928_v16  ;;  %v4505_v33 = vor.u32 %v5896_v24, %v4504_v23  ;;  %v3808_v16 = vld [vmem:[#allocation2 + $0x8] sm:$0xf]  ;;  %v5722_v17 = vld [vmem:[#allocation2 + $0x1c] sm:$0xf0] }
  0x6d   :  { %1981 = vmatpush.bf16.msra.mxu3 %v4813_v30  ;;  %v5746_v30 = vld [vmem:[#allocation2 + $0xdc] sm:$0xf0] }
  0x6e   :  { %1943 = vmatpush.bf16.msra.mxu0 %v4213_v38  ;;  %v4480_v38 = vld [vmem:[#allocation2 + $0x548] sm:$0xf]  ;;  %v3905_v40 = vor.u32 %v5746_v30, %v3904_v29  ;;  %v5818_v24 = vld [vmem:[#allocation2 + $0x31c] sm:$0xf0]  ;;  %v5956_v29 = vld [vmem:[#allocation2 + $0x76c] sm:$0xf0] }
  0x6f   :  { %1956 = vmatpush.bf16.msra.mxu1 %v4405_v41  ;;  %v4097_v41 = vor.u32 %v5794_v34, %v4096_v31  ;;  %v4936_v30 = vld [vmem:[#allocation2 + $0x8d8] sm:$0xf]  ;;  %v3809_v31 = vor.u32 %v5722_v17, %v3808_v16  ;;  %v5761_v34 = vld [vmem:[#allocation2 + $0x15c] sm:$0xf]  ;;  %v4098_v16 = vld [vmem:[#allocation2 + $0x260] sm:$0xf0] }
  0x70   :  { %1969 = vmatpush.bf16.msra.mxu2 %v4597_v42  ;;  %v4289_v42 = vor.u32 %v5842_v37, %v4288_v36  ;;  %v3978_v36 = vld [vmem:[#allocation2 + $0x170] sm:$0xf0]  ;;  %v4001_v37 = vor.u32 %v5770_v21, %v4000_v20  ;;  %v4648_v20 = vld [vmem:[#allocation2 + $0x698] sm:$0xf]  ;;  %v5932_v21 = vld [vmem:[#allocation2 + $0x6ac] sm:$0xf0] }
  0x71   :  { %1982 = vmatpush.bf16.msra.mxu3 %v4789_v46  ;;  %v4481_v46 = vor.u32 %v5890_v39, %v4480_v38  ;;  %v4193_v38 = vor.u32 %v5818_v24, %v4192_v22  ;;  %v5809_v39 = vld [vmem:[#allocation2 + $0x2dc] sm:$0xf]  ;;  %v3981_v44 = vor.u32 %v5761_v34, %v3978_v36  ;;  %v4840_v22 = vld [vmem:[#allocation2 + $0x818] sm:$0xf]  ;;  %v5980_v24 = vld [vmem:[#allocation2 + $0x82c] sm:$0xf0] }
  0x72   :  { %1944 = vmatpush.bf16.msra.mxu0 %v4189_v53  ;;  %v4073_v53 = vor.u32 %v5788_v47, %v4072_v45  ;;  %v4720_v45 = vld [vmem:[#allocation2 + $0x728] sm:$0xf]  ;;  %v5926_v36 = vld [vmem:[#allocation2 + $0x67c] sm:$0xf0] }
  0x73   :  { %1957 = vmatpush.bf16.msra.mxu1 %v4381_v57  ;;  %v4048_v57 = vld [vmem:[#allocation2 + $0x1e8] sm:$0xf] }
  0x74   :  { %1970 = vmatpush.bf16.msra.mxu2 %v4573_v58  ;;  %v4457_v58 = vor.u32 %v5884_v51, %v4456_v50  ;;  %v4049_v1 = vor.u32 %v5782_v59, %v4048_v57  ;;  %v4912_v47 = vld [vmem:[#allocation2 + $0x8a8] sm:$0xf]  ;;  %v5755_v50 = vld [vmem:[#allocation2 + $0x12c] sm:$0xf]  ;;  %v3954_v51 = vld [vmem:[#allocation2 + $0x140] sm:$0xf0] }
  0x75   :  { %1983 = vmatpush.bf16.msra.mxu3 %v4765_v61  ;;  %1945 = vmatmul.bf16.vlgmr.msra.gmra.mxu0 %v6366_v8  ;;  %v5830_v61 = vld [vmem:[#allocation2 + $0x37c] sm:$0xf0]  ;;  %v4696_v57 = vld [vmem:[#allocation2 + $0x6f8] sm:$0xf]  ;;  %v4624_v34 = vld [vmem:[#allocation2 + $0x668] sm:$0xf] }
  0x76   :  { %1989 = vmatpush.bf16.msrb.mxu0 %v3977_v62  ;;  %1958 = vmatmul.bf16.vlgmr.msra.gmra.mxu1 %v6373_v15  ;;  %v4432_v62 = vld [vmem:[#allocation2 + $0x4e8] sm:$0xf]  ;;  %v4241_v2 = vor.u32 %v5830_v61, %v4240_v60  ;;  %v4888_v59 = vld [vmem:[#allocation2 + $0x878] sm:$0xf]  ;;  %v5992_v61 = vld [vmem:[#allocation2 + $0x88c] sm:$0xf0] }
  0x77   :  { %2002 = vmatpush.bf16.msrb.mxu1 %v4169_v63  ;;  %1971 = vmatmul.bf16.vlgmr.msra.gmra.mxu2 %v6390_v32  ;;  %v5878_v63 = vld [vmem:[#allocation2 + $0x4fc] sm:$0xf0] }
  0x78   :  { %2015 = vmatpush.bf16.msrb.mxu2 %v4361_v0  ;;  %1984 = vmatmul.bf16.vlgmr.msra.gmra.mxu3 %v6392_v35  ;;  %v3857_v0 = vor.u32 %v5734_v56, %v3856_v55  ;;  %v4433_v6 = vor.u32 %v5878_v63, %v4432_v62  ;;  %v4913_v55 = vor.u32 %v5998_v49, %v4912_v47  ;;  %v5749_v62 = vld [vmem:[#allocation2 + $0xfc] sm:$0xf]  ;;  %v3930_v63 = vld [vmem:[#allocation2 + $0x110] sm:$0xf0]  ;;  %v4600_v47 = vld [vmem:[#allocation2 + $0x638] sm:$0xf] }
  0x79   :  { %2028 = vmatpush.bf16.msrb.mxu3 %v4553_v4  ;;  %v5728_v4 = vld [vmem:[#allocation2 + $0x4c] sm:$0xf0]  ;;  %v3957_v56 = vor.u32 %v5755_v50, %v3954_v51  ;;  %v4792_v49 = vld [vmem:[#allocation2 + $0x7b8] sm:$0xf] }
  0x7a   :  { %1990 = vmatpush.bf16.msrb.mxu0 %v3953_v12  ;;  %v4408_v12 = vld [vmem:[#allocation2 + $0x4b8] sm:$0xf]  ;;  %v5968_v51 = vld [vmem:[#allocation2 + $0x7cc] sm:$0xf0] }
  0x7b   :  { %2003 = vmatpush.bf16.msrb.mxu1 %v4145_v13  ;;  %v5872_v13 = vld [vmem:[#allocation2 + $0x4cc] sm:$0xf0] }
  0x7c   :  { %2016 = vmatpush.bf16.msrb.mxu2 %v4337_v14  ;;  %v3833_v14 = vor.u32 %v5728_v4, %v3832_v3  ;;  %v4409_v23 = vor.u32 %v5872_v13, %v4408_v12  ;;  %v4889_v3 = vor.u32 %v5992_v61, %v4888_v59  ;;  %v3933_v4 = vor.u32 %v5749_v62, %v3930_v63  ;;  %v5743_v12 = vld [vmem:[#allocation2 + $0xcc] sm:$0xf]  ;;  %v3906_v13 = vld [vmem:[#allocation2 + $0xe0] sm:$0xf0]  ;;  %v4768_v61 = vld [vmem:[#allocation2 + $0x788] sm:$0xf] }
  0x7d   :  { %2029 = vmatpush.bf16.msrb.mxu3 %v4529_v19  ;;  %v4217_v19 = vor.u32 %v5824_v11, %v4216_v10  ;;  %v5986_v11 = vld [vmem:[#allocation2 + $0x85c] sm:$0xf0]  ;;  %v4793_v59 = vor.u32 %v5968_v51, %v4792_v49  ;;  %v5719_v63 = vld [vmem:[#allocation2 + $0xc] sm:$0xf] }
  0x7e   :  { %1991 = vmatpush.bf16.msrb.mxu0 %v3929_v26  ;;  %v4384_v26 = vld [vmem:[#allocation2 + $0x488] sm:$0xf]  ;;  %v5962_v62 = vld [vmem:[#allocation2 + $0x79c] sm:$0xf0]  ;;  %v5887_v51 = vld [vmem:[#allocation2 + $0x54c] sm:$0xf] }
  0x7f   :  { %2004 = vmatpush.bf16.msrb.mxu1 %v4121_v27  ;;  %v5866_v27 = vld [vmem:[#allocation2 + $0x49c] sm:$0xf0] }
  0x80   :  { %2017 = vmatpush.bf16.msrb.mxu2 %v4313_v28  ;;  %v4744_v28 = vld [vmem:[#allocation2 + $0x758] sm:$0xf] }
  0x81   :  { %2030 = vmatpush.bf16.msrb.mxu3 %v4505_v33  ;;  %v6004_v33 = vld [vmem:[#allocation2 + $0x8ec] sm:$0xf0] }
  0x82   :  { %1992 = vmatpush.bf16.msrb.mxu0 %v3905_v40  ;;  %v4170_v40 = vld [vmem:[#allocation2 + $0x2f0] sm:$0xf0]  ;;  %v4937_v43 = vor.u32 %v6004_v33, %v4936_v30  ;;  %v4649_v30 = vor.u32 %v5932_v21, %v4648_v20 }
  0x83   :  { %2005 = vmatpush.bf16.msrb.mxu1 %v4097_v41  ;;  %v4385_v41 = vor.u32 %v5866_v27, %v4384_v26  ;;  %v4173_v48 = vor.u32 %v5809_v39, %v4170_v40  ;;  %v5737_v26 = vld [vmem:[#allocation2 + $0x9c] sm:$0xf]  ;;  %v3882_v27 = vld [vmem:[#allocation2 + $0xb0] sm:$0xf0]  ;;  %v5974_v39 = vld [vmem:[#allocation2 + $0x7fc] sm:$0xf0] }
  0x84   :  { %2018 = vmatpush.bf16.msrb.mxu2 %v4289_v42  ;;  %v4745_v42 = vor.u32 %v5956_v29, %v4744_v28  ;;  %v5785_v28 = vld [vmem:[#allocation2 + $0x21c] sm:$0xf]  ;;  %v4074_v29 = vld [vmem:[#allocation2 + $0x230] sm:$0xf0]  ;;  %v3885_v33 = vor.u32 %v5737_v26, %v3882_v27  ;;  %v5731_v40 = vld [vmem:[#allocation2 + $0x6c] sm:$0xf] }
  0x85   :  { %2031 = vmatpush.bf16.msrb.mxu3 %v4481_v46  ;;  %v5950_v46 = vld [vmem:[#allocation2 + $0x73c] sm:$0xf0]  ;;  %v4530_v27 = vld [vmem:[#allocation2 + $0x5c0] sm:$0xf0] }
  0x86   :  { %1993 = vmatpush.bf16.msrb.mxu0 %v3881_v52  ;;  %v5803_v52 = vld [vmem:[#allocation2 + $0x2ac] sm:$0xf] }
  0x87   :  { %2006 = vmatpush.bf16.msrb.mxu1 %v4073_v53  ;;  %v4146_v53 = vld [vmem:[#allocation2 + $0x2c0] sm:$0xf0] }
  0x88   :  { %2019 = vmatpush.bf16.msrb.mxu2 %v4265_v54  ;;  %v4721_v54 = vor.u32 %v5950_v46, %v4720_v45  ;;  %v4149_v60 = vor.u32 %v5803_v52, %v4146_v53  ;;  %v5725_v52 = vld [vmem:[#allocation2 + $0x3c] sm:$0xf]  ;;  %v3834_v53 = vld [vmem:[#allocation2 + $0x50] sm:$0xf0] }
  0x89   :  { %2032 = vmatpush.bf16.msrb.mxu3 %v4457_v58  ;;  %v5944_v58 = vld [vmem:[#allocation2 + $0x70c] sm:$0xf0] }
  0x8a   :  { %1994 = vmatpush.bf16.msrb.mxu0 %v3857_v0  ;;  %v5797_v0 = vld [vmem:[#allocation2 + $0x27c] sm:$0xf] }
  0x8b   :  { %2007 = vmatpush.bf16.msrb.mxu1 %v4049_v1  ;;  %v4122_v1 = vld [vmem:[#allocation2 + $0x290] sm:$0xf0] }
  0x8c   :  { %2020 = vmatpush.bf16.msrb.mxu2 %v4241_v2  ;;  %v4697_v2 = vor.u32 %v5944_v58, %v4696_v57  ;;  %v4125_v10 = vor.u32 %v5797_v0, %v4122_v1  ;;  %v4576_v57 = vld [vmem:[#allocation2 + $0x608] sm:$0xf]  ;;  %v5914_v58 = vld [vmem:[#allocation2 + $0x61c] sm:$0xf0]  ;;  %v3810_v1 = vld [vmem:[#allocation2 + $0x20] sm:$0xf0] }
  0x8d   :  { %2033 = vmatpush.bf16.msrb.mxu3 %v4433_v6  ;;  %v5938_v6 = vld [vmem:[#allocation2 + $0x6dc] sm:$0xf0] }
  0x8e   :  { %1995 = vmatpush.bf16.msrb.mxu0 %v3833_v14  ;;  %v5791_v14 = vld [vmem:[#allocation2 + $0x24c] sm:$0xf]  ;;  %v4673_v17 = vor.u32 %v5938_v6, %v4672_v5  ;;  %v4362_v5 = vld [vmem:[#allocation2 + $0x470] sm:$0xf0]  ;;  %v5905_v6 = vld [vmem:[#allocation2 + $0x5dc] sm:$0xf] }
  0x8f   :  { %2008 = vmatpush.bf16.msrb.mxu1 %v4025_v18  ;;  %v4865_v18 = vor.u32 %v5986_v11, %v4864_v7  ;;  %v4577_v7 = vor.u32 %v5914_v58, %v4576_v57  ;;  %v5953_v11 = vld [vmem:[#allocation2 + $0x75c] sm:$0xf]  ;;  %v5983_v57 = vld [vmem:[#allocation2 + $0x84c] sm:$0xf]  ;;  %v4866_v58 = vld [vmem:[#allocation2 + $0x860] sm:$0xf0] }
  0x90   :  { %2021 = vmatpush.bf16.msrb.mxu2 %v4217_v19  ;;  %v3909_v19 = vor.u32 %v5743_v12, %v3906_v13  ;;  %v4746_v12 = vld [vmem:[#allocation2 + $0x770] sm:$0xf0]  ;;  %v4769_v13 = vor.u32 %v5962_v62, %v4768_v61 }
  0x91   :  { %2034 = vmatpush.bf16.msrb.mxu3 %v4409_v23  ;;  %v4101_v23 = vor.u32 %v5791_v14, %v4098_v16  ;;  %v3813_v14 = vor.u32 %v5719_v63, %v3810_v1  ;;  %v6001_v16 = vld [vmem:[#allocation2 + $0x8dc] sm:$0xf]  ;;  %v4749_v21 = vor.u32 %v5953_v11, %v4746_v12  ;;  %v4266_v63 = vld [vmem:[#allocation2 + $0x3b0] sm:$0xf0] }
  0x92   :  { %1996 = vmatpush.bf16.msrb.mxu0 %v3809_v31  ;;  %v4841_v31 = vor.u32 %v5980_v24, %v4840_v22  ;;  %v5851_v22 = vld [vmem:[#allocation2 + $0x42c] sm:$0xf] }
  0x93   :  { %2009 = vmatpush.bf16.msrb.mxu1 %v4001_v37  ;;  %v4816_v37 = vld [vmem:[#allocation2 + $0x7e8] sm:$0xf]  ;;  %v5899_v24 = vld [vmem:[#allocation2 + $0x5ac] sm:$0xf] }
  0x94   :  { %2022 = vmatpush.bf16.msrb.mxu2 %v4193_v38  ;;  %v4077_v38 = vor.u32 %v5785_v28, %v4074_v29  ;;  %v4817_v45 = vor.u32 %v5974_v39, %v4816_v37  ;;  %v5947_v28 = vld [vmem:[#allocation2 + $0x72c] sm:$0xf]  ;;  %v4722_v29 = vld [vmem:[#allocation2 + $0x740] sm:$0xf0]  ;;  %v5845_v37 = vld [vmem:[#allocation2 + $0x3fc] sm:$0xf] }
  0x95   :  { %2035 = vmatpush.bf16.msrb.mxu3 %v4385_v41  ;;  %1997 = vmatmul.bf16.vlgmr.msrb.gmra.mxu0 %v6368_v9  ;;  %v3858_v41 = vld [vmem:[#allocation2 + $0x80] sm:$0xf0]  ;;  %v5893_v39 = vld [vmem:[#allocation2 + $0x57c] sm:$0xf] }
  0x96   :  { %2041 = vmatpush.bf16.msra.mxu0 %v4745_v42  ;;  %2010 = vmatmul.bf16.vlgmr.msrb.gmra.mxu1 %v6381_v25  ;;  %v5779_v42 = vld [vmem:[#allocation2 + $0x1ec] sm:$0xf]  ;;  %v3861_v46 = vor.u32 %v5731_v40, %v3858_v41  ;;  %v4506_v41 = vld [vmem:[#allocation2 + $0x590] sm:$0xf0] }
  0x97   :  { %2054 = vmatpush.bf16.msra.mxu1 %v4937_v43  ;;  %2023 = vmatmul.bf16.vlgmr.msrb.gmra.mxu2 %v6366_v8  ;;  %v4050_v43 = vld [vmem:[#allocation2 + $0x200] sm:$0xf0] }
  0x98   :  { %2067 = vmatpush.bf16.msra.mxu2 %v3981_v44  ;;  %2036 = vmatmul.bf16.vlgmr.msrb.gmra.mxu3 %v6373_v15  ;;  %v4625_v44 = vor.u32 %v5926_v36, %v4624_v34  ;;  %v4053_v50 = vor.u32 %v5779_v42, %v4050_v43  ;;  %v4533_v34 = vor.u32 %v5899_v24, %v4530_v27  ;;  %v5941_v42 = vld [vmem:[#allocation2 + $0x6fc] sm:$0xf]  ;;  %v4698_v43 = vld [vmem:[#allocation2 + $0x710] sm:$0xf0]  ;;  %v4818_v24 = vld [vmem:[#allocation2 + $0x800] sm:$0xf0] }
  0x99   :  { %2080 = vmatpush.bf16.msra.mxu3 %v4173_v48  ;;  %v5920_v48 = vld [vmem:[#allocation2 + $0x64c] sm:$0xf0]  ;;  %v4725_v36 = vor.u32 %v5947_v28, %v4722_v29  ;;  %v4701_v49 = vor.u32 %v5941_v42, %v4698_v43  ;;  %v4794_v42 = vld [vmem:[#allocation2 + $0x7d0] sm:$0xf0] }
  0x9a   :  { %2042 = vmatpush.bf16.msra.mxu0 %v4721_v54  ;;  %v5773_v54 = vld [vmem:[#allocation2 + $0x1bc] sm:$0xf] }
  0x9b   :  { %2055 = vmatpush.bf16.msra.mxu1 %v4913_v55  ;;  %v4026_v55 = vld [vmem:[#allocation2 + $0x1d0] sm:$0xf0] }
  0x9c   :  { %2068 = vmatpush.bf16.msra.mxu2 %v3957_v56  ;;  %v4601_v56 = vor.u32 %v5920_v48, %v4600_v47  ;;  %v4029_v0 = vor.u32 %v5773_v54, %v4026_v55  ;;  %v5839_v47 = vld [vmem:[#allocation2 + $0x3cc] sm:$0xf]  ;;  %v4509_v48 = vor.u32 %v5893_v39, %v4506_v41  ;;  %v4674_v55 = vld [vmem:[#allocation2 + $0x6e0] sm:$0xf0]  ;;  %v4602_v39 = vld [vmem:[#allocation2 + $0x650] sm:$0xf0] }
  0x9d   :  { %2081 = vmatpush.bf16.msra.mxu3 %v4149_v60  ;;  %v3837_v60 = vor.u32 %v5725_v52, %v3834_v53  ;;  %v4482_v52 = vld [vmem:[#allocation2 + $0x560] sm:$0xf0]  ;;  %v5935_v54 = vld [vmem:[#allocation2 + $0x6cc] sm:$0xf]  ;;  %v5965_v41 = vld [vmem:[#allocation2 + $0x7bc] sm:$0xf] }
  0x9e   :  { %2043 = vmatpush.bf16.msra.mxu0 %v4697_v2  ;;  %v5767_v2 = vld [vmem:[#allocation2 + $0x18c] sm:$0xf]  ;;  %v4485_v61 = vor.u32 %v5887_v51, %v4482_v52  ;;  %v4677_v62 = vor.u32 %v5935_v54, %v4674_v55  ;;  %v4386_v52 = vld [vmem:[#allocation2 + $0x4a0] sm:$0xf0]  ;;  %v4797_v55 = vor.u32 %v5965_v41, %v4794_v42 }
  0x9f   :  { %2056 = vmatpush.bf16.msra.mxu1 %v4889_v3  ;;  %v4002_v3 = vld [vmem:[#allocation2 + $0x1a0] sm:$0xf0]  ;;  %v5863_v51 = vld [vmem:[#allocation2 + $0x48c] sm:$0xf] }
  0xa0   :  { %2069 = vmatpush.bf16.msra.mxu2 %v3933_v4  ;;  %v5857_v4 = vld [vmem:[#allocation2 + $0x45c] sm:$0xf] }
  0xa1   :  { %2082 = vmatpush.bf16.msra.mxu3 %v4125_v10  ;;  %v4554_v10 = vld [vmem:[#allocation2 + $0x5f0] sm:$0xf0] }
  0xa2   :  { %2044 = vmatpush.bf16.msra.mxu0 %v4673_v17  ;;  %v4938_v17 = vld [vmem:[#allocation2 + $0x8f0] sm:$0xf0]  ;;  %v4557_v20 = vor.u32 %v5905_v6, %v4554_v10  ;;  %v5977_v6 = vld [vmem:[#allocation2 + $0x81c] sm:$0xf] }
  0xa3   :  { %2057 = vmatpush.bf16.msra.mxu1 %v4865_v18  ;;  %v4005_v18 = vor.u32 %v5767_v2, %v4002_v3  ;;  %v4941_v26 = vor.u32 %v6001_v16, %v4938_v17  ;;  %v4869_v2 = vor.u32 %v5983_v57, %v4866_v58  ;;  %v4458_v3 = vld [vmem:[#allocation2 + $0x530] sm:$0xf0]  ;;  %v4242_v16 = vld [vmem:[#allocation2 + $0x380] sm:$0xf0]  ;;  %v5875_v17 = vld [vmem:[#allocation2 + $0x4ec] sm:$0xf] }
  0xa4   :  { %2070 = vmatpush.bf16.msra.mxu2 %v3909_v19  ;;  %v4365_v19 = vor.u32 %v5857_v4, %v4362_v5  ;;  %v5929_v4 = vld [vmem:[#allocation2 + $0x69c] sm:$0xf]  ;;  %v4650_v5 = vld [vmem:[#allocation2 + $0x6b0] sm:$0xf0]  ;;  %v4578_v57 = vld [vmem:[#allocation2 + $0x620] sm:$0xf0] }
  0xa5   :  { %2083 = vmatpush.bf16.msra.mxu3 %v4101_v23  ;;  %v4338_v23 = vld [vmem:[#allocation2 + $0x440] sm:$0xf0]  ;;  %v5959_v58 = vld [vmem:[#allocation2 + $0x78c] sm:$0xf] }
  0xa6   :  { %2045 = vmatpush.bf16.msra.mxu0 %v4649_v30  ;;  %v5995_v30 = vld [vmem:[#allocation2 + $0x8ac] sm:$0xf] }
  0xa7   :  { %2058 = vmatpush.bf16.msra.mxu1 %v4841_v31  ;;  %v4914_v31 = vld [vmem:[#allocation2 + $0x8c0] sm:$0xf0] }
  0xa8   :  { %2071 = vmatpush.bf16.msra.mxu2 %v3885_v33  ;;  %v4341_v33 = vor.u32 %v5851_v22, %v4338_v23  ;;  %v4917_v40 = vor.u32 %v5995_v30, %v4914_v31  ;;  %v4626_v22 = vld [vmem:[#allocation2 + $0x680] sm:$0xf0]  ;;  %v5971_v23 = vld [vmem:[#allocation2 + $0x7ec] sm:$0xf]  ;;  %v5821_v30 = vld [vmem:[#allocation2 + $0x33c] sm:$0xf] }
  0xa9   :  { %2084 = vmatpush.bf16.msra.mxu3 %v4077_v38  ;;  %v4314_v38 = vld [vmem:[#allocation2 + $0x410] sm:$0xf0] }
  0xaa   :  { %2046 = vmatpush.bf16.msra.mxu0 %v4625_v44  ;;  %v5989_v44 = vld [vmem:[#allocation2 + $0x87c] sm:$0xf]  ;;  %v4218_v31 = vld [vmem:[#allocation2 + $0x350] sm:$0xf0] }
  0xab   :  { %2059 = vmatpush.bf16.msra.mxu1 %v4817_v45  ;;  %v4890_v45 = vld [vmem:[#allocation2 + $0x890] sm:$0xf0] }
  0xac   :  { %2072 = vmatpush.bf16.msra.mxu2 %v3861_v46  ;;  %v4317_v46 = vor.u32 %v5845_v37, %v4314_v38  ;;  %v4893_v53 = vor.u32 %v5989_v44, %v4890_v45  ;;  %v4410_v37 = vld [vmem:[#allocation2 + $0x4d0] sm:$0xf0]  ;;  %v5917_v38 = vld [vmem:[#allocation2 + $0x63c] sm:$0xf]  ;;  %v4221_v45 = vor.u32 %v5821_v30, %v4218_v31  ;;  %v3936_v30 = vld [vmem:[#allocation2 + $0x100] sm:$0xf] }
  0xad   :  { %2085 = vmatpush.bf16.msra.mxu3 %v4053_v50  ;;  %v4290_v50 = vld [vmem:[#allocation2 + $0x3e0] sm:$0xf0]  ;;  %v5753_v31 = vld [vmem:[#allocation2 + $0x114] sm:$0xf0] }
  0xae   :  { %2047 = vmatpush.bf16.msra.mxu0 %v4601_v56  ;;  %v6410_v56 = vld [vmem:[#allocation4] sm:$0x3f]  ;;  %v3937_v41 = vor.u32 %v5753_v31, %v3936_v30  ;;  %v5729_v31 = vld [vmem:[#allocation2 + $0x54] sm:$0xf0] }
  0xaf   :  { %2060 = vmatpush.bf16.msra.mxu1 %v4793_v59  ;;  %v4293_v59 = vor.u32 %v5839_v47, %v4290_v50  ;;  %v381_v1 = vperm.slane %v6410_v56, 0  ;;  %v4194_v47 = vld [vmem:[#allocation2 + $0x320] sm:$0xf0]  ;;  %v4605_v50 = vor.u32 %v5917_v38, %v4602_v39  ;;  %v5849_v38 = vld [vmem:[#allocation2 + $0x414] sm:$0xf0] }
  0xb0   :  { %2073 = vmatpush.bf16.msra.mxu2 %v3837_v60  ;;  %v5833_v60 = vld [vmem:[#allocation2 + $0x39c] sm:$0xf]  ;;  %v4512_v39 = vld [vmem:[#allocation2 + $0x580] sm:$0xf] }
  0xb1   :  { %2086 = vmatpush.bf16.msra.mxu3 %v4029_v0  ;;  %v5881_v0 = vld [vmem:[#allocation2 + $0x51c] sm:$0xf]  ;;  %v4269_v10 = vor.u32 %v5833_v60, %v4266_v63  ;;  %v3984_v60 = vld [vmem:[#allocation2 + $0x160] sm:$0xf] }
  0xb2   :  { %2048 = vmatpush.bf16.msra.mxu0 %v4577_v7  ;;  %v4842_v7 = vld [vmem:[#allocation2 + $0x830] sm:$0xf0]  ;;  %v1842_v11 = vpop.f32.mrf.mxu0  ;;  %v4461_v12 = vor.u32 %v5881_v0, %v4458_v3  ;;  %v5813_v0 = vld [vmem:[#allocation2 + $0x2f4] sm:$0xf0]  ;;  %v3840_v30 = vld [vmem:[#allocation2 + $0x40] sm:$0xf] }
  0xb3   :  { %2061 = vmatpush.bf16.msra.mxu1 %v4769_v13  ;;  %v4653_v13 = vor.u32 %v5929_v4, %v4650_v5  ;;  %v4389_v4 = vor.u32 %v5863_v51, %v4386_v52  ;;  %v4488_v51 = vld [vmem:[#allocation2 + $0x550] sm:$0xf]  ;;  %v5891_v52 = vld [vmem:[#allocation2 + $0x564] sm:$0xf0] }
  0xb4   :  { %2074 = vmatpush.bf16.msra.mxu2 %v3813_v14  ;;  %v5827_v14 = vld [vmem:[#allocation2 + $0x36c] sm:$0xf] }
  0xb5   :  { %2087 = vmatpush.bf16.msra.mxu3 %v4005_v18  ;;  %2049 = vmatmul.bf16.vlgmr.msra.gmra.mxu0 %v6390_v32  ;;  %v1843_v18 = vadd.f32 %v1842_v11, %v381_v1  ;;  %v4368_v1 = vld [vmem:[#allocation2 + $0x460] sm:$0xf] }
  0xb6   :  { %2093 = vmatpush.bf16.msrb.mxu0 %v4365_v19  ;;  %2062 = vmatmul.bf16.vlgmr.msra.gmra.mxu1 %v6392_v35  ;;  %v4845_v19 = vor.u32 %v5977_v6, %v4842_v7  ;;  %v1855_v27 = vpop.f32.mrf.mxu1  ;;  %v4560_v6 = vld [vmem:[#allocation2 + $0x5e0] sm:$0xf]  ;;  %v5909_v7 = vld [vmem:[#allocation2 + $0x5f4] sm:$0xf0] }
  0xb7   :  { %2106 = vmatpush.bf16.msrb.mxu1 %v4557_v20  ;;  %2075 = vmatmul.bf16.vlgmr.msra.gmra.mxu2 %v6368_v9  ;;  %v4434_v20 = vld [vmem:[#allocation2 + $0x500] sm:$0xf0] }
  0xb8   :  { %2119 = vmatpush.bf16.msrb.mxu2 %v4749_v21  ;;  %2088 = vmatmul.bf16.vlgmr.msra.gmra.mxu3 %v6381_v25  ;;  %v5923_v21 = vld [vmem:[#allocation2 + $0x66c] sm:$0xf]  ;;  %v4437_v28 = vor.u32 %v5875_v17, %v4434_v20  ;;  %v5759_v17 = vld [vmem:[#allocation2 + $0x144] sm:$0xf0]  ;;  %v4561_v20 = vor.u32 %v5909_v7, %v4560_v6  ;;  %v5885_v6 = vld [vmem:[#allocation2 + $0x534] sm:$0xf0] }
  0xb9   :  { %2132 = vmatpush.bf16.msrb.mxu3 %v4941_v26  ;;  %v4245_v26 = vor.u32 %v5827_v14, %v4242_v16  ;;  %v4629_v29 = vor.u32 %v5923_v21, %v4626_v22  ;;  %v3960_v16 = vld [vmem:[#allocation2 + $0x130] sm:$0xf]  ;;  %v5807_v21 = vld [vmem:[#allocation2 + $0x2c4] sm:$0xf0]  ;;  %v382_v7 = vperm.slane %v6410_v56, 1 }
  0xba   :  { %2094 = vmatpush.bf16.msrb.mxu0 %v4341_v33  ;;  %v5869_v33 = vld [vmem:[#allocation2 + $0x4bc] sm:$0xf]  ;;  %v4344_v22 = vld [vmem:[#allocation2 + $0x430] sm:$0xf] }
  0xbb   :  { %2107 = vmatpush.bf16.msrb.mxu1 %v4533_v34  ;;  %v1856_v34 = vadd.f32 %v1855_v27, %v1843_v18  ;;  %v1881_v44 = vpop.f32.mrf.mxu3  ;;  %v4152_v18 = vld [vmem:[#allocation2 + $0x2b0] sm:$0xf]  ;;  %v3961_v27 = vor.u32 %v5759_v17, %v3960_v16  ;;  %v5783_v17 = vld [vmem:[#allocation2 + $0x204] sm:$0xf0] }
  0xbc   :  { %2120 = vmatpush.bf16.msrb.mxu2 %v4725_v36  ;;  %v4821_v36 = vor.u32 %v5971_v23, %v4818_v24  ;;  %v5855_v23 = vld [vmem:[#allocation2 + $0x444] sm:$0xf0]  ;;  %v4536_v24 = vld [vmem:[#allocation2 + $0x5b0] sm:$0xf] }
  0xbd   :  { %2133 = vmatpush.bf16.msrb.mxu3 %v4917_v40  ;;  %v1868_v40 = vpop.f32.mrf.mxu2 }
  0xbe   :  { %2095 = vmatpush.bf16.msrb.mxu0 %v4317_v46  ;;  %v1869_v43 = vadd.f32 %v1868_v40, %v1856_v34  ;;  %v5815_v46 = vld [vmem:[#allocation2 + $0x30c] sm:$0xf]  ;;  %v1857_v3 = vpop.f32.mrf.mxu1  ;;  %v5897_v40 = vld [vmem:[#allocation2 + $0x594] sm:$0xf0] }
  0xbf   :  { %2108 = vmatpush.bf16.msrb.mxu1 %v4509_v48  ;;  %v1844_v48 = vpop.f32.mrf.mxu0  ;;  %v4197_v63 = vor.u32 %v5815_v46, %v4194_v47  ;;  %v4104_v46 = vld [vmem:[#allocation2 + $0x250] sm:$0xf]  ;;  %v4513_v47 = vor.u32 %v5897_v40, %v4512_v39  ;;  %v5837_v3 = vld [vmem:[#allocation2 + $0x3b4] sm:$0xf0]  ;;  %v4416_v40 = vld [vmem:[#allocation2 + $0x4c0] sm:$0xf] }
  0xc0   :  { %2121 = vmatpush.bf16.msrb.mxu2 %v4701_v49  ;;  %v4413_v49 = vor.u32 %v5869_v33, %v4410_v37  ;;  %v6413_v54 = vadd.f32 %v1881_v44, %v1869_v43  ;;  %v4128_v33 = vld [vmem:[#allocation2 + $0x280] sm:$0xf]  ;;  %v3912_v44 = vld [vmem:[#allocation2 + $0xd0] sm:$0xf]  ;;  %v5795_v48 = vld [vmem:[#allocation2 + $0x264] sm:$0xf0] }
  0xc1   :  { %2134 = vmatpush.bf16.msrb.mxu3 %v4893_v53  ;;  %v5911_v53 = vld [vmem:[#allocation2 + $0x60c] sm:$0xf]  ;;  %v4320_v37 = vld [vmem:[#allocation2 + $0x400] sm:$0xf]  ;;  %v5825_v39 = vld [vmem:[#allocation2 + $0x354] sm:$0xf0] }
  0xc2   :  { %2096 = vmatpush.bf16.msrb.mxu0 %v4293_v59  ;;  %v4770_v59 = vld [vmem:[#allocation2 + $0x7a0] sm:$0xf0]  ;;  %v4581_v5 = vor.u32 %v5911_v53, %v4578_v57  ;;  %v4321_v43 = vor.u32 %v5849_v38, %v4320_v37  ;;  %v5777_v37 = vld [vmem:[#allocation2 + $0x1d4] sm:$0xf0]  ;;  %v4224_v38 = vld [vmem:[#allocation2 + $0x340] sm:$0xf] }
  0xc3   :  { %2109 = vmatpush.bf16.msrb.mxu1 %v4485_v61  ;;  %v5765_v61 = vld [vmem:[#allocation2 + $0x174] sm:$0xf0] }
  0xc4   :  { %2122 = vmatpush.bf16.msrb.mxu2 %v4677_v62  ;;  %v4176_v62 = vld [vmem:[#allocation2 + $0x2e0] sm:$0xf]  ;;  %v3985_v11 = vor.u32 %v5765_v61, %v3984_v60 }
  0xc5   :  { %2135 = vmatpush.bf16.msrb.mxu3 %v4869_v2  ;;  %v5861_v2 = vld [vmem:[#allocation2 + $0x474] sm:$0xf0]  ;;  %v3888_v61 = vld [vmem:[#allocation2 + $0xa0] sm:$0xf] }
  0xc6   :  { %2097 = vmatpush.bf16.msrb.mxu0 %v4269_v10  ;;  %v4773_v10 = vor.u32 %v5959_v58, %v4770_v59  ;;  %v4369_v14 = vor.u32 %v5861_v2, %v4368_v1  ;;  %v4105_v59 = vor.u32 %v5795_v48, %v4104_v46  ;;  %v5789_v1 = vld [vmem:[#allocation2 + $0x234] sm:$0xf0]  ;;  %v4272_v2 = vld [vmem:[#allocation2 + $0x3a0] sm:$0xf]  ;;  %v4225_v46 = vor.u32 %v5825_v39, %v4224_v38  ;;  %v5771_v48 = vld [vmem:[#allocation2 + $0x1a4] sm:$0xf0] }
  0xc7   :  { %2110 = vmatpush.bf16.msrb.mxu1 %v4461_v12  ;;  %v1870_v12 = vpop.f32.mrf.mxu2  ;;  %v4680_v39 = vld [vmem:[#allocation2 + $0x6d0] sm:$0xf] }
  0xc8   :  { %2123 = vmatpush.bf16.msrb.mxu2 %v4653_v13  ;;  %v4177_v13 = vor.u32 %v5813_v0, %v4176_v62  ;;  %v5741_v62 = vld [vmem:[#allocation2 + $0xb4] sm:$0xf0]  ;;  %v4489_v0 = vor.u32 %v5891_v52, %v4488_v51  ;;  %v3864_v12 = vld [vmem:[#allocation2 + $0x70] sm:$0xf]  ;;  %v5819_v51 = vld [vmem:[#allocation2 + $0x324] sm:$0xf0] }
  0xc9   :  { %2136 = vmatpush.bf16.msrb.mxu3 %v4845_v19  ;;  %v1883_v19 = vpop.f32.mrf.mxu3  ;;  %v4392_v52 = vld [vmem:[#allocation2 + $0x490] sm:$0xf] }
  0xca   :  { %2098 = vmatpush.bf16.msrb.mxu0 %v4245_v26  ;;  %v5903_v26 = vld [vmem:[#allocation2 + $0x5c4] sm:$0xf0] }
  0xcb   :  { %2111 = vmatpush.bf16.msrb.mxu1 %v4437_v28  ;;  %v4153_v28 = vor.u32 %v5807_v21, %v4152_v18  ;;  %v4537_v34 = vor.u32 %v5903_v26, %v4536_v24  ;;  %v4248_v18 = vld [vmem:[#allocation2 + $0x370] sm:$0xf]  ;;  %v5831_v19 = vld [vmem:[#allocation2 + $0x384] sm:$0xf0] }
  0xcc   :  { %2124 = vmatpush.bf16.msrb.mxu2 %v4629_v29  ;;  %v4345_v29 = vor.u32 %v5855_v23, %v4344_v22  ;;  %v4440_v21 = vld [vmem:[#allocation2 + $0x4f0] sm:$0xf]  ;;  %v5879_v22 = vld [vmem:[#allocation2 + $0x504] sm:$0xf0] }
  0xcd   :  { %2137 = vmatpush.bf16.msrb.mxu3 %v4821_v36  ;;  %v5801_v36 = vld [vmem:[#allocation2 + $0x294] sm:$0xf0] }
  0xce   :  { %2099 = vmatpush.bf16.msrb.mxu0 %v4221_v45  ;;  %v4129_v42 = vor.u32 %v5801_v36, %v4128_v33  ;;  %v5747_v45 = vld [vmem:[#allocation2 + $0xe4] sm:$0xf0]  ;;  %v4032_v33 = vld [vmem:[#allocation2 + $0x1c0] sm:$0xf]  ;;  %v4441_v36 = vor.u32 %v5879_v22, %v4440_v21 }
  0xcf   :  { %2112 = vmatpush.bf16.msrb.mxu1 %v4413_v49  ;;  %v4296_v49 = vld [vmem:[#allocation2 + $0x3d0] sm:$0xf] }
  0xd0   :  { %2125 = vmatpush.bf16.msrb.mxu2 %v4605_v50  ;;  %v5843_v50 = vld [vmem:[#allocation2 + $0x3e4] sm:$0xf0] }
  0xd1   :  { %2138 = vmatpush.bf16.msrb.mxu3 %v4797_v55  ;;  %v3913_v55 = vor.u32 %v5747_v45, %v3912_v44  ;;  %v4297_v60 = vor.u32 %v5843_v50, %v4296_v49  ;;  %v5723_v44 = vld [vmem:[#allocation2 + $0x24] sm:$0xf0]  ;;  %v4033_v45 = vor.u32 %v5777_v37, %v4032_v33  ;;  %v4200_v49 = vld [vmem:[#allocation2 + $0x310] sm:$0xf]  ;;  %v4130_v33 = vld [vmem:[#allocation2 + $0x298] sm:$0xf0] }
  0xd2   :  { %2100 = vmatpush.bf16.msrb.mxu0 %v4197_v63  ;;  %v1894_v53 = vpop.f32.mrf.mxu0  ;;  %v4080_v63 = vld [vmem:[#allocation2 + $0x220] sm:$0xf] }
  0xd3   :  { %2113 = vmatpush.bf16.msrb.mxu1 %v4389_v4  ;;  %v1895_v57 = vadd.f32 %v1894_v53, %v6413_v54  ;;  %v1907_v58 = vpop.f32.mrf.mxu1  ;;  %v3889_v54 = vor.u32 %v5741_v62, %v3888_v61  ;;  %v5867_v53 = vld [vmem:[#allocation2 + $0x4a4] sm:$0xf0]  ;;  %v6005_v62 = vld [vmem:[#allocation2 + $0x8f4] sm:$0xf0] }
  0xd4   :  { %2126 = vmatpush.bf16.msrb.mxu2 %v4581_v5  ;;  %v4464_v5 = vld [vmem:[#allocation2 + $0x520] sm:$0xf] }
  0xd5   :  { %2139 = vmatpush.bf16.msrb.mxu3 %v4773_v10  ;;  %2101 = vmatmul.bf16.vlgmr.msrb.gmra.mxu0 %v6366_v8  ;;  %v6420_v4 = vadd.f32 %v1907_v58, %v1895_v57  ;;  %v4081_v10 = vor.u32 %v5789_v1, %v4080_v63  ;;  %v4465_v16 = vor.u32 %v5885_v6, %v4464_v5  ;;  %v4752_v57 = vld [vmem:[#allocation2 + $0x760] sm:$0xf]  ;;  %v5957_v58 = vld [vmem:[#allocation2 + $0x774] sm:$0xf0]  ;;  %v5762_v63 = vld [vmem:[#allocation2 + $0x164] sm:$0xf] }
  0xd6   :  { %2145 = vmatpush.bf16.msra.mxu0 %v3985_v11  ;;  %2114 = vmatmul.bf16.vlgmr.msrb.gmra.mxu1 %v6373_v15  ;;  %v4273_v11 = vor.u32 %v5837_v3, %v4272_v2  ;;  %v4201_v2 = vor.u32 %v5819_v51, %v4200_v49  ;;  %v5810_v3 = vld [vmem:[#allocation2 + $0x2e4] sm:$0xf]  ;;  %v4178_v5 = vld [vmem:[#allocation2 + $0x2f8] sm:$0xf0]  ;;  %v4393_v6 = vor.u32 %v5867_v53, %v4392_v52  ;;  %v4656_v52 = vld [vmem:[#allocation2 + $0x6a0] sm:$0xf] }
  0xd7   :  { %2158 = vmatpush.bf16.msra.mxu1 %v4177_v13  ;;  %2127 = vmatmul.bf16.vlgmr.msrb.gmra.mxu2 %v6390_v32  ;;  %v5735_v13 = vld [vmem:[#allocation2 + $0x84] sm:$0xf0]  ;;  %v5933_v53 = vld [vmem:[#allocation2 + $0x6b4] sm:$0xf0] }
  0xd8   :  { %2171 = vmatpush.bf16.msra.mxu2 %v4369_v14  ;;  %2140 = vmatmul.bf16.vlgmr.msrb.gmra.mxu3 %v6392_v35  ;;  %v4056_v14 = vld [vmem:[#allocation2 + $0x1f0] sm:$0xf]  ;;  %v3865_v26 = vor.u32 %v5735_v13, %v3864_v12  ;;  %v5951_v12 = vld [vmem:[#allocation2 + $0x744] sm:$0xf0] }
  0xd9   :  { %2184 = vmatpush.bf16.msra.mxu3 %v4561_v20  ;;  %v4920_v13 = vld [vmem:[#allocation2 + $0x8b0] sm:$0xf] }
  0xda   :  { %2146 = vmatpush.bf16.msra.mxu0 %v3961_v27  ;;  %v1920_v20 = vpop.f32.mrf.mxu2  ;;  %v1896_v56 = vpop.f32.mrf.mxu0 }
  0xdb   :  { %2159 = vmatpush.bf16.msra.mxu1 %v4153_v28  ;;  %v1921_v23 = vadd.f32 %v1920_v20, %v382_v7  ;;  %v1933_v24 = vpop.f32.mrf.mxu3  ;;  %v1909_v27 = vpop.f32.mrf.mxu1  ;;  %v4057_v28 = vor.u32 %v5783_v17, %v4056_v14  ;;  %v4753_v7 = vor.u32 %v5957_v58, %v4752_v57  ;;  %v4181_v14 = vor.u32 %v5810_v3, %v4178_v5  ;;  %v5756_v17 = vld [vmem:[#allocation2 + $0x134] sm:$0xf]  ;;  %v4154_v20 = vld [vmem:[#allocation2 + $0x2c8] sm:$0xf0]  ;;  %v5945_v56 = vld [vmem:[#allocation2 + $0x714] sm:$0xf0] }
  0xdc   :  { %2172 = vmatpush.bf16.msra.mxu2 %v4345_v29  ;;  %v4249_v29 = vor.u32 %v5831_v19, %v4248_v18  ;;  %v3962_v18 = vld [vmem:[#allocation2 + $0x148] sm:$0xf0]  ;;  %v5804_v19 = vld [vmem:[#allocation2 + $0x2b4] sm:$0xf] }
  0xdd   :  { %2185 = vmatpush.bf16.msra.mxu3 %v4537_v34  ;;  %v6423_v34 = vadd.f32 %v1933_v24, %v1921_v23  ;;  %v3965_v23 = vor.u32 %v5756_v17, %v3962_v18  ;;  %v4704_v24 = vld [vmem:[#allocation2 + $0x700] sm:$0xf]  ;;  %v4157_v27 = vor.u32 %v5804_v19, %v4154_v20  ;;  %v5780_v17 = vld [vmem:[#allocation2 + $0x1f4] sm:$0xf]  ;;  %v4058_v18 = vld [vmem:[#allocation2 + $0x208] sm:$0xf0] }
  0xde   :  { %2147 = vmatpush.bf16.msra.mxu0 %v3937_v41  ;;  %v5873_v41 = vld [vmem:[#allocation2 + $0x4d4] sm:$0xf0] }
  0xdf   :  { %2160 = vmatpush.bf16.msra.mxu1 %v4129_v42  ;;  %v3841_v42 = vor.u32 %v5729_v31, %v3840_v30  ;;  %v4417_v50 = vor.u32 %v5873_v41, %v4416_v40  ;;  %v3938_v30 = vld [vmem:[#allocation2 + $0x118] sm:$0xf0]  ;;  %v5798_v31 = vld [vmem:[#allocation2 + $0x284] sm:$0xf]  ;;  %v5939_v40 = vld [vmem:[#allocation2 + $0x6e4] sm:$0xf0] }
  0xe0   :  { %2173 = vmatpush.bf16.msra.mxu2 %v4321_v43  ;;  %v3816_v43 = vld [vmem:[#allocation2 + $0x10] sm:$0xf] }
  0xe1   :  { %2186 = vmatpush.bf16.msra.mxu3 %v4513_v47  ;;  %v4008_v47 = vld [vmem:[#allocation2 + $0x190] sm:$0xf]  ;;  %v3817_v61 = vor.u32 %v5723_v44, %v3816_v43  ;;  %v5987_v43 = vld [vmem:[#allocation2 + $0x864] sm:$0xf0]  ;;  %v5744_v44 = vld [vmem:[#allocation2 + $0xd4] sm:$0xf] }
  0xe2   :  { %2148 = vmatpush.bf16.msra.mxu0 %v3913_v55  ;;  %v1922_v55 = vpop.f32.mrf.mxu2  ;;  %v4009_v1 = vor.u32 %v5771_v48, %v4008_v47  ;;  %v4872_v41 = vld [vmem:[#allocation2 + $0x850] sm:$0xf]  ;;  %v4106_v47 = vld [vmem:[#allocation2 + $0x268] sm:$0xf0]  ;;  %v4681_v48 = vor.u32 %v5939_v40, %v4680_v39  ;;  %v5915_v39 = vld [vmem:[#allocation2 + $0x624] sm:$0xf0] }
  0xe3   :  { %2161 = vmatpush.bf16.msra.mxu1 %v4105_v59  ;;  %v4944_v59 = vld [vmem:[#allocation2 + $0x8e0] sm:$0xf] }
  0xe4   :  { %2174 = vmatpush.bf16.msra.mxu2 %v4297_v60  ;;  %v1935_v60 = vpop.f32.mrf.mxu3  ;;  %v4848_v55 = vld [vmem:[#allocation2 + $0x820] sm:$0xf] }
  0xe5   :  { %2187 = vmatpush.bf16.msra.mxu3 %v4489_v0  ;;  %v3986_v0 = vld [vmem:[#allocation2 + $0x178] sm:$0xf0]  ;;  %v5981_v60 = vld [vmem:[#allocation2 + $0x834] sm:$0xf0] }
  0xe6   :  { %2149 = vmatpush.bf16.msra.mxu0 %v3889_v54  ;;  %v4945_v54 = vor.u32 %v6005_v62, %v4944_v59  ;;  %v3890_v62 = vld [vmem:[#allocation2 + $0xb8] sm:$0xf0]  ;;  %v4849_v3 = vor.u32 %v5981_v60, %v4848_v55 }
  0xe7   :  { %2162 = vmatpush.bf16.msra.mxu1 %v4081_v10  ;;  %v3989_v10 = vor.u32 %v5762_v63, %v3986_v0  ;;  %v5786_v63 = vld [vmem:[#allocation2 + $0x224] sm:$0xf]  ;;  %v4082_v0 = vld [vmem:[#allocation2 + $0x238] sm:$0xf0] }
  0xe8   :  { %2175 = vmatpush.bf16.msra.mxu2 %v4273_v11  ;;  %v4728_v11 = vld [vmem:[#allocation2 + $0x730] sm:$0xf] }
  0xe9   :  { %2188 = vmatpush.bf16.msra.mxu3 %v4465_v16  ;;  %v5999_v16 = vld [vmem:[#allocation2 + $0x8c4] sm:$0xf0]  ;;  %v4729_v21 = vor.u32 %v5951_v12, %v4728_v11  ;;  %v5732_v12 = vld [vmem:[#allocation2 + $0x74] sm:$0xf] }
  0xea   :  { %2150 = vmatpush.bf16.msra.mxu0 %v3865_v26  ;;  %v4921_v22 = vor.u32 %v5999_v16, %v4920_v13  ;;  %v4896_v26 = vld [vmem:[#allocation2 + $0x880] sm:$0xf]  ;;  %v5975_v11 = vld [vmem:[#allocation2 + $0x804] sm:$0xf0]  ;;  %v3866_v13 = vld [vmem:[#allocation2 + $0x88] sm:$0xf0] }
  0xeb   :  { %2163 = vmatpush.bf16.msra.mxu1 %v4057_v28  ;;  %v5993_v28 = vld [vmem:[#allocation2 + $0x894] sm:$0xf0] }
  0xec   :  { %2176 = vmatpush.bf16.msra.mxu2 %v4249_v29  ;;  %v5750_v29 = vld [vmem:[#allocation2 + $0x104] sm:$0xf]  ;;  %v4897_v37 = vor.u32 %v5993_v28, %v4896_v26  ;;  %v4800_v26 = vld [vmem:[#allocation2 + $0x7c0] sm:$0xf]  ;;  %v4061_v28 = vor.u32 %v5780_v17, %v4058_v18 }
  0xed   :  { %2189 = vmatpush.bf16.msra.mxu3 %v4441_v36  ;;  %v4705_v36 = vor.u32 %v5945_v56, %v4704_v24  ;;  %v3941_v38 = vor.u32 %v5750_v29, %v3938_v30  ;;  %v4608_v24 = vld [vmem:[#allocation2 + $0x640] sm:$0xf]  ;;  %v5921_v56 = vld [vmem:[#allocation2 + $0x654] sm:$0xf0]  ;;  %v5726_v30 = vld [vmem:[#allocation2 + $0x44] sm:$0xf] }
  0xee   :  { %2151 = vmatpush.bf16.msra.mxu0 %v3841_v42  ;;  %v4133_v42 = vor.u32 %v5798_v31, %v4130_v33  ;;  %v5969_v29 = vld [vmem:[#allocation2 + $0x7d4] sm:$0xf0]  ;;  %v3842_v31 = vld [vmem:[#allocation2 + $0x58] sm:$0xf0]  ;;  %v5774_v33 = vld [vmem:[#allocation2 + $0x1c4] sm:$0xf] }
  0xef   :  { %2164 = vmatpush.bf16.msra.mxu1 %v4033_v45  ;;  %v3914_v45 = vld [vmem:[#allocation2 + $0xe8] sm:$0xf0]  ;;  %v4801_v40 = vor.u32 %v5969_v29, %v4800_v26  ;;  %v5846_v18 = vld [vmem:[#allocation2 + $0x404] sm:$0xf] }
  0xf0   :  { %2177 = vmatpush.bf16.msra.mxu2 %v4225_v46  ;;  %v5792_v46 = vld [vmem:[#allocation2 + $0x254] sm:$0xf]  ;;  %v3917_v51 = vor.u32 %v5744_v44, %v3914_v45  ;;  %v5990_v26 = vld [vmem:[#allocation2 + $0x884] sm:$0xf] }
  0xf1   :  { %2190 = vmatpush.bf16.msra.mxu3 %v4417_v50  ;;  %v4873_v50 = vor.u32 %v5987_v43, %v4872_v41  ;;  %v4109_v59 = vor.u32 %v5792_v46, %v4106_v47  ;;  %v3845_v41 = vor.u32 %v5726_v30, %v3842_v31  ;;  %v5963_v43 = vld [vmem:[#allocation2 + $0x7a4] sm:$0xf0]  ;;  %v5720_v44 = vld [vmem:[#allocation2 + $0x14] sm:$0xf]  ;;  %v3818_v47 = vld [vmem:[#allocation2 + $0x28] sm:$0xf0] }
  0xf2   :  { %2152 = vmatpush.bf16.msra.mxu0 %v3817_v61  ;;  %v1946_v49 = vpop.f32.mrf.mxu0  ;;  %v5738_v61 = vld [vmem:[#allocation2 + $0xa4] sm:$0xf]  ;;  %v5840_v31 = vld [vmem:[#allocation2 + $0x3d4] sm:$0xf] }
  0xf3   :  { %2165 = vmatpush.bf16.msra.mxu1 %v4009_v1  ;;  %v1947_v57 = vadd.f32 %v1946_v49, %v6423_v34  ;;  %v1959_v58 = vpop.f32.mrf.mxu1  ;;  %v3893_v5 = vor.u32 %v5738_v61, %v3890_v62  ;;  %v4085_v34 = vor.u32 %v5786_v63, %v4082_v0  ;;  %v4010_v49 = vld [vmem:[#allocation2 + $0x1a8] sm:$0xf0]  ;;  %v3821_v61 = vor.u32 %v5720_v44, %v3818_v47  ;;  %v6002_v62 = vld [vmem:[#allocation2 + $0x8e4] sm:$0xf]  ;;  %v4946_v63 = vld [vmem:[#allocation2 + $0x8f8] sm:$0xf0] }
  0xf4   :  { %2178 = vmatpush.bf16.msra.mxu2 %v4201_v2  ;;  %v4657_v2 = vor.u32 %v5933_v53, %v4656_v52  ;;  %v4370_v52 = vld [vmem:[#allocation2 + $0x478] sm:$0xf0]  ;;  %v5906_v53 = vld [vmem:[#allocation2 + $0x5e4] sm:$0xf] }
  0xf5   :  { %2191 = vmatpush.bf16.msra.mxu3 %v4393_v6  ;;  %2153 = vmatmul.bf16.vlgmr.msra.gmra.mxu0 %v6368_v9  ;;  %v1960_v1 = vadd.f32 %v1959_v58, %v1947_v57  ;;  %v4632_v6 = vld [vmem:[#allocation2 + $0x670] sm:$0xf]  ;;  %v4562_v57 = vld [vmem:[#allocation2 + $0x5f8] sm:$0xf0]  ;;  %v5954_v58 = vld [vmem:[#allocation2 + $0x764] sm:$0xf] }
  0xf6   :  { %2197 = vmatpush.bf16.msrb.mxu0 %v4753_v7  ;;  %2166 = vmatmul.bf16.vlgmr.msra.gmra.mxu1 %v6381_v25  ;;  %v5927_v7 = vld [vmem:[#allocation2 + $0x684] sm:$0xf0]  ;;  %v5882_v47 = vld [vmem:[#allocation2 + $0x524] sm:$0xf] }
  0xf7   :  { %2210 = vmatpush.bf16.msrb.mxu1 %v4945_v54  ;;  %2179 = vmatmul.bf16.vlgmr.msra.gmra.mxu2 %v6366_v8  ;;  %v4824_v54 = vld [vmem:[#allocation2 + $0x7f0] sm:$0xf]  ;;  %v4633_v19 = vor.u32 %v5927_v7, %v4632_v6  ;;  %v4346_v6 = vld [vmem:[#allocation2 + $0x448] sm:$0xf0]  ;;  %v5900_v7 = vld [vmem:[#allocation2 + $0x5b4] sm:$0xf] }
  0xf8   :  { %2223 = vmatpush.bf16.msrb.mxu2 %v3989_v10  ;;  %2192 = vmatmul.bf16.vlgmr.msra.gmra.mxu3 %v6373_v15 }
  0xf9   :  { %2236 = vmatpush.bf16.msrb.mxu3 %v4181_v14 }
  0xfa   :  { %2198 = vmatpush.bf16.msrb.mxu0 %v4729_v21  ;;  %v1972_v10 = vpop.f32.mrf.mxu2  ;;  %v1948_v21 = vpop.f32.mrf.mxu0 }
  0xfb   :  { %2211 = vmatpush.bf16.msrb.mxu1 %v4921_v22  ;;  %v1973_v14 = vadd.f32 %v1972_v10, %v1960_v1  ;;  %v1985_v16 = vpop.f32.mrf.mxu3  ;;  %v4825_v22 = vor.u32 %v5975_v11, %v4824_v54  ;;  %v4949_v54 = vor.u32 %v6002_v62, %v4946_v63  ;;  %v4538_v10 = vld [vmem:[#allocation2 + $0x5c8] sm:$0xf0]  ;;  %v5894_v21 = vld [vmem:[#allocation2 + $0x584] sm:$0xf]  ;;  %v5876_v62 = vld [vmem:[#allocation2 + $0x4f4] sm:$0xf] }
  0xfc   :  { %2224 = vmatpush.bf16.msrb.mxu2 %v3965_v23  ;;  %v3869_v23 = vor.u32 %v5732_v12, %v3866_v13  ;;  %v4730_v11 = vld [vmem:[#allocation2 + $0x748] sm:$0xf0]  ;;  %v5996_v12 = vld [vmem:[#allocation2 + $0x8b4] sm:$0xf] }
  0xfd   :  { %2237 = vmatpush.bf16.msrb.mxu3 %v4157_v27  ;;  %v6430_v20 = vadd.f32 %v1985_v16, %v1973_v14  ;;  %v1961_v27 = vpop.f32.mrf.mxu1  ;;  %v4922_v13 = vld [vmem:[#allocation2 + $0x8c8] sm:$0xf0]  ;;  %v4541_v16 = vor.u32 %v5900_v7, %v4538_v10 }
  0xfe   :  { %2199 = vmatpush.bf16.msrb.mxu0 %v4705_v36  ;;  %v4034_v36 = vld [vmem:[#allocation2 + $0x1d8] sm:$0xf0]  ;;  %v4826_v7 = vld [vmem:[#allocation2 + $0x808] sm:$0xf0] }
  0xff   :  { %2212 = vmatpush.bf16.msrb.mxu1 %v4897_v37  ;;  %v4609_v37 = vor.u32 %v5921_v56, %v4608_v24  ;;  %v4037_v46 = vor.u32 %v5774_v33, %v4034_v36  ;;  %v5942_v24 = vld [vmem:[#allocation2 + $0x704] sm:$0xf]  ;;  %v4706_v56 = vld [vmem:[#allocation2 + $0x718] sm:$0xf0]  ;;  %v4298_v33 = vld [vmem:[#allocation2 + $0x3e8] sm:$0xf0] }
 0x100   :  { %2225 = vmatpush.bf16.msrb.mxu2 %v3941_v38  ;;  %v4584_v38 = vld [vmem:[#allocation2 + $0x610] sm:$0xf]  ;;  %v4898_v27 = vld [vmem:[#allocation2 + $0x898] sm:$0xf0]  ;;  %v4709_v30 = vor.u32 %v5942_v24, %v4706_v56  ;;  %v5888_v36 = vld [vmem:[#allocation2 + $0x554] sm:$0xf] }
 0x101   :  { %2238 = vmatpush.bf16.msrb.mxu3 %v4133_v42  ;;  %v4776_v42 = vld [vmem:[#allocation2 + $0x790] sm:$0xf]  ;;  %v4585_v55 = vor.u32 %v5915_v39, %v4584_v38  ;;  %v4490_v38 = vld [vmem:[#allocation2 + $0x568] sm:$0xf0]  ;;  %v5936_v39 = vld [vmem:[#allocation2 + $0x6d4] sm:$0xf] }
 0x102   :  { %2200 = vmatpush.bf16.msrb.mxu0 %v4681_v48  ;;  %v1974_v45 = vpop.f32.mrf.mxu2  ;;  %v5768_v48 = vld [vmem:[#allocation2 + $0x194] sm:$0xf]  ;;  %v4777_v60 = vor.u32 %v5963_v43, %v4776_v42  ;;  %v4301_v42 = vor.u32 %v5840_v31, %v4298_v33 }
 0x103   :  { %2213 = vmatpush.bf16.msrb.mxu1 %v4873_v50  ;;  %v1987_v50 = vpop.f32.mrf.mxu3  ;;  %v4013_v0 = vor.u32 %v5768_v48, %v4010_v49  ;;  %v5834_v45 = vld [vmem:[#allocation2 + $0x3a4] sm:$0xf]  ;;  %v5816_v56 = vld [vmem:[#allocation2 + $0x314] sm:$0xf] }
 0x104   :  { %2226 = vmatpush.bf16.msrb.mxu2 %v3917_v51  ;;  %v5858_v51 = vld [vmem:[#allocation2 + $0x464] sm:$0xf]  ;;  %v4466_v50 = vld [vmem:[#allocation2 + $0x538] sm:$0xf0]  ;;  %v5912_v31 = vld [vmem:[#allocation2 + $0x614] sm:$0xf] }
 0x105   :  { %2239 = vmatpush.bf16.msrb.mxu3 %v4109_v59  ;;  %v4754_v59 = vld [vmem:[#allocation2 + $0x778] sm:$0xf0]  ;;  %v4373_v1 = vor.u32 %v5858_v51, %v4370_v52  ;;  %v5930_v51 = vld [vmem:[#allocation2 + $0x6a4] sm:$0xf] }
 0x106   :  { %2201 = vmatpush.bf16.msrb.mxu0 %v4657_v2  ;;  %v4565_v2 = vor.u32 %v5906_v53, %v4562_v57  ;;  %v4658_v52 = vld [vmem:[#allocation2 + $0x6b8] sm:$0xf0]  ;;  %v5978_v53 = vld [vmem:[#allocation2 + $0x824] sm:$0xf] }
 0x107   :  { %2214 = vmatpush.bf16.msrb.mxu1 %v4849_v3  ;;  %v4757_v3 = vor.u32 %v5954_v58, %v4754_v59  ;;  %v4469_v58 = vor.u32 %v5882_v47, %v4466_v50  ;;  %v4661_v59 = vor.u32 %v5930_v51, %v4658_v52  ;;  %v5048_v52 = vld [vmem:[#allocation6 + $0xc0] sm:$0xf] }
 0x108   :  { %2227 = vmatpush.bf16.msrb.mxu2 %v3893_v5  ;;  %v5852_v5 = vld [vmem:[#allocation2 + $0x434] sm:$0xf] }
 0x109   :  { %2240 = vmatpush.bf16.msrb.mxu3 %v4085_v34  ;;  %v5948_v34 = vld [vmem:[#allocation2 + $0x734] sm:$0xf]  ;;  %v4349_v14 = vor.u32 %v5852_v5, %v4346_v6 }
 0x10a   :  { %2202 = vmatpush.bf16.msrb.mxu0 %v4633_v19  ;;  %v4733_v17 = vor.u32 %v5948_v34, %v4730_v11  ;;  %v4322_v19 = vld [vmem:[#allocation2 + $0x418] sm:$0xf0]  ;;  %v5972_v6 = vld [vmem:[#allocation2 + $0x7f4] sm:$0xf] }
 0x10b   :  { %2215 = vmatpush.bf16.msrb.mxu1 %v4825_v22  ;;  %v4925_v22 = vor.u32 %v5996_v12, %v4922_v13  ;;  %v5822_v12 = vld [vmem:[#allocation2 + $0x344] sm:$0xf]  ;;  %v4226_v13 = vld [vmem:[#allocation2 + $0x358] sm:$0xf0] }
 0x10c   :  { %2228 = vmatpush.bf16.msrb.mxu2 %v3869_v23  ;;  %v4514_v23 = vld [vmem:[#allocation2 + $0x598] sm:$0xf0]  ;;  %v4229_v24 = vor.u32 %v5822_v12, %v4226_v13  ;;  %v5432_v12 = vld [vmem:[#allocation6 + $0x3c0] sm:$0xf]  ;;  %v6128_v13 = vld [vmem:[#allocation6 + $0x3cc] sm:$0xf0] }
 0x10d   :  { %2241 = vmatpush.bf16.msrb.mxu3 %v4061_v28  ;;  %v4325_v28 = vor.u32 %v5846_v18, %v4322_v19  ;;  %v4517_v29 = vor.u32 %v5894_v21, %v4514_v23  ;;  %v4418_v18 = vld [vmem:[#allocation2 + $0x4d8] sm:$0xf0]  ;;  %v5918_v19 = vld [vmem:[#allocation2 + $0x644] sm:$0xf] }
 0x10e   :  { %2203 = vmatpush.bf16.msrb.mxu0 %v4609_v37  ;;  %v4901_v37 = vor.u32 %v5990_v26, %v4898_v27  ;;  %v4610_v21 = vld [vmem:[#allocation2 + $0x658] sm:$0xf0]  ;;  %v4202_v26 = vld [vmem:[#allocation2 + $0x328] sm:$0xf0] }
 0x10f   :  { %2216 = vmatpush.bf16.msrb.mxu1 %v4801_v40  ;;  %v4682_v40 = vld [vmem:[#allocation2 + $0x6e8] sm:$0xf0]  ;;  %v4802_v23 = vld [vmem:[#allocation2 + $0x7d8] sm:$0xf0] }
 0x110   :  { %2229 = vmatpush.bf16.msrb.mxu2 %v3845_v41  ;;  %v5984_v41 = vld [vmem:[#allocation2 + $0x854] sm:$0xf]  ;;  %v4685_v44 = vor.u32 %v5936_v39, %v4682_v40  ;;  %v4778_v39 = vld [vmem:[#allocation2 + $0x7a8] sm:$0xf0] }
 0x111   :  { %2242 = vmatpush.bf16.msrb.mxu3 %v4037_v46  ;;  %v4274_v46 = vld [vmem:[#allocation2 + $0x3b8] sm:$0xf0] }
 0x112   :  { %2204 = vmatpush.bf16.msrb.mxu0 %v4585_v55  ;;  %v6436_v43 = vpop.f32.mrf.mxu0  ;;  %v4850_v55 = vld [vmem:[#allocation2 + $0x838] sm:$0xf0]  ;;  %v4277_v57 = vor.u32 %v5834_v45, %v4274_v46  ;;  %v5320_v45 = vld [vmem:[#allocation6 + $0x2e0] sm:$0xf]  ;;  %v6100_v46 = vld [vmem:[#allocation6 + $0x2ec] sm:$0xf0] }
 0x113   :  { %2217 = vmatpush.bf16.msrb.mxu1 %v4777_v60  ;;  %v6438_v48 = vpop.f32.mrf.mxu1  ;;  %v5828_v60 = vld [vmem:[#allocation2 + $0x374] sm:$0xf] }
 0x114   :  { %2230 = vmatpush.bf16.msrb.mxu2 %v3821_v61  ;;  %v4250_v61 = vld [vmem:[#allocation2 + $0x388] sm:$0xf0] }
 0x115   :  { %2243 = vmatpush.bf16.msrb.mxu3 %v4013_v0  ;;  %2205 = vmatmul.bf16.vlgmr.msrb.gmra.mxu0 %v6390_v32  ;;  %v4853_v0 = vor.u32 %v5978_v53, %v4850_v55  ;;  %v6032_v53 = vld [vmem:[#allocation6 + $0xcc] sm:$0xf0]  ;;  %v5176_v55 = vld [vmem:[#allocation6 + $0x1c0] sm:$0xf] }
 0x116   :  { %2249 = vmatpush.bf16.msra.mxu0 %v4373_v1  ;;  %2218 = vmatmul.bf16.vlgmr.msrb.gmra.mxu1 %v6392_v35  ;;  %v4442_v1 = vld [vmem:[#allocation2 + $0x508] sm:$0xf0] }
 0x117   :  { %2262 = vmatpush.bf16.msra.mxu1 %v4565_v2  ;;  %2231 = vmatmul.bf16.vlgmr.msrb.gmra.mxu2 %v6368_v9  ;;  %v4874_v9 = vld [vmem:[#allocation2 + $0x868] sm:$0xf0]  ;;  %v5924_v2 = vld [vmem:[#allocation2 + $0x674] sm:$0xf]  ;;  %v4445_v34 = vor.u32 %v5876_v62, %v4442_v1  ;;  %v5304_v1 = vld [vmem:[#allocation6 + $0x2c0] sm:$0xf] }
 0x118   :  { %2275 = vmatpush.bf16.msra.mxu2 %v4757_v3  ;;  %2244 = vmatmul.bf16.vlgmr.msrb.gmra.mxu3 %v6381_v25  ;;  %v4493_v25 = vor.u32 %v5888_v36, %v4490_v38  ;;  %v4877_v49 = vor.u32 %v5984_v41, %v4874_v9  ;;  %v4634_v3 = vld [vmem:[#allocation2 + $0x688] sm:$0xf0]  ;;  %v5960_v38 = vld [vmem:[#allocation2 + $0x794] sm:$0xf]  ;;  %v5064_v41 = vld [vmem:[#allocation6 + $0xe0] sm:$0xf] }
 0x119   :  { %2288 = vmatpush.bf16.msra.mxu3 %v4949_v54  ;;  %v4253_v54 = vor.u32 %v5828_v60, %v4250_v61  ;;  %v4637_v11 = vor.u32 %v5924_v2, %v4634_v3  ;;  %v6036_v9 = vld [vmem:[#allocation6 + $0xec] sm:$0xf0]  ;;  %v4781_v50 = vor.u32 %v5960_v38, %v4778_v39  ;;  %v5448_v61 = vld [vmem:[#allocation6 + $0x3e0] sm:$0xf]  ;;  %v5049_v3 = vor.u32 %v6032_v53, %v5048_v52 }
 0x11a   :  { %2250 = vmatpush.bf16.msra.mxu0 %v4349_v14  ;;  %v6440_v63 = vpop.f32.mrf.mxu2  ;;  %v2000_v10 = vpop.f32.mrf.mxu0  ;;  %v5870_v14 = vld [vmem:[#allocation2 + $0x4c4] sm:$0xf]  ;;  %v5065_v51 = vor.u32 %v6036_v9, %v5064_v41  ;;  %v6132_v62 = vld [vmem:[#allocation6 + $0x3ec] sm:$0xf0] }
 0x11b   :  { %2263 = vmatpush.bf16.msra.mxu1 %v4541_v16  ;;  %v6442_v5 = vpop.f32.mrf.mxu3  ;;  %v2013_v16 = vpop.f32.mrf.mxu1  ;;  %v4421_v27 = vor.u32 %v5870_v14, %v4418_v18  ;;  %v6096_v2 = vld [vmem:[#allocation6 + $0x2cc] sm:$0xf0]  ;;  %v5128_v39 = vld [vmem:[#allocation6 + $0x160] sm:$0xf] }
 0x11c   :  { %2276 = vmatpush.bf16.msra.mxu2 %v4733_v17  ;;  %v4829_v17 = vor.u32 %v5972_v6, %v4826_v7  ;;  %v5032_v6 = vld [vmem:[#allocation6 + $0xa0] sm:$0xf]  ;;  %v6028_v7 = vld [vmem:[#allocation6 + $0xac] sm:$0xf0] }
 0x11d   :  { %2289 = vmatpush.bf16.msra.mxu3 %v4925_v22  ;;  %v5966_v22 = vld [vmem:[#allocation2 + $0x7c4] sm:$0xf]  ;;  %v6060_v16 = vld [vmem:[#allocation6 + $0x1ac] sm:$0xf0] }
 0x11e   :  { %2251 = vmatpush.bf16.msra.mxu0 %v4325_v28  ;;  %v4613_v28 = vor.u32 %v5918_v19, %v4610_v21  ;;  %v4805_v36 = vor.u32 %v5966_v22, %v4802_v23  ;;  %v6092_v18 = vld [vmem:[#allocation6 + $0x2ac] sm:$0xf0]  ;;  %v5033_v19 = vor.u32 %v6028_v7, %v5032_v6  ;;  %v5016_v21 = vld [vmem:[#allocation6 + $0x80] sm:$0xf]  ;;  %v5433_v23 = vor.u32 %v6128_v13, %v5432_v12 }
 0x11f   :  { %2264 = vmatpush.bf16.msra.mxu1 %v4517_v29  ;;  %v5864_v29 = vld [vmem:[#allocation2 + $0x494] sm:$0xf]  ;;  %v5384_v52 = vld [vmem:[#allocation6 + $0x360] sm:$0xf] }
 0x120   :  { %2277 = vmatpush.bf16.msra.mxu2 %v4709_v30  ;;  %v4394_v30 = vld [vmem:[#allocation2 + $0x4a8] sm:$0xf0]  ;;  %v6024_v22 = vld [vmem:[#allocation6 + $0x8c] sm:$0xf0]  ;;  %v5224_v13 = vld [vmem:[#allocation6 + $0x220] sm:$0xf] }
 0x121   :  { %2290 = vmatpush.bf16.msra.mxu3 %v4901_v37  ;;  %v4586_v37 = vld [vmem:[#allocation2 + $0x628] sm:$0xf0]  ;;  %v4397_v47 = vor.u32 %v5864_v29, %v4394_v30  ;;  %v5000_v30 = vld [vmem:[#allocation6 + $0x60] sm:$0xf]  ;;  %v6120_v41 = vld [vmem:[#allocation6 + $0x38c] sm:$0xf0] }
 0x122   :  { %2252 = vmatpush.bf16.msra.mxu0 %v4301_v42  ;;  %v2026_v33 = vpop.f32.mrf.mxu2  ;;  %v5192_v42 = vld [vmem:[#allocation6 + $0x1e0] sm:$0xf]  ;;  %v6052_v9 = vld [vmem:[#allocation6 + $0x16c] sm:$0xf0] }
 0x123   :  { %2265 = vmatpush.bf16.msra.mxu1 %v4493_v25  ;;  %v2039_v40 = vpop.f32.mrf.mxu3  ;;  %v4205_v25 = vor.u32 %v5816_v56, %v4202_v26  ;;  %v5416_v56 = vld [vmem:[#allocation6 + $0x3a0] sm:$0xf]  ;;  %v6116_v53 = vld [vmem:[#allocation6 + $0x36c] sm:$0xf0] }
 0x124   :  { %2278 = vmatpush.bf16.msra.mxu2 %v4685_v44  ;;  %v6068_v44 = vld [vmem:[#allocation6 + $0x1ec] sm:$0xf0]  ;;  %v5400_v40 = vld [vmem:[#allocation6 + $0x380] sm:$0xf] }
 0x125   :  { %2291 = vmatpush.bf16.msra.mxu3 %v4877_v49  ;;  %v4589_v49 = vor.u32 %v5912_v31, %v4586_v37  ;;  %v6020_v31 = vld [vmem:[#allocation6 + $0x6c] sm:$0xf0] }
 0x126   :  { %2253 = vmatpush.bf16.msra.mxu0 %v4277_v57  ;;  %v5193_v57 = vor.u32 %v6068_v44, %v5192_v42  ;;  %v5256_v42 = vld [vmem:[#allocation6 + $0x260] sm:$0xf]  ;;  %v5001_v44 = vor.u32 %v6020_v31, %v5000_v30  ;;  %v6044_v12 = vld [vmem:[#allocation6 + $0x12c] sm:$0xf0] }
 0x127   :  { %2266 = vmatpush.bf16.msra.mxu1 %v4469_v58  ;;  %v5321_v58 = vor.u32 %v6100_v46, %v5320_v45  ;;  %v4984_v45 = vld [vmem:[#allocation6 + $0x40] sm:$0xf]  ;;  %v6016_v46 = vld [vmem:[#allocation6 + $0x4c] sm:$0xf0] }
 0x128   :  { %2279 = vmatpush.bf16.msra.mxu2 %v4661_v59  ;;  %v6444_v59 = vld [vmem:[#allocation4] sm:$0x3f]  ;;  %v6164_v30 = vld [vmem:[#allocation6 + $0x4ec] sm:$0xf0] }
 0x129   :  { %2292 = vmatpush.bf16.msra.mxu3 %v4853_v0  ;;  %v383_v60 = vperm.slane %v6444_v59, 2  ;;  %v6064_v0 = vld [vmem:[#allocation6 + $0x1cc] sm:$0xf0] }
 0x12a   :  { %2254 = vmatpush.bf16.msra.mxu0 %v4253_v54  ;;  %v5449_v54 = vor.u32 %v6132_v62, %v5448_v61  ;;  %v5177_v10 = vor.u32 %v6064_v0, %v5176_v55  ;;  %v4985_v0 = vor.u32 %v6016_v46, %v4984_v45  ;;  %v5050_v45 = vld [vmem:[#allocation6 + $0xd0] sm:$0xf0]  ;;  %v6066_v46 = vld [vmem:[#allocation6 + $0x1e4] sm:$0xf] }
 0x12b   :  { %2267 = vmatpush.bf16.msra.mxu1 %v4445_v34  ;;  %v5305_v34 = vor.u32 %v6096_v2, %v5304_v1  ;;  %v1999_v14 = vadd.f32 %v6436_v43, %v383_v60  ;;  %v6124_v43 = vld [vmem:[#allocation6 + $0x3ac] sm:$0xf0]  ;;  %v4968_v1 = vld [vmem:[#allocation6 + $0x20] sm:$0xf] }
 0x12c   :  { %2280 = vmatpush.bf16.msra.mxu2 %v4637_v11  ;;  %v5160_v11 = vld [vmem:[#allocation6 + $0x1a0] sm:$0xf]  ;;  %v5417_v33 = vor.u32 %v6124_v43, %v5416_v56  ;;  %v6012_v2 = vld [vmem:[#allocation6 + $0x2c] sm:$0xf0] }
 0x12d   :  { %2293 = vmatpush.bf16.msra.mxu3 %v4829_v17  ;;  %v5288_v17 = vld [vmem:[#allocation6 + $0x2a0] sm:$0xf]  ;;  %v2012_v26 = vadd.f32 %v6438_v48, %v1999_v14  ;;  %v6076_v14 = vld [vmem:[#allocation6 + $0x22c] sm:$0xf0] }
 0x12e   :  { %2255 = vmatpush.bf16.msra.mxu0 %v4229_v24  ;;  %v5289_v24 = vor.u32 %v6092_v18, %v5288_v17  ;;  %v4952_v17 = vld [vmem:[#allocation6] sm:$0xf]  ;;  %v6008_v18 = vld [vmem:[#allocation6 + $0xc] sm:$0xf0] }
 0x12f   :  { %2268 = vmatpush.bf16.msra.mxu1 %v4421_v27  ;;  %v6056_v27 = vld [vmem:[#allocation6 + $0x18c] sm:$0xf0]  ;;  %v2025_v48 = vadd.f32 %v6440_v63, %v2012_v26  ;;  %v5240_v63 = vld [vmem:[#allocation6 + $0x240] sm:$0xf]  ;;  %v4953_v31 = vor.u32 %v6008_v18, %v4952_v17  ;;  %v6018_v17 = vld [vmem:[#allocation6 + $0x64] sm:$0xf] }
 0x130   :  { %2281 = vmatpush.bf16.msra.mxu2 %v4613_v28  ;;  %v5272_v28 = vld [vmem:[#allocation6 + $0x280] sm:$0xf]  ;;  %v6072_v26 = vld [vmem:[#allocation6 + $0x20c] sm:$0xf0] }
 0x131   :  { %2294 = vmatpush.bf16.msra.mxu3 %v4805_v36  ;;  %v2038_v55 = vadd.f32 %v6442_v5, %v2025_v48  ;;  %v5096_v5 = vld [vmem:[#allocation6 + $0x120] sm:$0xf] }
 0x132   :  { %2256 = vmatpush.bf16.msra.mxu0 %v4205_v25  ;;  %v2050_v29 = vpop.f32.mrf.mxu0  ;;  %v6084_v25 = vld [vmem:[#allocation6 + $0x26c] sm:$0xf0]  ;;  %v5208_v43 = vld [vmem:[#allocation6 + $0x200] sm:$0xf] }
 0x133   :  { %2269 = vmatpush.bf16.msra.mxu1 %v4397_v47  ;;  %v6453_v36 = vpop.f32.mrf.mxu1  ;;  %v5401_v47 = vor.u32 %v6120_v41, %v5400_v40  ;;  %v6030_v40 = vld [vmem:[#allocation6 + $0xc4] sm:$0xf] }
 0x134   :  { %2282 = vmatpush.bf16.msra.mxu2 %v4589_v49  ;;  %v5129_v49 = vor.u32 %v6052_v9, %v5128_v39  ;;  %v384_v9 = vperm.slane %v6444_v59, 3 }
 0x135   :  { %2295 = vmatpush.bf16.msra.mxu3 %v4781_v50  ;;  %2257 = vmatmul.bf16.vlgmr.msra.gmra.mxu0 %v6366_v8  ;;  %v5161_v8 = vor.u32 %v6060_v16, %v5160_v11  ;;  %v5257_v50 = vor.u32 %v6084_v25, %v5256_v42  ;;  %v2051_v11 = vadd.f32 %v2050_v29, %v2038_v55  ;;  %v5336_v42 = vld [vmem:[#allocation6 + $0x300] sm:$0xf]  ;;  %v6104_v25 = vld [vmem:[#allocation6 + $0x30c] sm:$0xf0]  ;;  %v6026_v55 = vld [vmem:[#allocation6 + $0xa4] sm:$0xf] }
 0x136   :  { %3475 = vmatpush.bf16.msrb.mxu0 %v5065_v51  ;;  %2270 = vmatmul.bf16.vlgmr.msra.gmra.mxu1 %v6373_v15  ;;  %v5144_v15 = vld [vmem:[#allocation6 + $0x180] sm:$0xf]  ;;  %v4969_v16 = vor.u32 %v6012_v2, %v4968_v1 }
 0x137   :  { %3488 = vmatpush.bf16.msrb.mxu1 %v5193_v57  ;;  %2283 = vmatmul.bf16.vlgmr.msra.gmra.mxu2 %v6390_v32  ;;  %v6088_v32 = vld [vmem:[#allocation6 + $0x28c] sm:$0xf0]  ;;  %v5145_v37 = vor.u32 %v6056_v27, %v5144_v15  ;;  %v5112_v51 = vld [vmem:[#allocation6 + $0x140] sm:$0xf]  ;;  %v2064_v56 = vadd.f32 %v6453_v36, %v2051_v11  ;;  %v6034_v27 = vld [vmem:[#allocation6 + $0xe4] sm:$0xf]  ;;  %v5209_v36 = vor.u32 %v6072_v26, %v5208_v43 }
 0x138   :  { %3501 = vmatpush.bf16.msrb.mxu2 %v5321_v58  ;;  %2296 = vmatmul.bf16.vlgmr.msra.gmra.mxu3 %v6392_v35  ;;  %v5017_v35 = vor.u32 %v6024_v22, %v5016_v21  ;;  %v5273_v38 = vor.u32 %v6088_v32, %v5272_v28  ;;  %v6048_v57 = vld [vmem:[#allocation6 + $0x14c] sm:$0xf0]  ;;  %v5097_v22 = vor.u32 %v6044_v12, %v5096_v5  ;;  %v5066_v32 = vld [vmem:[#allocation6 + $0xf0] sm:$0xf0]  ;;  %v5544_v2 = vld [vmem:[#allocation6 + $0x4a0] sm:$0xf] }
 0x139   :  { %3514 = vmatpush.bf16.msrb.mxu3 %v5449_v54  ;;  %v6080_v58 = vld [vmem:[#allocation6 + $0x24c] sm:$0xf0]  ;;  %v5113_v7 = vor.u32 %v6048_v57, %v5112_v51  ;;  %v2303_v41 = vmax.f32 %v2064_v56, 0.0  ;;  %v5069_v48 = vor.u32 %v6034_v27, %v5066_v32  ;;  %v5337_v51 = vor.u32 %v6104_v25, %v5336_v42  ;;  %v5018_v5 = vld [vmem:[#allocation6 + $0x90] sm:$0xf0] }
 0x13a   :  { %3476 = vmatpush.bf16.msrb.mxu0 %v5049_v3  ;;  %v6457_v60 = vpop.f32.mrf.mxu2  ;;  %v2052_v62 = vpop.f32.mrf.mxu0  ;;  %v5385_v3 = vor.u32 %v6116_v53, %v5384_v52  ;;  %v5241_v54 = vor.u32 %v6080_v58, %v5240_v63  ;;  %v6108_v15 = vld [vmem:[#allocation6 + $0x32c] sm:$0xf0]  ;;  %v5053_v53 = vor.u32 %v6030_v40, %v5050_v45  ;;  %v5034_v58 = vld [vmem:[#allocation6 + $0xb0] sm:$0xf0]  ;;  %v5528_v12 = vld [vmem:[#allocation6 + $0x480] sm:$0xf] }
 0x13b   :  { %3489 = vmatpush.bf16.msrb.mxu1 %v5177_v10  ;;  %v6459_v61 = vpop.f32.mrf.mxu3  ;;  %v2065_v6 = vpop.f32.mrf.mxu1  ;;  %v5368_v10 = vld [vmem:[#allocation6 + $0x340] sm:$0xf]  ;;  %v6469_v52 = vpack.c.bf16 %v2303_v41, %v2303_v41  ;;  %v2077_v63 = vadd.f32 %v6457_v60, %v384_v9  ;;  %v6062_v62 = vld [vmem:[#allocation6 + $0x1c4] sm:$0xf]  ;;  %v4986_v32 = vld [vmem:[#allocation6 + $0x50] sm:$0xf0] }
 0x13c   :  { %3502 = vmatpush.bf16.msrb.mxu2 %v5305_v34  ;;  %v6112_v34 = vld [vmem:[#allocation6 + $0x34c] sm:$0xf0]  ;;  %v5037_v6 = vor.u32 %v6026_v55, %v5034_v58  ;;  %v6014_v26 = vld [vmem:[#allocation6 + $0x44] sm:$0xf]  ;;  %v4970_v9 = vld [vmem:[#allocation6 + $0x30] sm:$0xf0] }
 0x13d   :  { %3515 = vmatpush.bf16.msrb.mxu3 %v5433_v23  ;;  %v5369_v21 = vor.u32 %v6112_v34, %v5368_v10  ;;  %v5225_v23 = vor.u32 %v6076_v14, %v5224_v13  ;;  %v2090_v60 = vadd.f32 %v6459_v61, %v2077_v63  ;;  %v6058_v10 = vld [vmem:[#allocation6 + $0x1a4] sm:$0xf]  ;;  %v5162_v34 = vld [vmem:[#allocation6 + $0x1b0] sm:$0xf0]  ;;  %v6152_v13 = vld [vmem:[#allocation6 + $0x48c] sm:$0xf0] }
 0x13e   :  { %3477 = vmatpush.bf16.msrb.mxu0 %v5033_v19  ;;  %v5080_v19 = vld [vmem:[#allocation6 + $0x100] sm:$0xf]  ;;  %v5165_v18 = vor.u32 %v6058_v10, %v5162_v34  ;;  %v5529_v61 = vor.u32 %v6152_v13, %v5528_v12  ;;  %v6010_v40 = vld [vmem:[#allocation6 + $0x24] sm:$0xf]  ;;  %v5114_v25 = vld [vmem:[#allocation6 + $0x150] sm:$0xf0] }
 0x13f   :  { %3490 = vmatpush.bf16.msrb.mxu1 %v5161_v8  ;;  %v6040_v8 = vld [vmem:[#allocation6 + $0x10c] sm:$0xf0]  ;;  %v6046_v42 = vld [vmem:[#allocation6 + $0x144] sm:$0xf]  ;;  %v4954_v55 = vld [vmem:[#allocation6 + $0x10] sm:$0xf0] }
 0x140   :  { %3503 = vmatpush.bf16.msrb.mxu2 %v5289_v24  ;;  %v5352_v24 = vld [vmem:[#allocation6 + $0x320] sm:$0xf]  ;;  %v5081_v39 = vor.u32 %v6040_v8, %v5080_v19  ;;  %v5146_v8 = vld [vmem:[#allocation6 + $0x190] sm:$0xf0]  ;;  %v6196_v58 = vld [vmem:[#allocation6 + $0x5ec] sm:$0xf0] }
 0x141   :  { %3516 = vmatpush.bf16.msrb.mxu3 %v5417_v33  ;;  %v5353_v33 = vor.u32 %v6108_v15, %v5352_v24  ;;  %v5512_v24 = vld [vmem:[#allocation6 + $0x460] sm:$0xf]  ;;  %v6148_v15 = vld [vmem:[#allocation6 + $0x46c] sm:$0xf0]  ;;  %v6098_v10 = vld [vmem:[#allocation6 + $0x2e4] sm:$0xf] }
 0x142   :  { %3478 = vmatpush.bf16.msrb.mxu0 %v5017_v35  ;;  %v2078_v28 = vpop.f32.mrf.mxu2  ;;  %v5576_v35 = vld [vmem:[#allocation6 + $0x4e0] sm:$0xf]  ;;  %v5322_v34 = vld [vmem:[#allocation6 + $0x2f0] sm:$0xf0] }
 0x143   :  { %3491 = vmatpush.bf16.msrb.mxu1 %v5145_v37  ;;  %v2091_v29 = vpop.f32.mrf.mxu3  ;;  %v2301_v37 = vmax.f32 %v6420_v4, 0.0  ;;  %v5560_v4 = vld [vmem:[#allocation6 + $0x4c0] sm:$0xf] }
 0x144   :  { %3504 = vmatpush.bf16.msrb.mxu2 %v5273_v38  ;;  %v2302_v38 = vmax.f32 %v6430_v20, 0.0  ;;  %v6050_v29 = vld [vmem:[#allocation6 + $0x164] sm:$0xf]  ;;  %v5704_v63 = vld [vmem:[#allocation6 + $0x5e0] sm:$0xf] }
 0x145   :  { %3517 = vmatpush.bf16.msrb.mxu3 %v5401_v47  ;;  %v5194_v47 = vld [vmem:[#allocation6 + $0x1f0] sm:$0xf0]  ;;  %v6465_v20 = vpack.c.bf16 %v2301_v37, %v2301_v37  ;;  %v5496_v37 = vld [vmem:[#allocation6 + $0x440] sm:$0xf] }
 0x146   :  { %3479 = vmatpush.bf16.msrb.mxu0 %v5001_v44  ;;  %v5577_v44 = vor.u32 %v6164_v30, %v5576_v35  ;;  %v5197_v57 = vor.u32 %v6066_v46, %v5194_v47  ;;  %v5130_v35 = vld [vmem:[#allocation6 + $0x170] sm:$0xf0]  ;;  %v5513_v30 = vor.u32 %v6148_v15, %v5512_v24  ;;  %v5480_v47 = vld [vmem:[#allocation6 + $0x420] sm:$0xf]  ;;  %v6094_v15 = vld [vmem:[#allocation6 + $0x2c4] sm:$0xf] }
 0x147   :  { %3492 = vmatpush.bf16.msrb.mxu1 %v5129_v49  ;;  %v6160_v49 = vld [vmem:[#allocation6 + $0x4cc] sm:$0xf0]  ;;  %v5133_v41 = vor.u32 %v6050_v29, %v5130_v35  ;;  %v5688_v13 = vld [vmem:[#allocation6 + $0x5c0] sm:$0xf]  ;;  %v5706_v24 = vld [vmem:[#allocation6 + $0x5f0] sm:$0xf0] }
 0x148   :  { %3505 = vmatpush.bf16.msrb.mxu2 %v5257_v50  ;;  %v6467_v50 = vpack.c.bf16 %v2302_v38, %v2302_v38  ;;  %v5561_v1 = vor.u32 %v6160_v49, %v5560_v4  ;;  %v6144_v38 = vld [vmem:[#allocation6 + $0x44c] sm:$0xf0]  ;;  %v6006_v49 = vld [vmem:[#allocation6 + $0x4] sm:$0xf] }
 0x149   :  { %3518 = vmatpush.bf16.msrb.mxu3 %v5385_v3  ;;  %v6156_v3 = vld [vmem:[#allocation6 + $0x4ac] sm:$0xf0] }
 0x14a   :  { %3480 = vmatpush.bf16.msrb.mxu0 %v4985_v0  ;;  %v5178_v0 = vld [vmem:[#allocation6 + $0x1d0] sm:$0xf0]  ;;  %v5545_v11 = vor.u32 %v6156_v3, %v5544_v2  ;;  %v6140_v4 = vld [vmem:[#allocation6 + $0x42c] sm:$0xf0] }
 0x14b   :  { %3493 = vmatpush.bf16.msrb.mxu1 %v5113_v7  ;;  %v6022_v7 = vld [vmem:[#allocation6 + $0x84] sm:$0xf]  ;;  %v5481_v3 = vor.u32 %v6140_v4, %v5480_v47  ;;  %v5274_v4 = vld [vmem:[#allocation6 + $0x290] sm:$0xf0] }
 0x14c   :  { %3506 = vmatpush.bf16.msrb.mxu2 %v5241_v54  ;;  %v5181_v54 = vor.u32 %v6062_v62, %v5178_v0  ;;  %v5021_v14 = vor.u32 %v6022_v7, %v5018_v5  ;;  %v6162_v62 = vld [vmem:[#allocation6 + $0x4e4] sm:$0xf]  ;;  %v5578_v7 = vld [vmem:[#allocation6 + $0x4f0] sm:$0xf0]  ;;  %v6136_v5 = vld [vmem:[#allocation6 + $0x40c] sm:$0xf0] }
 0x14d   :  { %3519 = vmatpush.bf16.msrb.mxu3 %v5369_v21  ;;  %v6042_v0 = vld [vmem:[#allocation6 + $0x124] sm:$0xf] }
 0x14e   :  { %3481 = vmatpush.bf16.msrb.mxu0 %v4969_v16  ;;  %v6086_v47 = vld [vmem:[#allocation6 + $0x284] sm:$0xf] }
 0x14f   :  { %3494 = vmatpush.bf16.msrb.mxu1 %v5097_v22  ;;  %v5002_v22 = vld [vmem:[#allocation6 + $0x70] sm:$0xf0] }
 0x150   :  { %3507 = vmatpush.bf16.msrb.mxu2 %v5225_v23  ;;  %v6054_v23 = vld [vmem:[#allocation6 + $0x184] sm:$0xf]  ;;  %v5005_v43 = vor.u32 %v6018_v17, %v5002_v22 }
 0x151   :  { %3520 = vmatpush.bf16.msrb.mxu3 %v5353_v33  ;;  %v5149_v27 = vor.u32 %v6054_v23, %v5146_v8  ;;  %v6158_v17 = vld [vmem:[#allocation6 + $0x4c4] sm:$0xf]  ;;  %v5562_v23 = vld [vmem:[#allocation6 + $0x4d0] sm:$0xf0]  ;;  %v5325_v8 = vor.u32 %v6098_v10, %v5322_v34 }
 0x152   :  { %3482 = vmatpush.bf16.msrb.mxu0 %v4953_v31  ;;  %v2102_v16 = vpop.f32.mrf.mxu0  ;;  %v6142_v34 = vld [vmem:[#allocation6 + $0x444] sm:$0xf] }
 0x153   :  { %3495 = vmatpush.bf16.msrb.mxu1 %v5081_v39  ;;  %v2103_v19 = vadd.f32 %v2102_v16, %v2090_v60  ;;  %v2115_v21 = vpop.f32.mrf.mxu1  ;;  %v5464_v60 = vld [vmem:[#allocation6 + $0x400] sm:$0xf]  ;;  %v5581_v16 = vor.u32 %v6162_v62, %v5578_v7  ;;  %v6082_v7 = vld [vmem:[#allocation6 + $0x264] sm:$0xf] }
 0x154   :  { %3508 = vmatpush.bf16.msrb.mxu2 %v5209_v36  ;;  %v4989_v36 = vor.u32 %v6014_v26, %v4986_v32  ;;  %v5672_v26 = vld [vmem:[#allocation6 + $0x5a0] sm:$0xf]  ;;  %v6154_v32 = vld [vmem:[#allocation6 + $0x4a4] sm:$0xf] }
 0x155   :  { %3483 = vmatmul.bf16.vlgmr.msrb.gmra.mxu0 %v6465_v20  ;;  %3521 = vmatpush.bf16.msrb.mxu3 %v5337_v51  ;;  %v2116_v56 = vadd.f32 %v2115_v21, %v2103_v19  ;;  %v5082_v19 = vld [vmem:[#allocation6 + $0x110] sm:$0xf0]  ;;  %v5465_v21 = vor.u32 %v6136_v5, %v5464_v60  ;;  %v5624_v60 = vld [vmem:[#allocation6 + $0x540] sm:$0xf]  ;;  %v6176_v5 = vld [vmem:[#allocation6 + $0x54c] sm:$0xf0] }
 0x156   :  { %3527 = vmatpush.bf16.msra.mxu0 %v5577_v44  ;;  %3496 = vmatmul.bf16.vlgmr.msrb.gmra.mxu1 %v6467_v50  ;;  %v5497_v44 = vor.u32 %v6144_v38, %v5496_v37  ;;  %v5690_v37 = vld [vmem:[#allocation6 + $0x5d0] sm:$0xf0]  ;;  %v6090_v38 = vld [vmem:[#allocation6 + $0x2a4] sm:$0xf] }
 0x157   :  { %3509 = vmatmul.bf16.vlgmr.msrb.gmra.mxu2 %v6469_v52 }
 0x158   :  { %3553 = vmatpush.bf16.msra.mxu2 %v5069_v48 }
 0x159   :  { %3566 = vmatpush.bf16.msra.mxu3 %v5197_v57  ;;  %v5117_v57 = vor.u32 %v6046_v42, %v5114_v25  ;;  %v5530_v25 = vld [vmem:[#allocation6 + $0x490] sm:$0xf0] }
 0x15a   :  { %3528 = vmatpush.bf16.msra.mxu0 %v5561_v1  ;;  %v2128_v28 = vpop.f32.mrf.mxu2  ;;  %v2104_v48 = vpop.f32.mrf.mxu0  ;;  %v5098_v1 = vld [vmem:[#allocation6 + $0x130] sm:$0xf0] }
 0x15b   :  { %v2129_v31 = vadd.f32 %v2128_v28, %v2116_v56  ;;  %v2141_v33 = vpop.f32.mrf.mxu3  ;;  %v2117_v45 = vpop.f32.mrf.mxu1  ;;  %v5101_v12 = vor.u32 %v6042_v0, %v5098_v1  ;;  %v5306_v56 = vld [vmem:[#allocation6 + $0x2d0] sm:$0xf0]  ;;  %v5565_v28 = vor.u32 %v6158_v17, %v5562_v23  ;;  %v6150_v48 = vld [vmem:[#allocation6 + $0x484] sm:$0xf]  ;;  %v6172_v23 = vld [vmem:[#allocation6 + $0x52c] sm:$0xf0] }
 0x15c   :  { %3554 = vmatpush.bf16.msra.mxu2 %v5053_v53  ;;  %v4973_v53 = vor.u32 %v6010_v40, %v4970_v9  ;;  %v6184_v40 = vld [vmem:[#allocation6 + $0x58c] sm:$0xf0]  ;;  %v6186_v45 = vld [vmem:[#allocation6 + $0x5a4] sm:$0xf]  ;;  %v5514_v0 = vld [vmem:[#allocation6 + $0x470] sm:$0xf0] }
 0x15d   :  { %3567 = vmatpush.bf16.msra.mxu3 %v5181_v54  ;;  %v2142_v39 = vadd.f32 %v2141_v33, %v2129_v31  ;;  %v5309_v31 = vor.u32 %v6094_v15, %v5306_v56  ;;  %v6190_v33 = vld [vmem:[#allocation6 + $0x5c4] sm:$0xf]  ;;  %v5642_v17 = vld [vmem:[#allocation6 + $0x570] sm:$0xf0] }
 0x15e   :  { %3529 = vmatpush.bf16.msra.mxu0 %v5545_v11  ;;  %v4957_v11 = vor.u32 %v6006_v49, %v4954_v55  ;;  %v5693_v9 = vor.u32 %v6190_v33, %v5690_v37  ;;  %v5640_v49 = vld [vmem:[#allocation6 + $0x560] sm:$0xf]  ;;  %v5533_v55 = vor.u32 %v6150_v48, %v5530_v25  ;;  %v6134_v33 = vld [vmem:[#allocation6 + $0x404] sm:$0xf] }
 0x15f   :  { %v2304_v46 = vmax.f32 %v2142_v39, 0.0  ;;  %v5290_v39 = vld [vmem:[#allocation6 + $0x2b0] sm:$0xf0]  ;;  %v5592_v37 = vld [vmem:[#allocation6 + $0x500] sm:$0xf] }
 0x160   :  { %3555 = vmatpush.bf16.msra.mxu2 %v5037_v6  ;;  %v5705_v6 = vor.u32 %v6196_v58, %v5704_v63  ;;  %v6130_v48 = vld [vmem:[#allocation6 + $0x3e4] sm:$0xf] }
 0x161   :  { %3568 = vmatpush.bf16.msra.mxu3 %v5165_v18  ;;  %v6476_v51 = vpack.c.bf16 %v2304_v46, %v2304_v46  ;;  %v6038_v18 = vld [vmem:[#allocation6 + $0x104] sm:$0xf]  ;;  %v5674_v46 = vld [vmem:[#allocation6 + $0x5b0] sm:$0xf0] }
 0x162   :  { %3530 = vmatpush.bf16.msra.mxu0 %v5529_v61  ;;  %v2130_v2 = vpop.f32.mrf.mxu2  ;;  %3540 = vmatpush.bf16.msra.mxu1 %v5705_v6  ;;  %v6194_v61 = vld [vmem:[#allocation6 + $0x5e4] sm:$0xf]  ;;  %v5677_v58 = vor.u32 %v6186_v45, %v5674_v46  ;;  %v5658_v6 = vld [vmem:[#allocation6 + $0x590] sm:$0xf0]  ;;  %v6101_v46 = vld [vmem:[#allocation6 + $0x2f4] sm:$0xf0] }
 0x163   :  { %3522 = vmatmul.bf16.vlgmr.msrb.gmra.mxu3 %v6476_v51  ;;  %v2143_v54 = vpop.f32.mrf.mxu3  ;;  %v5709_v29 = vor.u32 %v6194_v61, %v5706_v24  ;;  %v5277_v2 = vor.u32 %v6086_v47, %v5274_v4  ;;  %v6138_v61 = vld [vmem:[#allocation6 + $0x424] sm:$0xf]  ;;  %v5610_v45 = vld [vmem:[#allocation6 + $0x530] sm:$0xf0] }
 0x164   :  { %3556 = vmatpush.bf16.msra.mxu2 %v5021_v14  ;;  %v6192_v14 = vld [vmem:[#allocation6 + $0x5cc] sm:$0xf0]  ;;  %v5258_v54 = vld [vmem:[#allocation6 + $0x270] sm:$0xf0]  ;;  %v6070_v47 = vld [vmem:[#allocation6 + $0x204] sm:$0xf] }
 0x165   :  { %3569 = vmatpush.bf16.msra.mxu3 %v5149_v27  ;;  %v5689_v22 = vor.u32 %v6192_v14, %v5688_v13  ;;  %v6188_v27 = vld [vmem:[#allocation6 + $0x5ac] sm:$0xf0]  ;;  %v5498_v13 = vld [vmem:[#allocation6 + $0x450] sm:$0xf0]  ;;  %v5261_v14 = vor.u32 %v6082_v7, %v5258_v54  ;;  %v6166_v7 = vld [vmem:[#allocation6 + $0x504] sm:$0xf] }
 0x166   :  { %3531 = vmatpush.bf16.msra.mxu0 %v5513_v30  ;;  %v5673_v35 = vor.u32 %v6188_v27, %v5672_v26  ;;  %v5546_v30 = vld [vmem:[#allocation6 + $0x4b0] sm:$0xf0] }
 0x167   :  { %3541 = vmatpush.bf16.msra.mxu1 %v5689_v22  ;;  %v5608_v22 = vld [vmem:[#allocation6 + $0x520] sm:$0xf]  ;;  %v5482_v26 = vld [vmem:[#allocation6 + $0x430] sm:$0xf0] }
 0x168   :  { %3557 = vmatpush.bf16.msra.mxu2 %v5005_v43  ;;  %v5085_v43 = vor.u32 %v6038_v18, %v5082_v19  ;;  %v6078_v18 = vld [vmem:[#allocation6 + $0x244] sm:$0xf]  ;;  %v5242_v19 = vld [vmem:[#allocation6 + $0x250] sm:$0xf0] }
 0x169   :  { %3570 = vmatpush.bf16.msra.mxu3 %v5133_v41  ;;  %v5549_v41 = vor.u32 %v6154_v32, %v5546_v30  ;;  %v6174_v32 = vld [vmem:[#allocation6 + $0x544] sm:$0xf]  ;;  %v5210_v4 = vld [vmem:[#allocation6 + $0x210] sm:$0xf0] }
 0x16a   :  { %3532 = vmatpush.bf16.msra.mxu0 %v5497_v44  ;;  %v5293_v44 = vor.u32 %v6090_v38, %v5290_v39  ;;  %v6074_v30 = vld [vmem:[#allocation6 + $0x224] sm:$0xf]  ;;  %v6168_v38 = vld [vmem:[#allocation6 + $0x50c] sm:$0xf0]  ;;  %v5485_v39 = vor.u32 %v6138_v61, %v5482_v26  ;;  %v5594_v54 = vld [vmem:[#allocation6 + $0x510] sm:$0xf0] }
 0x16b   :  { %3542 = vmatpush.bf16.msra.mxu1 %v5673_v35  ;;  %v385_v35 = vperm.slane %v6444_v59, 4  ;;  %v5402_v61 = vld [vmem:[#allocation6 + $0x390] sm:$0xf0] }
 0x16c   :  { %3558 = vmatpush.bf16.msra.mxu2 %v4989_v36  ;;  %v5656_v36 = vld [vmem:[#allocation6 + $0x580] sm:$0xf] }
 0x16d   :  { %3571 = vmatpush.bf16.msra.mxu3 %v5117_v57  ;;  %v5657_v42 = vor.u32 %v6184_v40, %v5656_v36  ;;  %v6146_v57 = vld [vmem:[#allocation6 + $0x464] sm:$0xf]  ;;  %v5466_v36 = vld [vmem:[#allocation6 + $0x410] sm:$0xf0] }
 0x16e   :  { %3533 = vmatpush.bf16.msra.mxu0 %v5481_v3  ;;  %v6182_v3 = vld [vmem:[#allocation6 + $0x584] sm:$0xf]  ;;  %v5517_v10 = vor.u32 %v6146_v57, %v5514_v0  ;;  %v5434_v0 = vld [vmem:[#allocation6 + $0x3d0] sm:$0xf0] }
 0x16f   :  { %3543 = vmatpush.bf16.msra.mxu1 %v5657_v42  ;;  %v5328_v42 = vld [vmem:[#allocation6 + $0x2e8] sm:$0xf] }
 0x170   :  { %3559 = vmatpush.bf16.msra.mxu2 %v4973_v53  ;;  %v6180_v53 = vld [vmem:[#allocation6 + $0x56c] sm:$0xf0] }
 0x171   :  { %3572 = vmatpush.bf16.msra.mxu3 %v5101_v12  ;;  %v5641_v62 = vor.u32 %v6180_v53, %v5640_v49  ;;  %v5625_v12 = vor.u32 %v6176_v5, %v5624_v60  ;;  %v6097_v5 = vld [vmem:[#allocation6 + $0x2d4] sm:$0xf0] }
 0x172   :  { %3534 = vmatpush.bf16.msra.mxu0 %v5465_v21  ;;  %v6480_v63 = vpop.f32.mrf.mxu0 }
 0x173   :  { %v6483_v1 = vpop.f32.mrf.mxu1  ;;  %3544 = vmatpush.bf16.msra.mxu1 %v5641_v62  ;;  %v2155_v49 = vadd.f32 %v6480_v63, %v385_v35  ;;  %v6126_v62 = vld [vmem:[#allocation6 + $0x3c4] sm:$0xf] }
 0x174   :  { %3560 = vmatpush.bf16.msra.mxu2 %v4957_v11  ;;  %v5661_v11 = vor.u32 %v6182_v3, %v5658_v6  ;;  %v5312_v3 = vld [vmem:[#allocation6 + $0x2c8] sm:$0xf]  ;;  %v5213_v6 = vor.u32 %v6070_v47, %v5210_v4  ;;  %v5437_v60 = vor.u32 %v6126_v62, %v5434_v0  ;;  %v6114_v35 = vld [vmem:[#allocation6 + $0x364] sm:$0xf]  ;;  %v6081_v4 = vld [vmem:[#allocation6 + $0x254] sm:$0xf0] }
 0x175   :  { %3573 = vmatpush.bf16.msra.mxu3 %v5085_v43  ;;  %v5609_v43 = vor.u32 %v6172_v23, %v5608_v22  ;;  %v2168_v63 = vadd.f32 %v6483_v1, %v2155_v49  ;;  %v5440_v22 = vld [vmem:[#allocation6 + $0x3c8] sm:$0xf]  ;;  %v6129_v23 = vld [vmem:[#allocation6 + $0x3d4] sm:$0xf0]  ;;  %v6118_v1 = vld [vmem:[#allocation6 + $0x384] sm:$0xf] }
 0x176   :  { %3579 = vmatpush.bf16.msrb.mxu0 %v5325_v8  ;;  %v5501_v8 = vor.u32 %v6142_v34, %v5498_v13  ;;  %v6133_v34 = vld [vmem:[#allocation6 + $0x3f4] sm:$0xf0]  ;;  %v5418_v13 = vld [vmem:[#allocation6 + $0x3b0] sm:$0xf0]  ;;  %v5405_v26 = vor.u32 %v6118_v1, %v5402_v61  ;;  %v5392_v49 = vld [vmem:[#allocation6 + $0x368] sm:$0xf] }
 0x177   :  { %3561 = vmatmul.bf16.vlgmr.msra.gmra.mxu2 %v6465_v20  ;;  %3545 = vmatpush.bf16.msra.mxu1 %v5625_v12  ;;  %v6122_v12 = vld [vmem:[#allocation6 + $0x3a4] sm:$0xf]  ;;  %v6073_v61 = vld [vmem:[#allocation6 + $0x214] sm:$0xf0] }
 0x178   :  { %3605 = vmatpush.bf16.msrb.mxu2 %v5581_v16  ;;  %3574 = vmatmul.bf16.vlgmr.msra.gmra.mxu3 %v6467_v50  ;;  %v6178_v16 = vld [vmem:[#allocation6 + $0x564] sm:$0xf] }
 0x179   :  { %3618 = vmatpush.bf16.msrb.mxu3 %v5709_v29  ;;  %v5645_v56 = vor.u32 %v6178_v16, %v5642_v17  ;;  %v5626_v29 = vld [vmem:[#allocation6 + $0x550] sm:$0xf0]  ;;  %v5296_v16 = vld [vmem:[#allocation6 + $0x2a8] sm:$0xf]  ;;  %v6106_v62 = vld [vmem:[#allocation6 + $0x324] sm:$0xf] }
 0x17a   :  { %3580 = vmatpush.bf16.msrb.mxu0 %v5309_v31  ;;  %v6485_v21 = vpop.f32.mrf.mxu2  ;;  %v2156_v24 = vpop.f32.mrf.mxu0  ;;  %v5226_v31 = vld [vmem:[#allocation6 + $0x230] sm:$0xf0]  ;;  %v5629_v40 = vor.u32 %v6174_v32, %v5626_v29  ;;  %v6125_v32 = vld [vmem:[#allocation6 + $0x3b4] sm:$0xf0] }
 0x17b   :  { %v6487_v15 = vpop.f32.mrf.mxu3  ;;  %v2169_v27 = vpop.f32.mrf.mxu1  ;;  %3546 = vmatpush.bf16.msra.mxu1 %v5609_v43  ;;  %v5229_v25 = vor.u32 %v6074_v30, %v5226_v31  ;;  %v5441_v43 = vor.u32 %v6129_v23, %v5440_v22  ;;  %v5386_v30 = vld [vmem:[#allocation6 + $0x370] sm:$0xf0]  ;;  %v5264_v31 = vld [vmem:[#allocation6 + $0x268] sm:$0xf]  ;;  %v6029_v22 = vld [vmem:[#allocation6 + $0xb4] sm:$0xf0] }
 0x17c   :  { %3606 = vmatpush.bf16.msrb.mxu2 %v5565_v28  ;;  %v5245_v28 = vor.u32 %v6078_v18, %v5242_v19  ;;  %v5421_v18 = vor.u32 %v6122_v12, %v5418_v13  ;;  %v6093_v19 = vld [vmem:[#allocation6 + $0x2b4] sm:$0xf0]  ;;  %v5216_v23 = vld [vmem:[#allocation6 + $0x208] sm:$0xf] }
 0x17d   :  { %3619 = vmatpush.bf16.msrb.mxu3 %v5693_v9  ;;  %v5450_v9 = vld [vmem:[#allocation6 + $0x3f0] sm:$0xf0]  ;;  %v5297_v24 = vor.u32 %v6093_v19, %v5296_v16  ;;  %v6089_v27 = vld [vmem:[#allocation6 + $0x294] sm:$0xf0]  ;;  %v6102_v16 = vld [vmem:[#allocation6 + $0x304] sm:$0xf] }
 0x17e   :  { %3581 = vmatpush.bf16.msrb.mxu0 %v5293_v44  ;;  %v6170_v44 = vld [vmem:[#allocation6 + $0x524] sm:$0xf]  ;;  %v5453_v59 = vor.u32 %v6130_v48, %v5450_v9  ;;  %v5040_v19 = vld [vmem:[#allocation6 + $0xa8] sm:$0xf] }
 0x180   :  { %3607 = vmatpush.bf16.msrb.mxu2 %v5549_v41  ;;  %v5593_v41 = vor.u32 %v6168_v38, %v5592_v37  ;;  %v5389_v38 = vor.u32 %v6114_v35, %v5386_v30  ;;  %v6025_v35 = vld [vmem:[#allocation6 + $0x94] sm:$0xf0] }
 0x181   :  { %3620 = vmatpush.bf16.msrb.mxu3 %v5677_v58  ;;  %v5613_v58 = vor.u32 %v6170_v44, %v5610_v45  ;;  %v5072_v44 = vld [vmem:[#allocation6 + $0xe8] sm:$0xf]  ;;  %v6037_v45 = vld [vmem:[#allocation6 + $0xf4] sm:$0xf0] }
 0x182   :  { %3582 = vmatpush.bf16.msrb.mxu0 %v5277_v2  ;;  %3547 = vmatpush.bf16.msra.mxu1 %v5593_v41  ;;  %v2182_v53 = vpop.f32.mrf.mxu2  ;;  %v5329_v2 = vor.u32 %v6101_v46, %v5328_v42  ;;  %v6110_v42 = vld [vmem:[#allocation6 + $0x344] sm:$0xf] }
 0x183   :  { %v2195_v57 = vpop.f32.mrf.mxu3  ;;  %v6117_v53 = vld [vmem:[#allocation6 + $0x374] sm:$0xf0] }
 0x184   :  { %3608 = vmatpush.bf16.msrb.mxu2 %v5533_v55  ;;  %v5469_v55 = vor.u32 %v6134_v33, %v5466_v36  ;;  %v6085_v33 = vld [vmem:[#allocation6 + $0x274] sm:$0xf0]  ;;  %v5408_v36 = vld [vmem:[#allocation6 + $0x388] sm:$0xf]  ;;  %v5073_v57 = vor.u32 %v6037_v45, %v5072_v44 }
 0x185   :  { %3621 = vmatpush.bf16.msrb.mxu3 %v5661_v11  ;;  %v5597_v11 = vor.u32 %v6166_v7, %v5594_v54  ;;  %v5265_v9 = vor.u32 %v6085_v33, %v5264_v31  ;;  %v5232_v7 = vld [vmem:[#allocation6 + $0x228] sm:$0xf]  ;;  %v5393_v54 = vor.u32 %v6117_v53, %v5392_v49  ;;  %v5026_v49 = vld [vmem:[#allocation6 + $0x98] sm:$0xf0] }
 0x186   :  { %3583 = vmatpush.bf16.msrb.mxu0 %v5261_v14  ;;  %3592 = vmatpush.bf16.msrb.mxu1 %v5453_v59  ;;  %v5313_v14 = vor.u32 %v6097_v5, %v5312_v3  ;;  %v5248_v59 = vld [vmem:[#allocation6 + $0x248] sm:$0xf] }
 0x187   :  { %v5344_v33 = vld [vmem:[#allocation6 + $0x308] sm:$0xf] }
 0x188   :  { %3609 = vmatpush.bf16.msrb.mxu2 %v5517_v10  ;;  %v5456_v10 = vld [vmem:[#allocation6 + $0x3e8] sm:$0xf] }
 0x189   :  { %3622 = vmatpush.bf16.msrb.mxu3 %v5645_v56  ;;  %v5457_v17 = vor.u32 %v6133_v34, %v5456_v10  ;;  %v5280_v56 = vld [vmem:[#allocation6 + $0x288] sm:$0xf]  ;;  %v6077_v10 = vld [vmem:[#allocation6 + $0x234] sm:$0xf0] }
 0x18a   :  { %3584 = vmatpush.bf16.msrb.mxu0 %v5245_v28  ;;  %3593 = vmatpush.bf16.msrb.mxu1 %v5437_v60  ;;  %v5424_v28 = vld [vmem:[#allocation6 + $0x3a8] sm:$0xf]  ;;  %v5354_v60 = vld [vmem:[#allocation6 + $0x330] sm:$0xf0] }
 0x18b   :  { %v5425_v37 = vor.u32 %v6125_v32, %v5424_v28  ;;  %v5357_v12 = vor.u32 %v6106_v62, %v5354_v60  ;;  %v5217_v28 = vor.u32 %v6073_v61, %v5216_v23  ;;  %v6161_v23 = vld [vmem:[#allocation6 + $0x4d4] sm:$0xf0]  ;;  %v6011_v61 = vld [vmem:[#allocation6 + $0x2c] sm:$0xf] }
 0x18c   :  { %3610 = vmatpush.bf16.msrb.mxu2 %v5501_v8  ;;  %v2181_v8 = vadd.f32 %v6485_v21, %v2168_v63  ;;  %v5281_v21 = vor.u32 %v6089_v27, %v5280_v56  ;;  %v5376_v63 = vld [vmem:[#allocation6 + $0x348] sm:$0xf]  ;;  %v6109_v56 = vld [vmem:[#allocation6 + $0x334] sm:$0xf0]  ;;  %v5041_v27 = vor.u32 %v6029_v22, %v5040_v19 }
 0x18d   :  { %3623 = vmatpush.bf16.msrb.mxu3 %v5629_v40  ;;  %v6121_v40 = vld [vmem:[#allocation6 + $0x394] sm:$0xf0] }
 0x18e   :  { %3585 = vmatpush.bf16.msrb.mxu0 %v5229_v25  ;;  %3594 = vmatpush.bf16.msrb.mxu1 %v5421_v18  ;;  %v2194_v29 = vadd.f32 %v6487_v15, %v2181_v8  ;;  %v5370_v25 = vld [vmem:[#allocation6 + $0x350] sm:$0xf0]  ;;  %v5409_v46 = vor.u32 %v6121_v40, %v5408_v36  ;;  %v5233_v18 = vor.u32 %v6077_v10, %v5232_v7  ;;  %v5008_v40 = vld [vmem:[#allocation6 + $0x68] sm:$0xf] }
 0x18f   :  { %v5373_v47 = vor.u32 %v6110_v42, %v5370_v25  ;;  %v6027_v42 = vld [vmem:[#allocation6 + $0xac] sm:$0xf]  ;;  %v5042_v25 = vld [vmem:[#allocation6 + $0xb8] sm:$0xf0] }
 0x190   :  { %3611 = vmatpush.bf16.msrb.mxu2 %v5485_v39 }
 0x191   :  { %3624 = vmatpush.bf16.msrb.mxu3 %v5613_v58  ;;  %v5056_v58 = vld [vmem:[#allocation6 + $0xc8] sm:$0xf] }
 0x192   :  { %3586 = vmatpush.bf16.msrb.mxu0 %v5213_v6  ;;  %3595 = vmatpush.bf16.msrb.mxu1 %v5405_v26  ;;  %v2206_v39 = vpop.f32.mrf.mxu0  ;;  %v6033_v6 = vld [vmem:[#allocation6 + $0xd4] sm:$0xf0]  ;;  %v5074_v26 = vld [vmem:[#allocation6 + $0xf8] sm:$0xf0] }
 0x193   :  { %v2207_v41 = vadd.f32 %v2206_v39, %v2194_v29  ;;  %v2219_v48 = vpop.f32.mrf.mxu1  ;;  %v5024_v29 = vld [vmem:[#allocation6 + $0x88] sm:$0xf]  ;;  %v5058_v39 = vld [vmem:[#allocation6 + $0xd8] sm:$0xf0] }
 0x194   :  { %3612 = vmatpush.bf16.msrb.mxu2 %v5469_v55  ;;  %v5025_v36 = vor.u32 %v6025_v35, %v5024_v29 }
 0x195   :  { %3625 = vmatpush.bf16.msrb.mxu3 %v5597_v11  ;;  %v2220_v15 = vadd.f32 %v2219_v48, %v2207_v41  ;;  %v6113_v11 = vld [vmem:[#allocation6 + $0x354] sm:$0xf0] }
 0x196   :  { %3596 = vmatpush.bf16.msrb.mxu1 %v5389_v38  ;;  %v5377_v8 = vor.u32 %v6113_v11, %v5376_v63  ;;  %v6031_v38 = vld [vmem:[#allocation6 + $0xcc] sm:$0xf]  ;;  %v6021_v41 = vld [vmem:[#allocation6 + $0x74] sm:$0xf0] }
 0x197   :  { %v2305_v55 = vmax.f32 %v2220_v15, 0.0  ;;  %v6207_v15 = vld [vmem:[#allocation4] sm:$0x3f]  ;;  %v5009_v45 = vor.u32 %v6021_v41, %v5008_v40 }
 0x198   :  { %3657 = vmatpush.bf16.msra.mxu2 %v5329_v2  ;;  %v5249_v2 = vor.u32 %v6081_v4, %v5248_v59  ;;  %v386_v44 = vperm.slane %v6207_v15, 5  ;;  %v4992_v59 = vld [vmem:[#allocation6 + $0x48] sm:$0xf]  ;;  %v6023_v4 = vld [vmem:[#allocation6 + $0x8c] sm:$0xf] }
 0x199   :  { %3670 = vmatpush.bf16.msra.mxu3 %v5457_v17  ;;  %v6494_v0 = vpack.c.bf16 %v2305_v55, %v2305_v55  ;;  %v5338_v17 = vld [vmem:[#allocation6 + $0x310] sm:$0xf0]  ;;  %v5029_v62 = vor.u32 %v6023_v4, %v5026_v49  ;;  %v6009_v63 = vld [vmem:[#allocation6 + $0x14] sm:$0xf0]  ;;  %v5586_v40 = vld [vmem:[#allocation6 + $0x4f8] sm:$0xf0] }
 0x19a   :  { %3597 = vmatpush.bf16.msrb.mxu1 %v5373_v47  ;;  %v6496_v3 = vpop.f32.mrf.mxu2  ;;  %v2208_v34 = vpop.f32.mrf.mxu0  ;;  %v5341_v1 = vor.u32 %v6102_v16, %v5338_v17  ;;  %v5045_v47 = vor.u32 %v6027_v42, %v5042_v25  ;;  %v4994_v16 = vld [vmem:[#allocation6 + $0x58] sm:$0xf0]  ;;  %v5536_v49 = vld [vmem:[#allocation6 + $0x488] sm:$0xf] }
 0x19b   :  { %v6498_v5 = vpop.f32.mrf.mxu3  ;;  %3535 = vmatmul.bf16.vlgmr.msra.gmra.mxu0 %v6494_v0  ;;  %3613 = vmatmul.bf16.vlgmr.msrb.gmra.mxu2 %v6494_v0  ;;  %v2221_v13 = vpop.f32.mrf.mxu1  ;;  %v2233_v53 = vadd.f32 %v6496_v3, %v386_v44  ;;  %v4960_v34 = vld [vmem:[#allocation6 + $0x8] sm:$0xf]  ;;  %v6065_v44 = vld [vmem:[#allocation6 + $0x1d4] sm:$0xf0] }
 0x19c   :  { %3658 = vmatpush.bf16.msra.mxu2 %v5313_v14  ;;  %3631 = vmatpush.bf16.msra.mxu0 %v5073_v57  ;;  %v5057_v14 = vor.u32 %v6033_v6, %v5056_v58  ;;  %v4976_v57 = vld [vmem:[#allocation6 + $0x28] sm:$0xf]  ;;  %v6013_v58 = vld [vmem:[#allocation6 + $0x34] sm:$0xf0]  ;;  %v5010_v6 = vld [vmem:[#allocation6 + $0x78] sm:$0xf0]  ;;  %v4961_v17 = vor.u32 %v6009_v63, %v4960_v34 }
 0x19d   :  { %3671 = vmatpush.bf16.msra.mxu3 %v5441_v43  ;;  %v6035_v43 = vld [vmem:[#allocation6 + $0xec] sm:$0xf]  ;;  %v2246_v7 = vadd.f32 %v6498_v5, %v2233_v53  ;;  %v4977_v10 = vor.u32 %v6013_v58, %v4976_v57  ;;  %v5584_v3 = vld [vmem:[#allocation6 + $0x4e8] sm:$0xf]  ;;  %v6165_v13 = vld [vmem:[#allocation6 + $0x4f4] sm:$0xf0] }
 0x19e   :  { %3598 = vmatpush.bf16.msrb.mxu1 %v5357_v12  ;;  %v5568_v5 = vld [vmem:[#allocation6 + $0x4c8] sm:$0xf]  ;;  %v6153_v53 = vld [vmem:[#allocation6 + $0x494] sm:$0xf0]  ;;  %v5570_v57 = vld [vmem:[#allocation6 + $0x4d8] sm:$0xf0] }
 0x19f   :  { %v5520_v34 = vld [vmem:[#allocation6 + $0x468] sm:$0xf]  ;;  %v6149_v63 = vld [vmem:[#allocation6 + $0x474] sm:$0xf0] }
 0x1a0   :  { %3659 = vmatpush.bf16.msra.mxu2 %v5297_v24  ;;  %v5360_v24 = vld [vmem:[#allocation6 + $0x328] sm:$0xf]  ;;  %3632 = vmatpush.bf16.msra.mxu0 %v5057_v14  ;;  %v6015_v14 = vld [vmem:[#allocation6 + $0x4c] sm:$0xf] }
 0x1a1   :  { %3672 = vmatpush.bf16.msra.mxu3 %v5425_v37  ;;  %v5361_v30 = vor.u32 %v6109_v56, %v5360_v24  ;;  %v6105_v37 = vld [vmem:[#allocation6 + $0x314] sm:$0xf0]  ;;  %v4997_v22 = vor.u32 %v6015_v14, %v4994_v16  ;;  %v4978_v24 = vld [vmem:[#allocation6 + $0x38] sm:$0xf0]  ;;  %v5152_v14 = vld [vmem:[#allocation6 + $0x188] sm:$0xf] }
 0x1a2   :  { %3599 = vmatpush.bf16.msrb.mxu1 %v5341_v1  ;;  %v2234_v32 = vpop.f32.mrf.mxu2  ;;  %v5345_v48 = vor.u32 %v6105_v37, %v5344_v33  ;;  %v4981_v35 = vor.u32 %v6011_v61, %v4978_v24  ;;  %v6157_v33 = vld [vmem:[#allocation6 + $0x4b4] sm:$0xf0]  ;;  %v6007_v37 = vld [vmem:[#allocation6 + $0xc] sm:$0xf]  ;;  %v5538_v61 = vld [vmem:[#allocation6 + $0x498] sm:$0xf0] }
 0x1a3   :  { %v2247_v31 = vpop.f32.mrf.mxu3  ;;  %v6069_v32 = vld [vmem:[#allocation6 + $0x1f4] sm:$0xf0] }
 0x1a4   :  { %3660 = vmatpush.bf16.msra.mxu2 %v5281_v21  ;;  %v5077_v21 = vor.u32 %v6035_v43, %v5074_v26  ;;  %3633 = vmatpush.bf16.msra.mxu0 %v5041_v27  ;;  %v5569_v27 = vor.u32 %v6161_v23, %v5568_v5  ;;  %v5552_v31 = vld [vmem:[#allocation6 + $0x4a8] sm:$0xf]  ;;  %v6057_v16 = vld [vmem:[#allocation6 + $0x194] sm:$0xf0] }
 0x1a5   :  { %3673 = vmatpush.bf16.msra.mxu3 %v5409_v46  ;;  %v6017_v46 = vld [vmem:[#allocation6 + $0x54] sm:$0xf0]  ;;  %v5553_v25 = vor.u32 %v6157_v33, %v5552_v31  ;;  %v5504_v23 = vld [vmem:[#allocation6 + $0x448] sm:$0xf]  ;;  %v5153_v24 = vor.u32 %v6057_v16, %v5152_v14  ;;  %v5522_v31 = vld [vmem:[#allocation6 + $0x478] sm:$0xf0] }
 0x1a6   :  { %v4993_v55 = vor.u32 %v6017_v46, %v4992_v59  ;;  %v5186_v59 = vld [vmem:[#allocation6 + $0x1d8] sm:$0xf0]  ;;  %v5088_v16 = vld [vmem:[#allocation6 + $0x108] sm:$0xf] }
 0x1a8   :  { %3661 = vmatpush.bf16.msra.mxu2 %v5265_v9  ;;  %v5061_v9 = vor.u32 %v6031_v38, %v5058_v39  ;;  %3634 = vmatpush.bf16.msra.mxu0 %v5025_v36  ;;  %v4962_v38 = vld [vmem:[#allocation6 + $0x18] sm:$0xf0]  ;;  %v6163_v36 = vld [vmem:[#allocation6 + $0x4ec] sm:$0xf] }
 0x1a9   :  { %3674 = vmatpush.bf16.msra.mxu3 %v5393_v54  ;;  %v4965_v15 = vor.u32 %v6007_v37, %v4962_v38  ;;  %v5589_v4 = vor.u32 %v6163_v36, %v5586_v40 }
 0x1ab   :  { %3587 = vmatmul.bf16.vlgmr.msrb.gmra.mxu0 %v6469_v52 }
 0x1ac   :  { %3662 = vmatpush.bf16.msra.mxu2 %v5249_v2  ;;  %3635 = vmatpush.bf16.msra.mxu0 %v5009_v45  ;;  %v6019_v2 = vld [vmem:[#allocation6 + $0x6c] sm:$0xf] }
 0x1ad   :  { %3675 = vmatpush.bf16.msra.mxu3 %v5377_v8  ;;  %v5013_v12 = vor.u32 %v6019_v2, %v5010_v6  ;;  %v6063_v45 = vld [vmem:[#allocation6 + $0x1cc] sm:$0xf]  ;;  %v5168_v2 = vld [vmem:[#allocation6 + $0x1a8] sm:$0xf]  ;;  %v5537_v6 = vor.u32 %v6153_v53, %v5536_v49  ;;  %v5506_v49 = vld [vmem:[#allocation6 + $0x458] sm:$0xf0] }
 0x1b0   :  { %3663 = vmatpush.bf16.msra.mxu2 %v5233_v18  ;;  %3636 = vmatpush.bf16.msra.mxu0 %v4993_v55  ;;  %v5585_v18 = vor.u32 %v6165_v13, %v5584_v3  ;;  %v6159_v55 = vld [vmem:[#allocation6 + $0x4cc] sm:$0xf] }
 0x1b1   :  { %3676 = vmatpush.bf16.msra.mxu3 %v5361_v30  ;;  %v6067_v30 = vld [vmem:[#allocation6 + $0x1ec] sm:$0xf] }
 0x1b2   :  { %v2258_v54 = vpop.f32.mrf.mxu0 }
 0x1b3   :  { %v2271_v60 = vpop.f32.mrf.mxu1  ;;  %v2259_v11 = vadd.f32 %v2258_v54, %v2246_v7  ;;  %v6061_v7 = vld [vmem:[#allocation6 + $0x1b4] sm:$0xf0]  ;;  %v6059_v54 = vld [vmem:[#allocation6 + $0x1ac] sm:$0xf] }
 0x1b4   :  { %3664 = vmatpush.bf16.msra.mxu2 %v5217_v28  ;;  %3637 = vmatpush.bf16.msra.mxu0 %v4977_v10  ;;  %v5200_v28 = vld [vmem:[#allocation6 + $0x1e8] sm:$0xf]  ;;  %v5573_v10 = vor.u32 %v6159_v55, %v5570_v57  ;;  %v5169_v3 = vor.u32 %v6061_v7, %v5168_v2  ;;  %v6043_v2 = vld [vmem:[#allocation6 + $0x12c] sm:$0xf] }
 0x1b5   :  { %3677 = vmatpush.bf16.msra.mxu3 %v5345_v48  ;;  %v2272_v19 = vadd.f32 %v2271_v60, %v2259_v11  ;;  %v5201_v41 = vor.u32 %v6069_v32, %v5200_v28  ;;  %v5170_v60 = vld [vmem:[#allocation6 + $0x1b8] sm:$0xf0]  ;;  %v6155_v11 = vld [vmem:[#allocation6 + $0x4ac] sm:$0xf]  ;;  %v5104_v57 = vld [vmem:[#allocation6 + $0x128] sm:$0xf] }
 0x1b6   :  { %v5173_v13 = vor.u32 %v6059_v54, %v5170_v60  ;;  %v6051_v28 = vld [vmem:[#allocation6 + $0x16c] sm:$0xf]  ;;  %v5138_v32 = vld [vmem:[#allocation6 + $0x178] sm:$0xf0] }
 0x1b7   :  { %3665 = vmatmul.bf16.vlgmr.msra.gmra.mxu2 %v6469_v52  ;;  %v5141_v38 = vor.u32 %v6051_v28, %v5138_v32  ;;  %v6095_v60 = vld [vmem:[#allocation6 + $0x2cc] sm:$0xf] }
 0x1b8   :  { %3709 = vmatpush.bf16.msrb.mxu2 %v5077_v21  ;;  %3638 = vmatpush.bf16.msra.mxu0 %v4961_v17  ;;  %v5202_v21 = vld [vmem:[#allocation6 + $0x1f8] sm:$0xf0]  ;;  %v5521_v17 = vor.u32 %v6149_v63, %v5520_v34  ;;  %v6139_v63 = vld [vmem:[#allocation6 + $0x42c] sm:$0xf] }
 0x1b9   :  { %v5205_v48 = vor.u32 %v6067_v30, %v5202_v21  ;;  %v6141_v30 = vld [vmem:[#allocation6 + $0x434] sm:$0xf0]  ;;  %v6147_v21 = vld [vmem:[#allocation6 + $0x46c] sm:$0xf]  ;;  %v5314_v34 = vld [vmem:[#allocation6 + $0x2d8] sm:$0xf0] }
 0x1ba   :  { %v2284_v8 = vpop.f32.mrf.mxu2  ;;  %v2260_v43 = vpop.f32.mrf.mxu0 }
 0x1bb   :  { %v2297_v1 = vpop.f32.mrf.mxu3  ;;  %v2285_v56 = vadd.f32 %v2284_v8, %v2272_v19  ;;  %v2273_v26 = vpop.f32.mrf.mxu1  ;;  %3639 = vmatmul.bf16.vlgmr.msra.gmra.mxu0 %v6465_v20  ;;  %v5154_v19 = vld [vmem:[#allocation6 + $0x198] sm:$0xf0]  ;;  %v6145_v8 = vld [vmem:[#allocation6 + $0x454] sm:$0xf0] }
 0x1bc   :  { %3710 = vmatpush.bf16.msrb.mxu2 %v5061_v9  ;;  %3683 = vmatpush.bf16.msrb.mxu0 %v5585_v18  ;;  %v5184_v9 = vld [vmem:[#allocation6 + $0x1c8] sm:$0xf]  ;;  %v6055_v18 = vld [vmem:[#allocation6 + $0x18c] sm:$0xf] }
 0x1bd   :  { %v2298_v29 = vadd.f32 %v2297_v1, %v2285_v56  ;;  %v5185_v58 = vor.u32 %v6065_v44, %v5184_v9  ;;  %v6151_v1 = vld [vmem:[#allocation6 + $0x48c] sm:$0xf]  ;;  %v5157_v56 = vor.u32 %v6055_v18, %v5154_v19  ;;  %v5136_v26 = vld [vmem:[#allocation6 + $0x168] sm:$0xf] }
 0x1be   :  { %v6047_v9 = vld [vmem:[#allocation6 + $0x14c] sm:$0xf]  ;;  %v5472_v44 = vld [vmem:[#allocation6 + $0x408] sm:$0xf] }
 0x1bf   :  { %v2306_v39 = vmax.f32 %v2298_v29, 0.0  ;;  %v5541_v29 = vor.u32 %v6151_v1, %v5538_v61  ;;  %v6039_v18 = vld [vmem:[#allocation6 + $0x10c] sm:$0xf]  ;;  %v5317_v1 = vor.u32 %v6095_v60, %v5314_v34  ;;  %v6181_v60 = vld [vmem:[#allocation6 + $0x574] sm:$0xf0] }
 0x1c0   :  { %3711 = vmatpush.bf16.msrb.mxu2 %v5045_v47  ;;  %3684 = vmatpush.bf16.msrb.mxu0 %v5569_v27  ;;  %v6053_v27 = vld [vmem:[#allocation6 + $0x174] sm:$0xf0]  ;;  %v5650_v34 = vld [vmem:[#allocation6 + $0x578] sm:$0xf0] }
 0x1c1   :  { %v6507_v42 = vpack.c.bf16 %v2306_v39, %v2306_v39  ;;  %v5137_v37 = vor.u32 %v6053_v27, %v5136_v26  ;;  %v5120_v39 = vld [vmem:[#allocation6 + $0x148] sm:$0xf]  ;;  %v5298_v26 = vld [vmem:[#allocation6 + $0x2b8] sm:$0xf0] }
 0x1c2   :  { %v2286_v46 = vpop.f32.mrf.mxu2  ;;  %v5474_v27 = vld [vmem:[#allocation6 + $0x418] sm:$0xf0] }
 0x1c3   :  { %v2299_v47 = vpop.f32.mrf.mxu3  ;;  %3548 = vmatmul.bf16.vlgmr.msra.gmra.mxu1 %v6507_v42  ;;  %3626 = vmatmul.bf16.vlgmr.msrb.gmra.mxu3 %v6507_v42 }
 0x1c4   :  { %3712 = vmatpush.bf16.msrb.mxu2 %v5029_v62  ;;  %3644 = vmatpush.bf16.msra.mxu1 %v5201_v41  ;;  %v5189_v62 = vor.u32 %v6063_v45, %v5186_v59  ;;  %v6137_v45 = vld [vmem:[#allocation6 + $0x414] sm:$0xf0]  ;;  %v6099_v59 = vld [vmem:[#allocation6 + $0x2ec] sm:$0xf]  ;;  %v5330_v47 = vld [vmem:[#allocation6 + $0x2f8] sm:$0xf0] }
 0x1c5   :  { %3722 = vmatpush.bf16.msrb.mxu3 %v5205_v48  ;;  %3685 = vmatpush.bf16.msrb.mxu0 %v5553_v25  ;;  %v6049_v48 = vld [vmem:[#allocation6 + $0x154] sm:$0xf0]  ;;  %v5122_v25 = vld [vmem:[#allocation6 + $0x158] sm:$0xf0]  ;;  %v5333_v7 = vor.u32 %v6099_v59, %v5330_v47  ;;  %v6083_v59 = vld [vmem:[#allocation6 + $0x26c] sm:$0xf] }
 0x1c6   :  { %v5121_v53 = vor.u32 %v6049_v48, %v5120_v39  ;;  %v5125_v55 = vor.u32 %v6047_v9, %v5122_v25  ;;  %v5680_v9 = vld [vmem:[#allocation6 + $0x5a8] sm:$0xf] }
 0x1c8   :  { %3713 = vmatpush.bf16.msrb.mxu2 %v5013_v12  ;;  %v5554_v12 = vld [vmem:[#allocation6 + $0x4b8] sm:$0xf0]  ;;  %3645 = vmatpush.bf16.msra.mxu1 %v5185_v58  ;;  %v5473_v58 = vor.u32 %v6137_v45, %v5472_v44  ;;  %v6187_v44 = vld [vmem:[#allocation6 + $0x5ac] sm:$0xf] }
 0x1c9   :  { %3723 = vmatpush.bf16.msrb.mxu3 %v5189_v62  ;;  %3686 = vmatpush.bf16.msrb.mxu0 %v5537_v6  ;;  %v5557_v5 = vor.u32 %v6155_v11, %v5554_v12  ;;  %v6045_v62 = vld [vmem:[#allocation6 + $0x134] sm:$0xf0]  ;;  %v5106_v6 = vld [vmem:[#allocation6 + $0x138] sm:$0xf0] }
 0x1ca   :  { %v5490_v11 = vld [vmem:[#allocation6 + $0x438] sm:$0xf0]  ;;  %v5109_v14 = vor.u32 %v6043_v2, %v5106_v6 }
 0x1cb   :  { %v5493_v61 = vor.u32 %v6139_v63, %v5490_v11  ;;  %v5682_v45 = vld [vmem:[#allocation6 + $0x5b8] sm:$0xf0]  ;;  %v6075_v11 = vld [vmem:[#allocation6 + $0x22c] sm:$0xf] }
 0x1cc   :  { %3714 = vmatpush.bf16.msrb.mxu2 %v4997_v22  ;;  %v6512_v22 = vld [vmem:[#allocation7] sm:$0xf]  ;;  %3646 = vmatpush.bf16.msra.mxu1 %v5169_v3  ;;  %v5250_v2 = vld [vmem:[#allocation6 + $0x258] sm:$0xf0] }
 0x1cd   :  { %3724 = vmatpush.bf16.msrb.mxu3 %v5173_v13  ;;  %v2507_v43 = vperm.slane %v6512_v22, 0  ;;  %3687 = vmatpush.bf16.msrb.mxu0 %v5521_v17  ;;  %v5105_v13 = vor.u32 %v6045_v62, %v5104_v57  ;;  %v6041_v17 = vld [vmem:[#allocation6 + $0x114] sm:$0xf0]  ;;  %v6183_v57 = vld [vmem:[#allocation6 + $0x58c] sm:$0xf] }
 0x1ce   :  { %v5089_v28 = vor.u32 %v6041_v17, %v5088_v16  ;;  %v6079_v62 = vld [vmem:[#allocation6 + $0x24c] sm:$0xf]  ;;  %v5632_v16 = vld [vmem:[#allocation6 + $0x548] sm:$0xf] }
 0x1d0   :  { %3715 = vmatpush.bf16.msrb.mxu2 %v4981_v35  ;;  %v5488_v35 = vld [vmem:[#allocation6 + $0x428] sm:$0xf]  ;;  %3647 = vmatpush.bf16.msra.mxu1 %v5153_v24  ;;  %v6195_v24 = vld [vmem:[#allocation6 + $0x5ec] sm:$0xf] }
 0x1d1   :  { %3725 = vmatpush.bf16.msrb.mxu3 %v5157_v56  ;;  %v5489_v41 = vor.u32 %v6141_v30, %v5488_v35  ;;  %v5714_v56 = vld [vmem:[#allocation6 + $0x5f8] sm:$0xf0]  ;;  %v5696_v30 = vld [vmem:[#allocation6 + $0x5c8] sm:$0xf] }
 0x1d2   :  { %v3484_v33 = vpop.f32.mrf.mxu0  ;;  %v5717_v35 = vor.u32 %v6195_v24, %v5714_v56  ;;  %v5616_v24 = vld [vmem:[#allocation6 + $0x528] sm:$0xf]  ;;  %v6173_v56 = vld [vmem:[#allocation6 + $0x534] sm:$0xf0] }
 0x1d3   :  { %v3485_v36 = vadd.f32 %v3484_v33, %v2507_v43  ;;  %v3497_v40 = vpop.f32.mrf.mxu1  ;;  %3600 = vmatmul.bf16.vlgmr.msrb.gmra.mxu1 %v6476_v51  ;;  %3678 = vmatmul.bf16.vlgmr.msra.gmra.mxu3 %v6476_v51  ;;  %v6091_v43 = vld [vmem:[#allocation6 + $0x2ac] sm:$0xf]  ;;  %v6193_v33 = vld [vmem:[#allocation6 + $0x5d4] sm:$0xf0] }
 0x1d4   :  { %3716 = vmatpush.bf16.msrb.mxu2 %v4965_v15  ;;  %v5525_v15 = vor.u32 %v6147_v21, %v5522_v31  ;;  %3648 = vmatpush.bf16.msra.mxu1 %v5137_v37  ;;  %v5301_v21 = vor.u32 %v6091_v43, %v5298_v26  ;;  %v6191_v37 = vld [vmem:[#allocation6 + $0x5cc] sm:$0xf]  ;;  %v5618_v26 = vld [vmem:[#allocation6 + $0x538] sm:$0xf0] }
 0x1d5   :  { %v3498_v46 = vadd.f32 %v3497_v40, %v3485_v36  ;;  %3726 = vmatpush.bf16.msrb.mxu3 %v5141_v38  ;;  %v5698_v38 = vld [vmem:[#allocation6 + $0x5d8] sm:$0xf0]  ;;  %v6087_v36 = vld [vmem:[#allocation6 + $0x28c] sm:$0xf] }
 0x1d6   :  { %v5282_v40 = vld [vmem:[#allocation6 + $0x298] sm:$0xf0]  ;;  %v5701_v48 = vor.u32 %v6191_v37, %v5698_v38  ;;  %v6171_v43 = vld [vmem:[#allocation6 + $0x52c] sm:$0xf] }
 0x1d7   :  { %3717 = vmatmul.bf16.vlgmr.msrb.gmra.mxu2 %v6465_v20  ;;  %v5505_v20 = vor.u32 %v6145_v8, %v5504_v23  ;;  %v5712_v23 = vld [vmem:[#allocation6 + $0x5e8] sm:$0xf]  ;;  %v6197_v8 = vld [vmem:[#allocation6 + $0x5f4] sm:$0xf0]  ;;  %v5285_v25 = vor.u32 %v6087_v36, %v5282_v40  ;;  %v5458_v37 = vld [vmem:[#allocation6 + $0x3f8] sm:$0xf0] }
 0x1d8   :  { %3761 = vmatpush.bf16.msra.mxu2 %v5589_v4  ;;  %v6143_v4 = vld [vmem:[#allocation6 + $0x44c] sm:$0xf]  ;;  %3649 = vmatpush.bf16.msra.mxu1 %v5121_v53 }
 0x1d9   :  { %3688 = vmatpush.bf16.msrb.mxu0 %v5505_v20  ;;  %v5509_v54 = vor.u32 %v6143_v4, %v5506_v49  ;;  %3727 = vmatpush.bf16.msrb.mxu3 %v5125_v55  ;;  %v6135_v20 = vld [vmem:[#allocation6 + $0x40c] sm:$0xf]  ;;  %v5685_v4 = vor.u32 %v6187_v44, %v5682_v45  ;;  %v5664_v49 = vld [vmem:[#allocation6 + $0x588] sm:$0xf]  ;;  %v6185_v55 = vld [vmem:[#allocation6 + $0x594] sm:$0xf0] }
 0x1da   :  { %v3486_v3 = vpop.f32.mrf.mxu0  ;;  %v5477_v31 = vor.u32 %v6135_v20, %v5474_v27  ;;  %v5665_v6 = vor.u32 %v6185_v55, %v5664_v49  ;;  %v6123_v45 = vld [vmem:[#allocation6 + $0x3ac] sm:$0xf]  ;;  %v5394_v55 = vld [vmem:[#allocation6 + $0x378] sm:$0xf0] }
 0x1db   :  { %v3499_v19 = vpop.f32.mrf.mxu1 }
 0x1dc   :  { %3762 = vmatpush.bf16.msra.mxu2 %v5573_v10  ;;  %v3510_v10 = vpop.f32.mrf.mxu2  ;;  %3650 = vmatpush.bf16.msra.mxu1 %v5105_v13  ;;  %v6175_v19 = vld [vmem:[#allocation6 + $0x54c] sm:$0xf] }
 0x1dd   :  { %3689 = vmatpush.bf16.msrb.mxu0 %v5489_v41  ;;  %v6517_v12 = vadd.f32 %v3510_v10, %v3498_v46  ;;  %3728 = vmatpush.bf16.msrb.mxu3 %v5109_v14  ;;  %v5697_v41 = vor.u32 %v6193_v33, %v5696_v30  ;;  %v5266_v46 = vld [vmem:[#allocation6 + $0x278] sm:$0xf0]  ;;  %v6179_v10 = vld [vmem:[#allocation6 + $0x56c] sm:$0xf]  ;;  %v6169_v30 = vld [vmem:[#allocation6 + $0x514] sm:$0xf0] }
 0x1de   :  { %v5269_v53 = vor.u32 %v6083_v59, %v5266_v46  ;;  %v5653_v14 = vor.u32 %v6179_v10, %v5650_v34  ;;  %v6131_v33 = vld [vmem:[#allocation6 + $0x3ec] sm:$0xf]  ;;  %v5426_v59 = vld [vmem:[#allocation6 + $0x3b8] sm:$0xf0] }
 0x1df   :  { %v5461_v40 = vor.u32 %v6131_v33, %v5458_v37  ;;  %v5429_v46 = vor.u32 %v6123_v45, %v5426_v59  ;;  %v2509_v33 = vperm.slane %v6512_v22, 2 }
 0x1e0   :  { %3763 = vmatpush.bf16.msra.mxu2 %v5557_v5  ;;  %v5090_v5 = vld [vmem:[#allocation6 + $0x118] sm:$0xf0]  ;;  %3651 = vmatpush.bf16.msra.mxu1 %v5089_v28  ;;  %v2508_v28 = vperm.slane %v6512_v22, 1 }
 0x1e1   :  { %3690 = vmatpush.bf16.msrb.mxu0 %v5473_v58  ;;  %v5093_v32 = vor.u32 %v6039_v18, %v5090_v5  ;;  %v5666_v58 = vld [vmem:[#allocation6 + $0x598] sm:$0xf0]  ;;  %v6177_v18 = vld [vmem:[#allocation6 + $0x554] sm:$0xf0] }
 0x1e2   :  { %v5634_v5 = vld [vmem:[#allocation6 + $0x558] sm:$0xf0] }
 0x1e3   :  { %3729 = vmatpush.bf16.msrb.mxu3 %v5093_v32  ;;  %3652 = vmatmul.bf16.vlgmr.msra.gmra.mxu1 %v6467_v50  ;;  %v5617_v32 = vor.u32 %v6173_v56, %v5616_v24 }
 0x1e4   :  { %3764 = vmatpush.bf16.msra.mxu2 %v5541_v29  ;;  %3691 = vmatmul.bf16.vlgmr.msrb.gmra.mxu0 %v6494_v0  ;;  %v5713_v29 = vor.u32 %v6197_v8, %v5712_v23  ;;  %v3512_v39 = vpop.f32.mrf.mxu2  ;;  %v6071_v23 = vld [vmem:[#allocation6 + $0x20c] sm:$0xf]  ;;  %v5218_v8 = vld [vmem:[#allocation6 + $0x218] sm:$0xf0] }
 0x1e5   :  { %3735 = vmatpush.bf16.msra.mxu0 %v5333_v7  ;;  %v5648_v7 = vld [vmem:[#allocation6 + $0x568] sm:$0xf] }
 0x1e6   :  { %3696 = vmatpush.bf16.msrb.mxu1 %v5713_v29  ;;  %3730 = vmatmul.bf16.vlgmr.msrb.gmra.mxu3 %v6467_v50  ;;  %v5669_v50 = vor.u32 %v6183_v57, %v5666_v58  ;;  %v3523_v63 = vpop.f32.mrf.mxu3  ;;  %v5649_v13 = vor.u32 %v6181_v60, %v5648_v7  ;;  %v5621_v29 = vor.u32 %v6171_v43, %v5618_v26  ;;  %v6111_v58 = vld [vmem:[#allocation6 + $0x34c] sm:$0xf] }
 0x1e7   :  { %3774 = vmatpush.bf16.msra.mxu3 %v5717_v35  ;;  %v6524_v3 = vadd.f32 %v3523_v63, %v6517_v12  ;;  %v5221_v12 = vor.u32 %v6071_v23, %v5218_v8  ;;  %v5600_v35 = vld [vmem:[#allocation6 + $0x508] sm:$0xf] }
 0x1e8   :  { %3765 = vmatpush.bf16.msra.mxu2 %v5525_v15  ;;  %v6189_v15 = vld [vmem:[#allocation6 + $0x5b4] sm:$0xf0]  ;;  %v5601_v38 = vor.u32 %v6169_v30, %v5600_v35 }
 0x1e9   :  { %3736 = vmatpush.bf16.msra.mxu0 %v5317_v1  ;;  %v5681_v47 = vor.u32 %v6189_v15, %v5680_v9  ;;  %v5633_v1 = vor.u32 %v6177_v18, %v5632_v16  ;;  %v5442_v9 = vld [vmem:[#allocation6 + $0x3d8] sm:$0xf0] }
 0x1ea   :  { %3697 = vmatpush.bf16.msrb.mxu1 %v5697_v41 }
 0x1eb   :  { %3775 = vmatpush.bf16.msra.mxu3 %v5701_v48  ;;  %v6127_v48 = vld [vmem:[#allocation6 + $0x3cc] sm:$0xf] }
 0x1ec   :  { %3766 = vmatpush.bf16.msra.mxu2 %v5509_v54  ;;  %v5253_v54 = vor.u32 %v6079_v62, %v5250_v2  ;;  %v5445_v44 = vor.u32 %v6127_v48, %v5442_v9  ;;  %v5378_v62 = vld [vmem:[#allocation6 + $0x358] sm:$0xf0] }
 0x1ed   :  { %3737 = vmatpush.bf16.msra.mxu0 %v5301_v21  ;;  %v6167_v21 = vld [vmem:[#allocation6 + $0x50c] sm:$0xf]  ;;  %v5381_v2 = vor.u32 %v6111_v58, %v5378_v62 }
 0x1ee   :  { %3698 = vmatpush.bf16.msrb.mxu1 %v5681_v47  ;;  %v3525_v20 = vpop.f32.mrf.mxu3 }
 0x1ef   :  { %3776 = vmatpush.bf16.msra.mxu3 %v5685_v4  ;;  %v5410_v4 = vld [vmem:[#allocation6 + $0x398] sm:$0xf0] }
 0x1f0   :  { %3767 = vmatpush.bf16.msra.mxu2 %v5493_v61  ;;  %v5637_v61 = vor.u32 %v6175_v19, %v5634_v5 }
 0x1f1   :  { %3738 = vmatpush.bf16.msra.mxu0 %v5285_v25 }
 0x1f2   :  { %3699 = vmatpush.bf16.msrb.mxu1 %v5665_v6  ;;  %v6107_v6 = vld [vmem:[#allocation6 + $0x32c] sm:$0xf] }
 0x1f3   :  { %3777 = vmatpush.bf16.msra.mxu3 %v5669_v50  ;;  %v5362_v50 = vld [vmem:[#allocation6 + $0x338] sm:$0xf0] }
 0x1f4   :  { %3768 = vmatpush.bf16.msra.mxu2 %v5477_v31  ;;  %v5602_v31 = vld [vmem:[#allocation6 + $0x518] sm:$0xf0]  ;;  %v5365_v7 = vor.u32 %v6107_v6, %v5362_v50 }
 0x1f5   :  { %3739 = vmatpush.bf16.msra.mxu0 %v5269_v53  ;;  %v5605_v39 = vor.u32 %v6167_v21, %v5602_v31  ;;  %v6115_v53 = vld [vmem:[#allocation6 + $0x36c] sm:$0xf] }
 0x1f6   :  { %3700 = vmatpush.bf16.msrb.mxu1 %v5649_v13  ;;  %v5397_v57 = vor.u32 %v6115_v53, %v5394_v55 }
 0x1f7   :  { %3769 = vmatmul.bf16.vlgmr.msra.gmra.mxu2 %v6494_v0  ;;  %v5234_v0 = vld [vmem:[#allocation6 + $0x238] sm:$0xf0]  ;;  %3778 = vmatpush.bf16.msra.mxu3 %v5653_v14 }
 0x1f8   :  { %v5237_v17 = vor.u32 %v6075_v11, %v5234_v0 }
 0x1f9   :  { %3740 = vmatpush.bf16.msra.mxu0 %v5253_v54  ;;  %v5346_v54 = vld [vmem:[#allocation6 + $0x318] sm:$0xf0] }
 0x1fa   :  { %v3562_v27 = vpop.f32.mrf.mxu2  ;;  %3701 = vmatpush.bf16.msrb.mxu1 %v5633_v1 }
 0x1fb   :  { %3779 = vmatpush.bf16.msra.mxu3 %v5637_v61  ;;  %v3563_v36 = vadd.f32 %v3562_v27, %v2508_v28  ;;  %v3575_v41 = vpop.f32.mrf.mxu3 }
 0x1fd   :  { %3741 = vmatpush.bf16.msra.mxu0 %v5237_v17  ;;  %v3576_v15 = vadd.f32 %v3575_v41, %v3563_v36 }
 0x1fe   :  { %3702 = vmatpush.bf16.msrb.mxu1 %v5617_v32 }
 0x1ff   :  { %3780 = vmatpush.bf16.msra.mxu3 %v5621_v29 }
 0x201   :  { %3742 = vmatpush.bf16.msra.mxu0 %v5221_v12 }
 0x202   :  { %v3564_v25 = vpop.f32.mrf.mxu2  ;;  %3703 = vmatpush.bf16.msrb.mxu1 %v5601_v38 }
 0x203   :  { %3781 = vmatpush.bf16.msra.mxu3 %v5605_v39  ;;  %v3577_v47 = vpop.f32.mrf.mxu3 }
 0x204   :  { %3743 = vmatmul.bf16.vlgmr.msra.gmra.mxu0 %v6469_v52  ;;  %v6119_v52 = vld [vmem:[#allocation6 + $0x38c] sm:$0xf]  ;;  %v2510_v47 = vperm.slane %v6512_v22, 3 }
 0x205   :  { %3704 = vmatmul.bf16.vlgmr.msrb.gmra.mxu1 %v6507_v42  ;;  %v5413_v49 = vor.u32 %v6119_v52, %v5410_v4 }
 0x206   :  { %3748 = vmatpush.bf16.msra.mxu1 %v5461_v40  ;;  %3782 = vmatmul.bf16.vlgmr.msra.gmra.mxu3 %v6507_v42  ;;  %v6103_v42 = vld [vmem:[#allocation6 + $0x30c] sm:$0xf] }
 0x207   :  { %v5349_v60 = vor.u32 %v6103_v42, %v5346_v54 }
 0x20a   :  { %3749 = vmatpush.bf16.msra.mxu1 %v5445_v44 }
 0x20e   :  { %3750 = vmatpush.bf16.msra.mxu1 %v5429_v46 }
 0x212   :  { %3751 = vmatpush.bf16.msra.mxu1 %v5413_v49 }
 0x216   :  { %3752 = vmatpush.bf16.msra.mxu1 %v5397_v57 }
 0x218   :  { %v3536_v10 = vpop.f32.mrf.mxu0 }
 0x219   :  { %v3537_v18 = vadd.f32 %v3536_v10, %v6524_v3 }
 0x21a   :  { %3753 = vmatpush.bf16.msra.mxu1 %v5381_v2 }
 0x21e   :  { %3754 = vmatpush.bf16.msra.mxu1 %v5365_v7  ;;  %v3614_v34 = vpop.f32.mrf.mxu2 }
 0x220   :  { %v3538_v63 = vpop.f32.mrf.mxu0 }
 0x222   :  { %3755 = vmatpush.bf16.msra.mxu1 %v5349_v60 }
 0x225   :  { %3756 = vmatmul.bf16.vlgmr.msra.gmra.mxu1 %v6476_v51 }
 0x226   :  { %v3616_v11 = vpop.f32.mrf.mxu2 }
 0x228   :  { %v3588_v0 = vpop.f32.mrf.mxu0 }
 0x229   :  { %v3589_v24 = vadd.f32 %v3588_v0, %v3576_v15 }
 0x230   :  { %v3590_v14 = vpop.f32.mrf.mxu0 }
 0x238   :  { %v3640_v17 = vpop.f32.mrf.mxu0 }
 0x239   :  { %v3641_v37 = vadd.f32 %v3640_v17, %v2509_v33 }
 0x23a   :  { %v3666_v13 = vpop.f32.mrf.mxu2 }
 0x240   :  { %v3549_v19 = vpop.f32.mrf.mxu1  ;;  %v3642_v23 = vpop.f32.mrf.mxu0 }
 0x241   :  { %v3550_v5 = vadd.f32 %v3549_v19, %v3537_v18 }
 0x242   :  { %v3668_v16 = vpop.f32.mrf.mxu2 }
 0x243   :  { %3787 = vst [vmem:[%s6551_s5] sm:$0xff] %v3550_v5 }
 0x246   :  { %v3627_v8 = vpop.f32.mrf.mxu3 }
 0x248   :  { %v3551_v1 = vpop.f32.mrf.mxu1 }
 0x24e   :  { %v3629_v61 = vpop.f32.mrf.mxu3 }
 0x250   :  { %v3601_v12 = vpop.f32.mrf.mxu1 }
 0x251   :  { %v3602_v56 = vadd.f32 %v3601_v12, %v3589_v24 }
 0x253   :  { %v3615_v43 = vadd.f32 %v3614_v34, %v3602_v56 }
 0x255   :  { %v3628_v20 = vadd.f32 %v3627_v8, %v3615_v43 }
 0x256   :  { %v3679_v27 = vpop.f32.mrf.mxu3 }
 0x257   :  { %3788 = vst [vmem:[%s6551_s5 + $0x8] sm:$0xff] %v3628_v20 }
 0x258   :  { %v3603_v3 = vpop.f32.mrf.mxu1 }
 0x25a   :  { %v3718_v51 = vpop.f32.mrf.mxu2 }
 0x25b   :  { %v3719_v52 = vadd.f32 %v3718_v51, %v2510_v47 }
 0x25e   :  { %v3681_v32 = vpop.f32.mrf.mxu3 }
 0x260   :  { %v3653_v29 = vpop.f32.mrf.mxu1 }
 0x261   :  { %v3692_v28 = vpop.f32.mrf.mxu0  ;;  %v3654_v39 = vadd.f32 %v3653_v29, %v3641_v37 }
 0x262   :  { %v3720_v26 = vpop.f32.mrf.mxu2 }
 0x263   :  { %v3667_v40 = vadd.f32 %v3666_v13, %v3654_v39 }
 0x265   :  { %v3680_v48 = vadd.f32 %v3679_v27, %v3667_v40 }
 0x267   :  { %v3693_v9 = vadd.f32 %v3692_v28, %v3680_v48 }
 0x268   :  { %v3655_v21 = vpop.f32.mrf.mxu1 }
 0x269   :  { %v3694_v35 = vpop.f32.mrf.mxu0  ;;  %v3731_v30 = vpop.f32.mrf.mxu3 }
 0x26a   :  { %v3732_v4 = vadd.f32 %v3731_v30, %v3719_v52 }
 0x271   :  { %v3733_v38 = vpop.f32.mrf.mxu3 }
 0x27a   :  { %v3770_v31 = vpop.f32.mrf.mxu2 }
 0x281   :  { %v3744_v41 = vpop.f32.mrf.mxu0 }
 0x282   :  { %v3772_v36 = vpop.f32.mrf.mxu2  ;;  %v3705_v25 = vpop.f32.mrf.mxu1  ;;  %v3745_v49 = vadd.f32 %v3744_v41, %v3732_v4 }
 0x283   :  { %v3706_v15 = vadd.f32 %v3705_v25, %v3693_v9 }
 0x285   :  { %3789 = vst [vmem:[%s6551_s5 + $0x10] sm:$0xff] %v3706_v15 }
 0x289   :  { %v3746_v44 = vpop.f32.mrf.mxu0  ;;  %v3783_v45 = vpop.f32.mrf.mxu3 }
 0x28a   :  { %v3707_v59 = vpop.f32.mrf.mxu1 }
 0x291   :  { %v3785_v46 = vpop.f32.mrf.mxu3 }
 0x2a2   :  { %v3757_v53 = vpop.f32.mrf.mxu1 }
 0x2a3   :  { %v3758_v55 = vadd.f32 %v3757_v53, %v3745_v49 }
 0x2a5   :  { %v3771_v57 = vadd.f32 %v3770_v31, %v3758_v55 }
 0x2a7   :  { %v3784_v58 = vadd.f32 %v3783_v45, %v3771_v57 }
 0x2a9   :  { %3790 = vst [vmem:[%s6551_s5 + $0x18] sm:$0xff] %v3784_v58 }
 0x2aa   :  { %v3759_v62 = vpop.f32.mrf.mxu1 }
 0x2ab   :  { %3795 = vsyncpa [#allocation3], 1 }
 0x2ac   :  { %3796 = vsyncpa [#allocation5], 1 }
 0x2ad   :  { %3797 = vsyncpa [#allocation8], 1 }

</bundles_post_ra>
